<compile_context>
chip_gen: v7x
topology: tpu7x:2x2x1
jax: 0.10.0
libtpu: 0.0.40
codegen_flags: <defaults>
</compile_context>

<pallas_src>
import math
import jax
import jax.numpy as jnp
from jax import lax
from jax.experimental import pallas as pl
from jax.experimental.pallas import tpu as pltpu

# ----------------------------- config (small synthetic backbone) -----------------------------
VOCAB = 100
TYPE_VOCAB = 2
MAX_POS = 16
HIDDEN = 32            # self.feature_dim = model.config.hidden_size
N_HEADS = 4
HEAD_DIM = HIDDEN // N_HEADS
INTER = 64
N_LAYERS = 2
NUM_CLASSES = 16
BATCH = 2
SEQ = 8
LN_EPS = 1e-12
DROPOUT_P = 0.1        # nn.Dropout -> identity at inference (eval mode)

EMB_ROWS = VOCAB + TYPE_VOCAB + MAX_POS + 2   # packed table: word | type | pos | emb_ln_g | emb_ln_b
W_LANES = 3 * HIDDEN                          # 96 : lane width of packed per-layer weight slab
W_ROWS = 3 * HIDDEN + INTER                   # 160: sublane rows per layer (Wqkv|Wo|W1|W2)

# ArcFace (ArcMarginProduct) parameters
ARC_S = 30.0
ARC_M = 0.5
COS_M = math.cos(ARC_M)
SIN_M = math.sin(ARC_M)
TH = math.cos(math.pi - ARC_M)
MM = math.sin(math.pi - ARC_M) * ARC_M


# ----------------------------------- in-kernel helpers -----------------------------------
def _layer_norm(x, g, b):
    mu = jnp.mean(x, axis=-1, keepdims=True)
    var = jnp.mean((x - mu) ** 2, axis=-1, keepdims=True)
    return (x - mu) * lax.rsqrt(var + LN_EPS) * g + b


def _erf_approx(x):
    # Abramowitz & Stegun 7.1.26 (|error| < 1.5e-7), VPU/EUP ops only.
    a1, a2, a3, a4, a5 = 0.254829592, -0.284496736, 1.421413741, -1.453152027, 1.061405429
    p = 0.3275911
    sgn = jnp.where(x >= 0.0, 1.0, -1.0)
    ax = jnp.abs(x)
    t = 1.0 / (1.0 + p * ax)
    poly = ((((a5 * t + a4) * t + a3) * t + a2) * t + a1) * t
    return sgn * (1.0 - poly * jnp.exp(-ax * ax))


def _gelu_exact(x):
    # exact (erf) GELU — matches the PyTorch / HF BERT default ("gelu")
    return 0.5 * x * (1.0 + _erf_approx(x * (1.0 / math.sqrt(2.0))))


# ----------------------------------- fused forward kernel -----------------------------------
def fused_forward_kernel(label_ref,                 # SMEM scalar-prefetch: [B] int32
                         tok_ref,                   # [B, S, 2] int32  (word id, type id)
                         mask_ref,                  # [B, 1, S] f32
                         table_ref,                 # [EMB_ROWS, H] bf16 (word|type|pos|ln_g|ln_b)
                         wmats_ref,                 # [L, 160, 96] bf16 (Wqkv|Wo|W1|W2 row-packed)
                         vecs_ref,                  # [L, 8, 96] f32   (biases / LN params, one per row)
                         arcw_ref,                  # [H, C] f32 (column-normalized ArcFace weight)
                         out_ref):                  # [B, C] f32
    S = SEQ
    inv_sqrt_d = 1.0 / math.sqrt(HEAD_DIM)

    # packed embedding table (also holds embedding-LN params as its last two rows)
    table = table_ref[...]                                         # [EMB_ROWS, H] bf16
    eg = table[EMB_ROWS - 2:EMB_ROWS - 1, :].astype(jnp.float32)   # [1, H]
    eb = table[EMB_ROWS - 1:EMB_ROWS, :].astype(jnp.float32)       # [1, H]

    row_iota = lax.broadcasted_iota(jnp.int32, (S, EMB_ROWS), 1)
    pos_col = lax.broadcasted_iota(jnp.int32, (S, 1), 0)           # position ids 0..S-1

    logits_rows = []
    for b in range(BATCH):                                         # static unroll over batch
        # ----- in-kernel embedding lookup: "3-hot" @ packed table (one MXU matmul) -----
        ids = tok_ref[b]                                           # [S, 2] int32
        wid = ids[:, 0:1]
        tid = ids[:, 1:2]
        hot = ((row_iota == wid)
               | (row_iota == VOCAB + tid)
               | (row_iota == VOCAB + TYPE_VOCAB + pos_col))
        hot = hot.astype(jnp.float32).astype(jnp.bfloat16)         # [S, EMB_ROWS]
        emb = jnp.dot(hot, table, preferred_element_type=jnp.float32)   # word+type+pos summed
        x = _layer_norm(emb, eg, eb)                               # [S, H] f32

        # additive attention bias (mask is a compact [1, S] row)
        bias = (1.0 - mask_ref[b]) * -1e9                          # [1, S]

        # ----- encoder layers (statically unrolled) -----
        for l in range(N_LAYERS):
            wm = wmats_ref[l]                                      # [160, 96] bf16 (one load)
            wqkv = wm[0:HIDDEN, :]                                 # [H, 3H]
            wo = wm[HIDDEN:2 * HIDDEN, 0:HIDDEN]                   # [H, H]
            w1 = wm[2 * HIDDEN:3 * HIDDEN, 0:INTER]                # [H, INTER]
            w2 = wm[3 * HIDDEN:W_ROWS, 0:HIDDEN]                   # [INTER, H]

            v_l = vecs_ref[l]                                      # [8, 96] f32
            bqkv = v_l[0:1, :]
            bo = v_l[1:2, 0:HIDDEN]
            ln1g = v_l[2:3, 0:HIDDEN]
            ln1b = v_l[3:4, 0:HIDDEN]
            b1 = v_l[4:5, 0:INTER]
            b2 = v_l[5:6, 0:HIDDEN]
            ln2g = v_l[6:7, 0:HIDDEN]
            ln2b = v_l[7:8, 0:HIDDEN]

            # fused QKV projection (bf16 operands, f32 accumulation)
            qkv = jnp.dot(x.astype(jnp.bfloat16), wqkv,
                          preferred_element_type=jnp.float32) + bqkv          # [S, 3H]

            # multi-head attention; contexts concatenated, then ONE output-projection matmul
            # TODO(synk): heads could be batched in a single 'hqd,hkd->hqk' contraction; kept as a
            # static per-head loop here (tiny shapes, avoids in-kernel reshape/transpose relayouts).
            ctxs = []
            for h in range(N_HEADS):
                q = qkv[:, h * HEAD_DIM:(h + 1) * HEAD_DIM] * inv_sqrt_d      # scale folded into Q
                k = qkv[:, HIDDEN + h * HEAD_DIM: HIDDEN + (h + 1) * HEAD_DIM]
                v = qkv[:, 2 * HIDDEN + h * HEAD_DIM: 2 * HIDDEN + (h + 1) * HEAD_DIM]
                s = lax.dot_general(q, k, (((1,), (1,)), ((), ())),
                                    preferred_element_type=jnp.float32) + bias    # [S, S]
                m = jnp.max(s, axis=-1, keepdims=True)
                p = jnp.exp(s - m)
                p = p * pl.reciprocal(jnp.sum(p, axis=-1, keepdims=True), approx=True)
                ctxs.append(jnp.dot(p, v, preferred_element_type=jnp.float32))    # [S, D]
            ctx_all = jnp.concatenate(ctxs, axis=-1)                              # [S, H]
            attn = jnp.dot(ctx_all.astype(jnp.bfloat16), wo,
                           preferred_element_type=jnp.float32) + bo
            x = _layer_norm(attn + x, ln1g, ln1b)

            # feed-forward
            h1 = jnp.dot(x.astype(jnp.bfloat16), w1,
                         preferred_element_type=jnp.float32) + b1
            h1 = _gelu_exact(h1)
            ff = jnp.dot(h1.astype(jnp.bfloat16), w2,
                         preferred_element_type=jnp.float32) + b2
            x = _layer_norm(ff + x, ln2g, ln2b)

        # ----- CLS pooling (last_hidden_state[:, 0, :]) -----
        feat = x[0:1, :]                                           # [1, H]
        # nn.Dropout(dropout): identity at inference time (eval mode)
        # TODO(synk): training-mode dropout mask not applied (inference semantics)

        # ----- ArcFace margin head (weight columns pre-normalized outside the kernel) -----
        feat_n = feat * lax.rsqrt(jnp.sum(feat * feat, axis=-1, keepdims=True) + 1e-12)
        cosine = jnp.dot(feat_n, arcw_ref[...], preferred_element_type=jnp.float32)   # [1, C]
        cosine = jnp.clip(cosine, -1.0, 1.0)
        sine = jnp.sqrt(jnp.clip(1.0 - cosine * cosine, 0.0, 1.0))
        phi = cosine * COS_M - sine * SIN_M
        phi = jnp.where(cosine > TH, phi, cosine - MM)             # easy_margin = False
        lbl = label_ref[b]                                         # scalar read from SMEM
        cls_iota = lax.broadcasted_iota(jnp.int32, (1, NUM_CLASSES), 1)
        one_hot = (cls_iota == lbl).astype(jnp.float32)
        logits_rows.append((one_hot * phi + (1.0 - one_hot) * cosine) * ARC_S)

    # single full-block store of the logits
    out_ref[...] = jnp.concatenate(logits_rows, axis=0)            # [B, C]


# ----------------------------------- cost estimate (advisory) -----------------------------------
def _cost_estimate():
    per_layer = (2 * SEQ * HIDDEN * 3 * HIDDEN                      # QKV
                 + N_HEADS * 2 * (2 * SEQ * SEQ * HEAD_DIM)         # scores + ctx
                 + 2 * SEQ * HIDDEN * HIDDEN                        # Wo
                 + 2 * (2 * SEQ * HIDDEN * INTER))                  # W1 + W2
    flops = BATCH * (2 * SEQ * EMB_ROWS * HIDDEN + N_LAYERS * per_layer
                     + 2 * HIDDEN * NUM_CLASSES)
    transcendentals = BATCH * N_LAYERS * SEQ * (SEQ * N_HEADS + INTER) + 64
    bytes_accessed = (N_LAYERS * W_ROWS * W_LANES * 2                # bf16 weight slab
                      + EMB_ROWS * HIDDEN * 2                        # bf16 emb table
                      + N_LAYERS * 8 * W_LANES * 4                   # f32 vecs
                      + HIDDEN * NUM_CLASSES * 4                     # arc weight
                      + BATCH * SEQ * 2 * 4 + BATCH * SEQ * 4        # ids + mask
                      + BATCH * NUM_CLASSES * 4)                     # output
    return pl.CostEstimate(flops=flops, transcendentals=transcendentals,
                           bytes_accessed=bytes_accessed)


# ----------------------------------- model forward (wrapper) -----------------------------------
def forward(params, input_ids, token_type_ids, attention_mask, label):
    B, S = input_ids.shape
    tok = jnp.stack([input_ids, token_type_ids], axis=-1).astype(jnp.int32)   # [B, S, 2]
    mask = attention_mask.astype(jnp.float32).reshape(B, 1, S)

    out = pl.pallas_call(
        fused_forward_kernel,
        out_shape=jax.ShapeDtypeStruct((B, NUM_CLASSES), jnp.float32),
        grid_spec=pltpu.PrefetchScalarGridSpec(
            num_scalar_prefetch=1,                     # label -> SMEM
            grid=(1,),                                 # single invocation; batch unrolled in-kernel
            in_specs=[
                pl.BlockSpec((B, S, 2), lambda i, lbl: (0, 0, 0)),                   # tok ids
                pl.BlockSpec((B, 1, S), lambda i, lbl: (0, 0, 0)),                   # mask
                pl.BlockSpec((EMB_ROWS, HIDDEN), lambda i, lbl: (0, 0)),             # packed emb table
                pl.BlockSpec((N_LAYERS, W_ROWS, W_LANES), lambda i, lbl: (0, 0, 0)),  # packed weights
                pl.BlockSpec((N_LAYERS, 8, W_LANES), lambda i, lbl: (0, 0, 0)),       # packed vectors
                pl.BlockSpec((HIDDEN, NUM_CLASSES), lambda i, lbl: (0, 0)),          # arc weight
            ],
            out_specs=pl.BlockSpec((B, NUM_CLASSES), lambda i, lbl: (0, 0)),
        ),
        compiler_params=pltpu.CompilerParams(dimension_semantics=("arbitrary",)),
        cost_estimate=_cost_estimate(),
    )(label.astype(jnp.int32), tok, mask,
      params['emb_table'], params['wmats'], params['vecs'], params['arc_wn'])

    return out


# ----------------------------------- parameter init -----------------------------------
def init_params(key):
    keys = iter(jax.random.split(key, 16))

    def nrm(shape, scale=0.02):
        return scale * jax.random.normal(next(keys), shape, jnp.float32)

    # packed embedding table: word | type | pos | emb_ln_gamma | emb_ln_beta  -> [120, 32] bf16
    word = nrm((VOCAB, HIDDEN))
    typ = nrm((TYPE_VOCAB, HIDDEN))
    pos = nrm((MAX_POS, HIDDEN))
    emb_ln_g = jnp.ones((1, HIDDEN), jnp.float32)
    emb_ln_b = jnp.zeros((1, HIDDEN), jnp.float32)
    emb_table = jnp.concatenate([word, typ, pos, emb_ln_g, emb_ln_b], axis=0).astype(jnp.bfloat16)

    # per-layer weight slab [L, 160, 96] bf16: rows 0:32 Wqkv, 32:64 Wo, 64:96 W1, 96:160 W2
    wqkv = nrm((N_LAYERS, HIDDEN, 3 * HIDDEN))
    wo = nrm((N_LAYERS, HIDDEN, HIDDEN))
    w1 = nrm((N_LAYERS, HIDDEN, INTER))
    w2 = nrm((N_LAYERS, INTER, HIDDEN))

    def padl(a):
        return jnp.pad(a, ((0, 0), (0, 0), (0, W_LANES - a.shape[2])))

    wmats = jnp.concatenate([wqkv, padl(wo), padl(w1), padl(w2)], axis=1).astype(jnp.bfloat16)

    # per-layer vector pack [L, 8, 96] f32: bqkv, bo, ln1_g, ln1_b, b1, b2, ln2_g, ln2_b
    bqkv = jnp.zeros((N_LAYERS, 1, 3 * HIDDEN), jnp.float32)
    bo = jnp.zeros((N_LAYERS, 1, HIDDEN), jnp.float32)
    ln1_g = jnp.ones((N_LAYERS, 1, HIDDEN), jnp.float32)
    ln1_b = jnp.zeros((N_LAYERS, 1, HIDDEN), jnp.float32)
    b1 = jnp.zeros((N_LAYERS, 1, INTER), jnp.float32)
    b2 = jnp.zeros((N_LAYERS, 1, HIDDEN), jnp.float32)
    ln2_g = jnp.ones((N_LAYERS, 1, HIDDEN), jnp.float32)
    ln2_b = jnp.zeros((N_LAYERS, 1, HIDDEN), jnp.float32)
    vecs = jnp.concatenate([bqkv, padl(bo), padl(ln1_g), padl(ln1_b),
                            padl(b1), padl(b2), padl(ln2_g), padl(ln2_b)], axis=1)

    # ArcMarginProduct normalizes its weight every forward; constant at inference, so the column
    # normalization is hoisted out of the kernel and done once here.
    arc_w = nrm((HIDDEN, NUM_CLASSES), scale=0.1)
    arc_wn = arc_w / jnp.sqrt(jnp.sum(arc_w * arc_w, axis=0, keepdims=True) + 1e-12)

    return {'emb_table': emb_table, 'wmats': wmats, 'vecs': vecs, 'arc_wn': arc_wn}


# ----------------------------------- main -----------------------------------
if __name__ == "__main__":
    key = jax.random.PRNGKey(0)
    k_ids, k_lbl, k_par = jax.random.split(key, 3)

    input_ids = jax.random.randint(k_ids, (BATCH, SEQ), 0, VOCAB, dtype=jnp.int32)
    token_type_ids = jnp.zeros((BATCH, SEQ), jnp.int32)
    attention_mask = jnp.ones((BATCH, SEQ), jnp.int32).at[1, -2:].set(0)  # some padding
    label = jax.random.randint(k_lbl, (BATCH,), 0, NUM_CLASSES, dtype=jnp.int32)

    params = init_params(k_par)

    out = jax.jit(forward)(params, input_ids, token_type_ids, attention_mask, label)
    out = jax.block_until_ready(out)

    assert out.shape == (BATCH, NUM_CLASSES)
    assert bool(jnp.all(jnp.isfinite(out)))
    print("KERNEL_OK")
</pallas_src>

<mosaic_0001>
module attributes {stable_mosaic.version = 11 : i64} {
  func.func @fused_forward_kernel(%arg0: i32, %arg1: memref<2xi32, #tpu.memory_space<smem>>, %arg2: memref<2x8x2xi32, #tpu.memory_space<vmem>>, %arg3: memref<2x1x8xf32, #tpu.memory_space<vmem>>, %arg4: memref<120x32xbf16, #tpu.memory_space<vmem>>, %arg5: memref<2x160x96xbf16, #tpu.memory_space<vmem>>, %arg6: memref<2x8x96xf32, #tpu.memory_space<vmem>>, %arg7: memref<32x16xf32, #tpu.memory_space<vmem>>, %arg8: memref<2x16xf32, #tpu.memory_space<vmem>>) attributes {dimension_semantics = [#tpu.dimension_semantics<arbitrary>], iteration_bounds = array<i64: 1>, scalar_prefetch = 1 : i64, scratch_operands = 0 : i64, tpu.core_type = #tpu.core_type<tc>, window_params = [{pipeline_mode = #tpu.pipeline_mode<synchronous>, transform_indices = @transform_0, window_bounds = array<i64: 2, 8, 2>}, {pipeline_mode = #tpu.pipeline_mode<synchronous>, transform_indices = @transform_1, window_bounds = array<i64: 2, 1, 8>}, {pipeline_mode = #tpu.pipeline_mode<synchronous>, transform_indices = @transform_2, window_bounds = array<i64: 120, 32>}, {pipeline_mode = #tpu.pipeline_mode<synchronous>, transform_indices = @transform_3, window_bounds = array<i64: 2, 160, 96>}, {pipeline_mode = #tpu.pipeline_mode<synchronous>, transform_indices = @transform_4, window_bounds = array<i64: 2, 8, 96>}, {pipeline_mode = #tpu.pipeline_mode<synchronous>, transform_indices = @transform_5, window_bounds = array<i64: 32, 16>}, {pipeline_mode = #tpu.pipeline_mode<synchronous>, transform_indices = @transform_6, window_bounds = array<i64: 2, 16>}]} {
    %c0 = arith.constant 0 : index
    %c0_0 = arith.constant 0 : index
    %0 = vector.load %arg4[%c0, %c0_0] : memref<120x32xbf16, #tpu.memory_space<vmem>>, vector<120x32xbf16>
    %1 = vector.extract_strided_slice %0 {offsets = [118, 0], sizes = [1, 32], strides = [1, 1]} : vector<120x32xbf16> to vector<1x32xbf16>
    %2 = arith.extf %1 : vector<1x32xbf16> to vector<1x32xf32>
    %3 = vector.extract_strided_slice %0 {offsets = [119, 0], sizes = [1, 32], strides = [1, 1]} : vector<120x32xbf16> to vector<1x32xbf16>
    %4 = arith.extf %3 : vector<1x32xbf16> to vector<1x32xf32>
    %5 = tpu.iota {dimensions = array<i32: 1>} : vector<8x120xi32>
    %6 = tpu.iota {dimensions = array<i32: 0>} : vector<8x1xi32>
    %c0_1 = arith.constant 0 : index
    %c0_2 = arith.constant 0 : index
    %c0_3 = arith.constant 0 : index
    %7 = vector.load %arg2[%c0_1, %c0_2, %c0_3] : memref<2x8x2xi32, #tpu.memory_space<vmem>>, vector<1x8x2xi32>
    %8 = vector.shape_cast %7 : vector<1x8x2xi32> to vector<8x2xi32>
    %9 = vector.extract_strided_slice %8 {offsets = [0, 0], sizes = [8, 1], strides = [1, 1]} : vector<8x2xi32> to vector<8x1xi32>
    %10 = vector.extract_strided_slice %8 {offsets = [0, 1], sizes = [8, 1], strides = [1, 1]} : vector<8x2xi32> to vector<8x1xi32>
    %11 = vector.broadcast %9 : vector<8x1xi32> to vector<8x120xi32>
    %12 = arith.cmpi eq, %5, %11 : vector<8x120xi32>
    %c100_i32 = arith.constant 100 : i32
    %13 = vector.broadcast %c100_i32 : i32 to vector<8x1xi32>
    %14 = arith.addi %13, %10 : vector<8x1xi32>
    %15 = vector.broadcast %14 : vector<8x1xi32> to vector<8x120xi32>
    %16 = arith.cmpi eq, %5, %15 : vector<8x120xi32>
    %17 = arith.ori %12, %16 : vector<8x120xi1>
    %c102_i32 = arith.constant 102 : i32
    %18 = vector.broadcast %c102_i32 : i32 to vector<8x1xi32>
    %19 = arith.addi %18, %6 : vector<8x1xi32>
    %20 = vector.broadcast %19 : vector<8x1xi32> to vector<8x120xi32>
    %21 = arith.cmpi eq, %5, %20 : vector<8x120xi32>
    %22 = arith.ori %17, %21 : vector<8x120xi1>
    %23 = arith.extui %22 : vector<8x120xi1> to vector<8x120xi32>
    %24 = arith.sitofp %23 : vector<8x120xi32> to vector<8x120xf32>
    %25 = arith.truncf %24 : vector<8x120xf32> to vector<8x120xbf16>
    %cst = arith.constant dense<0.000000e+00> : vector<8x32xf32>
    %26 = tpu.matmul %25, %0, %cst {dimension_numbers = #tpu.dot_dimension_numbers<[1], [0], [0], [1], [0, 0, 1, 1], [], []>} : vector<8x120xbf16>, vector<120x32xbf16>, vector<8x32xf32> -> vector<8x32xf32>
    %cst_4 = arith.constant dense<0.000000e+00> : vector<8xf32>
    %27 = vector.multi_reduction <add>, %26, %cst_4 [1] : vector<8x32xf32> to vector<8xf32>
    %28 = vector.shape_cast %27 : vector<8xf32> to vector<8x1xf32>
    %cst_5 = arith.constant 3.200000e+01 : f32
    %29 = vector.broadcast %cst_5 : f32 to vector<8x1xf32>
    %30 = arith.divf %28, %29 : vector<8x1xf32>
    %31 = vector.broadcast %30 : vector<8x1xf32> to vector<8x32xf32>
    %32 = arith.subf %26, %31 : vector<8x32xf32>
    %33 = arith.mulf %32, %32 : vector<8x32xf32>
    %cst_6 = arith.constant dense<0.000000e+00> : vector<8xf32>
    %34 = vector.multi_reduction <add>, %33, %cst_6 [1] : vector<8x32xf32> to vector<8xf32>
    %35 = vector.shape_cast %34 : vector<8xf32> to vector<8x1xf32>
    %cst_7 = arith.constant 3.200000e+01 : f32
    %36 = vector.broadcast %cst_7 : f32 to vector<8x1xf32>
    %37 = arith.divf %35, %36 : vector<8x1xf32>
    %38 = vector.broadcast %30 : vector<8x1xf32> to vector<8x32xf32>
    %39 = arith.subf %26, %38 : vector<8x32xf32>
    %cst_8 = arith.constant 9.99999996E-13 : f32
    %40 = vector.broadcast %cst_8 : f32 to vector<8x1xf32>
    %41 = arith.addf %37, %40 : vector<8x1xf32>
    %42 = math.rsqrt %41 : vector<8x1xf32>
    %43 = vector.broadcast %42 : vector<8x1xf32> to vector<8x32xf32>
    %44 = arith.mulf %39, %43 : vector<8x32xf32>
    %45 = vector.broadcast %2 : vector<1x32xf32> to vector<8x32xf32>
    %46 = arith.mulf %44, %45 : vector<8x32xf32>
    %47 = vector.broadcast %4 : vector<1x32xf32> to vector<8x32xf32>
    %48 = arith.addf %46, %47 : vector<8x32xf32>
    %c0_9 = arith.constant 0 : index
    %c0_10 = arith.constant 0 : index
    %c0_11 = arith.constant 0 : index
    %49 = vector.load %arg3[%c0_9, %c0_10, %c0_11] : memref<2x1x8xf32, #tpu.memory_space<vmem>>, vector<1x1x8xf32>
    %50 = vector.shape_cast %49 : vector<1x1x8xf32> to vector<1x8xf32>
    %cst_12 = arith.constant 1.000000e+00 : f32
    %51 = vector.broadcast %cst_12 : f32 to vector<1x8xf32>
    %52 = arith.subf %51, %50 : vector<1x8xf32>
    %cst_13 = arith.constant -1.000000e+09 : f32
    %53 = vector.broadcast %cst_13 : f32 to vector<1x8xf32>
    %54 = arith.mulf %52, %53 : vector<1x8xf32>
    %c0_14 = arith.constant 0 : index
    %c0_15 = arith.constant 0 : index
    %c0_16 = arith.constant 0 : index
    %55 = vector.load %arg5[%c0_14, %c0_15, %c0_16] : memref<2x160x96xbf16, #tpu.memory_space<vmem>>, vector<1x160x96xbf16>
    %56 = vector.shape_cast %55 : vector<1x160x96xbf16> to vector<160x96xbf16>
    %57 = vector.extract_strided_slice %56 {offsets = [0, 0], sizes = [32, 96], strides = [1, 1]} : vector<160x96xbf16> to vector<32x96xbf16>
    %58 = vector.extract_strided_slice %56 {offsets = [32, 0], sizes = [32, 32], strides = [1, 1]} : vector<160x96xbf16> to vector<32x32xbf16>
    %59 = vector.extract_strided_slice %56 {offsets = [64, 0], sizes = [32, 64], strides = [1, 1]} : vector<160x96xbf16> to vector<32x64xbf16>
    %60 = vector.extract_strided_slice %56 {offsets = [96, 0], sizes = [64, 32], strides = [1, 1]} : vector<160x96xbf16> to vector<64x32xbf16>
    %c0_17 = arith.constant 0 : index
    %c0_18 = arith.constant 0 : index
    %c0_19 = arith.constant 0 : index
    %61 = vector.load %arg6[%c0_17, %c0_18, %c0_19] : memref<2x8x96xf32, #tpu.memory_space<vmem>>, vector<1x8x96xf32>
    %62 = vector.shape_cast %61 : vector<1x8x96xf32> to vector<8x96xf32>
    %63 = vector.extract_strided_slice %62 {offsets = [0, 0], sizes = [1, 96], strides = [1, 1]} : vector<8x96xf32> to vector<1x96xf32>
    %64 = vector.extract_strided_slice %62 {offsets = [1, 0], sizes = [1, 32], strides = [1, 1]} : vector<8x96xf32> to vector<1x32xf32>
    %65 = vector.extract_strided_slice %62 {offsets = [2, 0], sizes = [1, 32], strides = [1, 1]} : vector<8x96xf32> to vector<1x32xf32>
    %66 = vector.extract_strided_slice %62 {offsets = [3, 0], sizes = [1, 32], strides = [1, 1]} : vector<8x96xf32> to vector<1x32xf32>
    %67 = vector.extract_strided_slice %62 {offsets = [4, 0], sizes = [1, 64], strides = [1, 1]} : vector<8x96xf32> to vector<1x64xf32>
    %68 = vector.extract_strided_slice %62 {offsets = [5, 0], sizes = [1, 32], strides = [1, 1]} : vector<8x96xf32> to vector<1x32xf32>
    %69 = vector.extract_strided_slice %62 {offsets = [6, 0], sizes = [1, 32], strides = [1, 1]} : vector<8x96xf32> to vector<1x32xf32>
    %70 = vector.extract_strided_slice %62 {offsets = [7, 0], sizes = [1, 32], strides = [1, 1]} : vector<8x96xf32> to vector<1x32xf32>
    %71 = arith.truncf %48 : vector<8x32xf32> to vector<8x32xbf16>
    %cst_20 = arith.constant dense<0.000000e+00> : vector<8x96xf32>
    %72 = tpu.matmul %71, %57, %cst_20 {dimension_numbers = #tpu.dot_dimension_numbers<[1], [0], [0], [1], [0, 0, 1, 1], [], []>} : vector<8x32xbf16>, vector<32x96xbf16>, vector<8x96xf32> -> vector<8x96xf32>
    %73 = vector.broadcast %63 : vector<1x96xf32> to vector<8x96xf32>
    %74 = arith.addf %72, %73 : vector<8x96xf32>
    %75 = vector.extract_strided_slice %74 {offsets = [0, 0], sizes = [8, 8], strides = [1, 1]} : vector<8x96xf32> to vector<8x8xf32>
    %cst_21 = arith.constant 0.353553385 : f32
    %76 = vector.broadcast %cst_21 : f32 to vector<8x8xf32>
    %77 = arith.mulf %75, %76 : vector<8x8xf32>
    %78 = vector.extract_strided_slice %74 {offsets = [0, 32], sizes = [8, 8], strides = [1, 1]} : vector<8x96xf32> to vector<8x8xf32>
    %79 = vector.extract_strided_slice %74 {offsets = [0, 64], sizes = [8, 8], strides = [1, 1]} : vector<8x96xf32> to vector<8x8xf32>
    %cst_22 = arith.constant dense<0.000000e+00> : vector<8x8xf32>
    %80 = tpu.matmul %77, %78, %cst_22 {dimension_numbers = #tpu.dot_dimension_numbers<[1], [1], [0], [0], [0, 0, 1, 0], [], []>} : vector<8x8xf32>, vector<8x8xf32>, vector<8x8xf32> -> vector<8x8xf32>
    %81 = vector.broadcast %54 : vector<1x8xf32> to vector<8x8xf32>
    %82 = arith.addf %80, %81 : vector<8x8xf32>
    %cst_23 = arith.constant dense<0xFF800000> : vector<8xf32>
    %83 = vector.multi_reduction <maximumf>, %82, %cst_23 [1] : vector<8x8xf32> to vector<8xf32>
    %84 = vector.shape_cast %83 : vector<8xf32> to vector<8x1xf32>
    %85 = vector.broadcast %84 : vector<8x1xf32> to vector<8x8xf32>
    %86 = arith.subf %82, %85 : vector<8x8xf32>
    %87 = math.exp %86 : vector<8x8xf32>
    %cst_24 = arith.constant dense<0.000000e+00> : vector<8xf32>
    %88 = vector.multi_reduction <add>, %87, %cst_24 [1] : vector<8x8xf32> to vector<8xf32>
    %89 = vector.shape_cast %88 : vector<8xf32> to vector<8x1xf32>
    %90 = tpu.reciprocal %89 {approx = true} : vector<8x1xf32> -> vector<8x1xf32>
    %91 = vector.broadcast %90 : vector<8x1xf32> to vector<8x8xf32>
    %92 = arith.mulf %87, %91 : vector<8x8xf32>
    %cst_25 = arith.constant dense<0.000000e+00> : vector<8x8xf32>
    %93 = tpu.matmul %92, %79, %cst_25 {dimension_numbers = #tpu.dot_dimension_numbers<[1], [0], [0], [1], [0, 0, 1, 1], [], []>} : vector<8x8xf32>, vector<8x8xf32>, vector<8x8xf32> -> vector<8x8xf32>
    %94 = vector.extract_strided_slice %74 {offsets = [0, 8], sizes = [8, 8], strides = [1, 1]} : vector<8x96xf32> to vector<8x8xf32>
    %cst_26 = arith.constant 0.353553385 : f32
    %95 = vector.broadcast %cst_26 : f32 to vector<8x8xf32>
    %96 = arith.mulf %94, %95 : vector<8x8xf32>
    %97 = vector.extract_strided_slice %74 {offsets = [0, 40], sizes = [8, 8], strides = [1, 1]} : vector<8x96xf32> to vector<8x8xf32>
    %98 = vector.extract_strided_slice %74 {offsets = [0, 72], sizes = [8, 8], strides = [1, 1]} : vector<8x96xf32> to vector<8x8xf32>
    %cst_27 = arith.constant dense<0.000000e+00> : vector<8x8xf32>
    %99 = tpu.matmul %96, %97, %cst_27 {dimension_numbers = #tpu.dot_dimension_numbers<[1], [1], [0], [0], [0, 0, 1, 0], [], []>} : vector<8x8xf32>, vector<8x8xf32>, vector<8x8xf32> -> vector<8x8xf32>
    %100 = vector.broadcast %54 : vector<1x8xf32> to vector<8x8xf32>
    %101 = arith.addf %99, %100 : vector<8x8xf32>
    %cst_28 = arith.constant dense<0xFF800000> : vector<8xf32>
    %102 = vector.multi_reduction <maximumf>, %101, %cst_28 [1] : vector<8x8xf32> to vector<8xf32>
    %103 = vector.shape_cast %102 : vector<8xf32> to vector<8x1xf32>
    %104 = vector.broadcast %103 : vector<8x1xf32> to vector<8x8xf32>
    %105 = arith.subf %101, %104 : vector<8x8xf32>
    %106 = math.exp %105 : vector<8x8xf32>
    %cst_29 = arith.constant dense<0.000000e+00> : vector<8xf32>
    %107 = vector.multi_reduction <add>, %106, %cst_29 [1] : vector<8x8xf32> to vector<8xf32>
    %108 = vector.shape_cast %107 : vector<8xf32> to vector<8x1xf32>
    %109 = tpu.reciprocal %108 {approx = true} : vector<8x1xf32> -> vector<8x1xf32>
    %110 = vector.broadcast %109 : vector<8x1xf32> to vector<8x8xf32>
    %111 = arith.mulf %106, %110 : vector<8x8xf32>
    %cst_30 = arith.constant dense<0.000000e+00> : vector<8x8xf32>
    %112 = tpu.matmul %111, %98, %cst_30 {dimension_numbers = #tpu.dot_dimension_numbers<[1], [0], [0], [1], [0, 0, 1, 1], [], []>} : vector<8x8xf32>, vector<8x8xf32>, vector<8x8xf32> -> vector<8x8xf32>
    %113 = vector.extract_strided_slice %74 {offsets = [0, 16], sizes = [8, 8], strides = [1, 1]} : vector<8x96xf32> to vector<8x8xf32>
    %cst_31 = arith.constant 0.353553385 : f32
    %114 = vector.broadcast %cst_31 : f32 to vector<8x8xf32>
    %115 = arith.mulf %113, %114 : vector<8x8xf32>
    %116 = vector.extract_strided_slice %74 {offsets = [0, 48], sizes = [8, 8], strides = [1, 1]} : vector<8x96xf32> to vector<8x8xf32>
    %117 = vector.extract_strided_slice %74 {offsets = [0, 80], sizes = [8, 8], strides = [1, 1]} : vector<8x96xf32> to vector<8x8xf32>
    %cst_32 = arith.constant dense<0.000000e+00> : vector<8x8xf32>
    %118 = tpu.matmul %115, %116, %cst_32 {dimension_numbers = #tpu.dot_dimension_numbers<[1], [1], [0], [0], [0, 0, 1, 0], [], []>} : vector<8x8xf32>, vector<8x8xf32>, vector<8x8xf32> -> vector<8x8xf32>
    %119 = vector.broadcast %54 : vector<1x8xf32> to vector<8x8xf32>
    %120 = arith.addf %118, %119 : vector<8x8xf32>
    %cst_33 = arith.constant dense<0xFF800000> : vector<8xf32>
    %121 = vector.multi_reduction <maximumf>, %120, %cst_33 [1] : vector<8x8xf32> to vector<8xf32>
    %122 = vector.shape_cast %121 : vector<8xf32> to vector<8x1xf32>
    %123 = vector.broadcast %122 : vector<8x1xf32> to vector<8x8xf32>
    %124 = arith.subf %120, %123 : vector<8x8xf32>
    %125 = math.exp %124 : vector<8x8xf32>
    %cst_34 = arith.constant dense<0.000000e+00> : vector<8xf32>
    %126 = vector.multi_reduction <add>, %125, %cst_34 [1] : vector<8x8xf32> to vector<8xf32>
    %127 = vector.shape_cast %126 : vector<8xf32> to vector<8x1xf32>
    %128 = tpu.reciprocal %127 {approx = true} : vector<8x1xf32> -> vector<8x1xf32>
    %129 = vector.broadcast %128 : vector<8x1xf32> to vector<8x8xf32>
    %130 = arith.mulf %125, %129 : vector<8x8xf32>
    %cst_35 = arith.constant dense<0.000000e+00> : vector<8x8xf32>
    %131 = tpu.matmul %130, %117, %cst_35 {dimension_numbers = #tpu.dot_dimension_numbers<[1], [0], [0], [1], [0, 0, 1, 1], [], []>} : vector<8x8xf32>, vector<8x8xf32>, vector<8x8xf32> -> vector<8x8xf32>
    %132 = vector.extract_strided_slice %74 {offsets = [0, 24], sizes = [8, 8], strides = [1, 1]} : vector<8x96xf32> to vector<8x8xf32>
    %cst_36 = arith.constant 0.353553385 : f32
    %133 = vector.broadcast %cst_36 : f32 to vector<8x8xf32>
    %134 = arith.mulf %132, %133 : vector<8x8xf32>
    %135 = vector.extract_strided_slice %74 {offsets = [0, 56], sizes = [8, 8], strides = [1, 1]} : vector<8x96xf32> to vector<8x8xf32>
    %136 = vector.extract_strided_slice %74 {offsets = [0, 88], sizes = [8, 8], strides = [1, 1]} : vector<8x96xf32> to vector<8x8xf32>
    %cst_37 = arith.constant dense<0.000000e+00> : vector<8x8xf32>
    %137 = tpu.matmul %134, %135, %cst_37 {dimension_numbers = #tpu.dot_dimension_numbers<[1], [1], [0], [0], [0, 0, 1, 0], [], []>} : vector<8x8xf32>, vector<8x8xf32>, vector<8x8xf32> -> vector<8x8xf32>
    %138 = vector.broadcast %54 : vector<1x8xf32> to vector<8x8xf32>
    %139 = arith.addf %137, %138 : vector<8x8xf32>
    %cst_38 = arith.constant dense<0xFF800000> : vector<8xf32>
    %140 = vector.multi_reduction <maximumf>, %139, %cst_38 [1] : vector<8x8xf32> to vector<8xf32>
    %141 = vector.shape_cast %140 : vector<8xf32> to vector<8x1xf32>
    %142 = vector.broadcast %141 : vector<8x1xf32> to vector<8x8xf32>
    %143 = arith.subf %139, %142 : vector<8x8xf32>
    %144 = math.exp %143 : vector<8x8xf32>
    %cst_39 = arith.constant dense<0.000000e+00> : vector<8xf32>
    %145 = vector.multi_reduction <add>, %144, %cst_39 [1] : vector<8x8xf32> to vector<8xf32>
    %146 = vector.shape_cast %145 : vector<8xf32> to vector<8x1xf32>
    %147 = tpu.reciprocal %146 {approx = true} : vector<8x1xf32> -> vector<8x1xf32>
    %148 = vector.broadcast %147 : vector<8x1xf32> to vector<8x8xf32>
    %149 = arith.mulf %144, %148 : vector<8x8xf32>
    %cst_40 = arith.constant dense<0.000000e+00> : vector<8x8xf32>
    %150 = tpu.matmul %149, %136, %cst_40 {dimension_numbers = #tpu.dot_dimension_numbers<[1], [0], [0], [1], [0, 0, 1, 1], [], []>} : vector<8x8xf32>, vector<8x8xf32>, vector<8x8xf32> -> vector<8x8xf32>
    %151 = tpu.concatenate %93, %112, %131, %150 in 1 : vector<8x8xf32>, vector<8x8xf32>, vector<8x8xf32>, vector<8x8xf32> -> vector<8x32xf32>
    %152 = arith.truncf %151 : vector<8x32xf32> to vector<8x32xbf16>
    %cst_41 = arith.constant dense<0.000000e+00> : vector<8x32xf32>
    %153 = tpu.matmul %152, %58, %cst_41 {dimension_numbers = #tpu.dot_dimension_numbers<[1], [0], [0], [1], [0, 0, 1, 1], [], []>} : vector<8x32xbf16>, vector<32x32xbf16>, vector<8x32xf32> -> vector<8x32xf32>
    %154 = vector.broadcast %64 : vector<1x32xf32> to vector<8x32xf32>
    %155 = arith.addf %153, %154 : vector<8x32xf32>
    %156 = arith.addf %155, %48 : vector<8x32xf32>
    %cst_42 = arith.constant dense<0.000000e+00> : vector<8xf32>
    %157 = vector.multi_reduction <add>, %156, %cst_42 [1] : vector<8x32xf32> to vector<8xf32>
    %158 = vector.shape_cast %157 : vector<8xf32> to vector<8x1xf32>
    %cst_43 = arith.constant 3.200000e+01 : f32
    %159 = vector.broadcast %cst_43 : f32 to vector<8x1xf32>
    %160 = arith.divf %158, %159 : vector<8x1xf32>
    %161 = vector.broadcast %160 : vector<8x1xf32> to vector<8x32xf32>
    %162 = arith.subf %156, %161 : vector<8x32xf32>
    %163 = arith.mulf %162, %162 : vector<8x32xf32>
    %cst_44 = arith.constant dense<0.000000e+00> : vector<8xf32>
    %164 = vector.multi_reduction <add>, %163, %cst_44 [1] : vector<8x32xf32> to vector<8xf32>
    %165 = vector.shape_cast %164 : vector<8xf32> to vector<8x1xf32>
    %cst_45 = arith.constant 3.200000e+01 : f32
    %166 = vector.broadcast %cst_45 : f32 to vector<8x1xf32>
    %167 = arith.divf %165, %166 : vector<8x1xf32>
    %168 = vector.broadcast %160 : vector<8x1xf32> to vector<8x32xf32>
    %169 = arith.subf %156, %168 : vector<8x32xf32>
    %cst_46 = arith.constant 9.99999996E-13 : f32
    %170 = vector.broadcast %cst_46 : f32 to vector<8x1xf32>
    %171 = arith.addf %167, %170 : vector<8x1xf32>
    %172 = math.rsqrt %171 : vector<8x1xf32>
    %173 = vector.broadcast %172 : vector<8x1xf32> to vector<8x32xf32>
    %174 = arith.mulf %169, %173 : vector<8x32xf32>
    %175 = vector.broadcast %65 : vector<1x32xf32> to vector<8x32xf32>
    %176 = arith.mulf %174, %175 : vector<8x32xf32>
    %177 = vector.broadcast %66 : vector<1x32xf32> to vector<8x32xf32>
    %178 = arith.addf %176, %177 : vector<8x32xf32>
    %179 = arith.truncf %178 : vector<8x32xf32> to vector<8x32xbf16>
    %cst_47 = arith.constant dense<0.000000e+00> : vector<8x64xf32>
    %180 = tpu.matmul %179, %59, %cst_47 {dimension_numbers = #tpu.dot_dimension_numbers<[1], [0], [0], [1], [0, 0, 1, 1], [], []>} : vector<8x32xbf16>, vector<32x64xbf16>, vector<8x64xf32> -> vector<8x64xf32>
    %181 = vector.broadcast %67 : vector<1x64xf32> to vector<8x64xf32>
    %182 = arith.addf %180, %181 : vector<8x64xf32>
    %cst_48 = arith.constant 5.000000e-01 : f32
    %183 = vector.broadcast %cst_48 : f32 to vector<8x64xf32>
    %184 = arith.mulf %183, %182 : vector<8x64xf32>
    %cst_49 = arith.constant 0.707106769 : f32
    %185 = vector.broadcast %cst_49 : f32 to vector<8x64xf32>
    %186 = arith.mulf %182, %185 : vector<8x64xf32>
    %cst_50 = arith.constant 0.000000e+00 : f32
    %187 = vector.broadcast %cst_50 : f32 to vector<8x64xf32>
    %188 = arith.cmpf oge, %186, %187 : vector<8x64xf32>
    %cst_51 = arith.constant 1.000000e+00 : f32
    %cst_52 = arith.constant -1.000000e+00 : f32
    %189 = vector.broadcast %cst_51 : f32 to vector<8x64xf32>
    %190 = vector.broadcast %cst_52 : f32 to vector<8x64xf32>
    %191 = arith.select %188, %189, %190 : vector<8x64xi1>, vector<8x64xf32>
    %192 = math.absf %186 : vector<8x64xf32>
    %cst_53 = arith.constant 0.327591091 : f32
    %193 = vector.broadcast %cst_53 : f32 to vector<8x64xf32>
    %194 = arith.mulf %193, %192 : vector<8x64xf32>
    %cst_54 = arith.constant 1.000000e+00 : f32
    %195 = vector.broadcast %cst_54 : f32 to vector<8x64xf32>
    %196 = arith.addf %195, %194 : vector<8x64xf32>
    %cst_55 = arith.constant 1.000000e+00 : f32
    %197 = vector.broadcast %cst_55 : f32 to vector<8x64xf32>
    %198 = arith.divf %197, %196 : vector<8x64xf32>
    %cst_56 = arith.constant 1.06140542 : f32
    %199 = vector.broadcast %cst_56 : f32 to vector<8x64xf32>
    %200 = arith.mulf %199, %198 : vector<8x64xf32>
    %cst_57 = arith.constant -1.45315206 : f32
    %201 = vector.broadcast %cst_57 : f32 to vector<8x64xf32>
    %202 = arith.addf %200, %201 : vector<8x64xf32>
    %203 = arith.mulf %202, %198 : vector<8x64xf32>
    %cst_58 = arith.constant 1.42141378 : f32
    %204 = vector.broadcast %cst_58 : f32 to vector<8x64xf32>
    %205 = arith.addf %203, %204 : vector<8x64xf32>
    %206 = arith.mulf %205, %198 : vector<8x64xf32>
    %cst_59 = arith.constant -0.284496725 : f32
    %207 = vector.broadcast %cst_59 : f32 to vector<8x64xf32>
    %208 = arith.addf %206, %207 : vector<8x64xf32>
    %209 = arith.mulf %208, %198 : vector<8x64xf32>
    %cst_60 = arith.constant 0.254829586 : f32
    %210 = vector.broadcast %cst_60 : f32 to vector<8x64xf32>
    %211 = arith.addf %209, %210 : vector<8x64xf32>
    %212 = arith.mulf %211, %198 : vector<8x64xf32>
    %cst_61 = arith.constant 0.000000e+00 : f32
    %213 = vector.broadcast %cst_61 : f32 to vector<8x64xf32>
    %214 = arith.subf %213, %192 : vector<8x64xf32>
    %215 = arith.mulf %214, %192 : vector<8x64xf32>
    %216 = math.exp %215 : vector<8x64xf32>
    %217 = arith.mulf %212, %216 : vector<8x64xf32>
    %cst_62 = arith.constant 1.000000e+00 : f32
    %218 = vector.broadcast %cst_62 : f32 to vector<8x64xf32>
    %219 = arith.subf %218, %217 : vector<8x64xf32>
    %220 = arith.mulf %191, %219 : vector<8x64xf32>
    %cst_63 = arith.constant 1.000000e+00 : f32
    %221 = vector.broadcast %cst_63 : f32 to vector<8x64xf32>
    %222 = arith.addf %221, %220 : vector<8x64xf32>
    %223 = arith.mulf %184, %222 : vector<8x64xf32>
    %224 = arith.truncf %223 : vector<8x64xf32> to vector<8x64xbf16>
    %cst_64 = arith.constant dense<0.000000e+00> : vector<8x32xf32>
    %225 = tpu.matmul %224, %60, %cst_64 {dimension_numbers = #tpu.dot_dimension_numbers<[1], [0], [0], [1], [0, 0, 1, 1], [], []>} : vector<8x64xbf16>, vector<64x32xbf16>, vector<8x32xf32> -> vector<8x32xf32>
    %226 = vector.broadcast %68 : vector<1x32xf32> to vector<8x32xf32>
    %227 = arith.addf %225, %226 : vector<8x32xf32>
    %228 = arith.addf %227, %178 : vector<8x32xf32>
    %cst_65 = arith.constant dense<0.000000e+00> : vector<8xf32>
    %229 = vector.multi_reduction <add>, %228, %cst_65 [1] : vector<8x32xf32> to vector<8xf32>
    %230 = vector.shape_cast %229 : vector<8xf32> to vector<8x1xf32>
    %cst_66 = arith.constant 3.200000e+01 : f32
    %231 = vector.broadcast %cst_66 : f32 to vector<8x1xf32>
    %232 = arith.divf %230, %231 : vector<8x1xf32>
    %233 = vector.broadcast %232 : vector<8x1xf32> to vector<8x32xf32>
    %234 = arith.subf %228, %233 : vector<8x32xf32>
    %235 = arith.mulf %234, %234 : vector<8x32xf32>
    %cst_67 = arith.constant dense<0.000000e+00> : vector<8xf32>
    %236 = vector.multi_reduction <add>, %235, %cst_67 [1] : vector<8x32xf32> to vector<8xf32>
    %237 = vector.shape_cast %236 : vector<8xf32> to vector<8x1xf32>
    %cst_68 = arith.constant 3.200000e+01 : f32
    %238 = vector.broadcast %cst_68 : f32 to vector<8x1xf32>
    %239 = arith.divf %237, %238 : vector<8x1xf32>
    %240 = vector.broadcast %232 : vector<8x1xf32> to vector<8x32xf32>
    %241 = arith.subf %228, %240 : vector<8x32xf32>
    %cst_69 = arith.constant 9.99999996E-13 : f32
    %242 = vector.broadcast %cst_69 : f32 to vector<8x1xf32>
    %243 = arith.addf %239, %242 : vector<8x1xf32>
    %244 = math.rsqrt %243 : vector<8x1xf32>
    %245 = vector.broadcast %244 : vector<8x1xf32> to vector<8x32xf32>
    %246 = arith.mulf %241, %245 : vector<8x32xf32>
    %247 = vector.broadcast %69 : vector<1x32xf32> to vector<8x32xf32>
    %248 = arith.mulf %246, %247 : vector<8x32xf32>
    %249 = vector.broadcast %70 : vector<1x32xf32> to vector<8x32xf32>
    %250 = arith.addf %248, %249 : vector<8x32xf32>
    %c1 = arith.constant 1 : index
    %c0_70 = arith.constant 0 : index
    %c0_71 = arith.constant 0 : index
    %251 = vector.load %arg5[%c1, %c0_70, %c0_71] : memref<2x160x96xbf16, #tpu.memory_space<vmem>>, vector<1x160x96xbf16>
    %252 = vector.shape_cast %251 : vector<1x160x96xbf16> to vector<160x96xbf16>
    %253 = vector.extract_strided_slice %252 {offsets = [0, 0], sizes = [32, 96], strides = [1, 1]} : vector<160x96xbf16> to vector<32x96xbf16>
    %254 = vector.extract_strided_slice %252 {offsets = [32, 0], sizes = [32, 32], strides = [1, 1]} : vector<160x96xbf16> to vector<32x32xbf16>
    %255 = vector.extract_strided_slice %252 {offsets = [64, 0], sizes = [32, 64], strides = [1, 1]} : vector<160x96xbf16> to vector<32x64xbf16>
    %256 = vector.extract_strided_slice %252 {offsets = [96, 0], sizes = [64, 32], strides = [1, 1]} : vector<160x96xbf16> to vector<64x32xbf16>
    %c1_72 = arith.constant 1 : index
    %c0_73 = arith.constant 0 : index
    %c0_74 = arith.constant 0 : index
    %257 = vector.load %arg6[%c1_72, %c0_73, %c0_74] : memref<2x8x96xf32, #tpu.memory_space<vmem>>, vector<1x8x96xf32>
    %258 = vector.shape_cast %257 : vector<1x8x96xf32> to vector<8x96xf32>
    %259 = vector.extract_strided_slice %258 {offsets = [0, 0], sizes = [1, 96], strides = [1, 1]} : vector<8x96xf32> to vector<1x96xf32>
    %260 = vector.extract_strided_slice %258 {offsets = [1, 0], sizes = [1, 32], strides = [1, 1]} : vector<8x96xf32> to vector<1x32xf32>
    %261 = vector.extract_strided_slice %258 {offsets = [2, 0], sizes = [1, 32], strides = [1, 1]} : vector<8x96xf32> to vector<1x32xf32>
    %262 = vector.extract_strided_slice %258 {offsets = [3, 0], sizes = [1, 32], strides = [1, 1]} : vector<8x96xf32> to vector<1x32xf32>
    %263 = vector.extract_strided_slice %258 {offsets = [4, 0], sizes = [1, 64], strides = [1, 1]} : vector<8x96xf32> to vector<1x64xf32>
    %264 = vector.extract_strided_slice %258 {offsets = [5, 0], sizes = [1, 32], strides = [1, 1]} : vector<8x96xf32> to vector<1x32xf32>
    %265 = vector.extract_strided_slice %258 {offsets = [6, 0], sizes = [1, 32], strides = [1, 1]} : vector<8x96xf32> to vector<1x32xf32>
    %266 = vector.extract_strided_slice %258 {offsets = [7, 0], sizes = [1, 32], strides = [1, 1]} : vector<8x96xf32> to vector<1x32xf32>
    %267 = arith.truncf %250 : vector<8x32xf32> to vector<8x32xbf16>
    %cst_75 = arith.constant dense<0.000000e+00> : vector<8x96xf32>
    %268 = tpu.matmul %267, %253, %cst_75 {dimension_numbers = #tpu.dot_dimension_numbers<[1], [0], [0], [1], [0, 0, 1, 1], [], []>} : vector<8x32xbf16>, vector<32x96xbf16>, vector<8x96xf32> -> vector<8x96xf32>
    %269 = vector.broadcast %259 : vector<1x96xf32> to vector<8x96xf32>
    %270 = arith.addf %268, %269 : vector<8x96xf32>
    %271 = vector.extract_strided_slice %270 {offsets = [0, 0], sizes = [8, 8], strides = [1, 1]} : vector<8x96xf32> to vector<8x8xf32>
    %cst_76 = arith.constant 0.353553385 : f32
    %272 = vector.broadcast %cst_76 : f32 to vector<8x8xf32>
    %273 = arith.mulf %271, %272 : vector<8x8xf32>
    %274 = vector.extract_strided_slice %270 {offsets = [0, 32], sizes = [8, 8], strides = [1, 1]} : vector<8x96xf32> to vector<8x8xf32>
    %275 = vector.extract_strided_slice %270 {offsets = [0, 64], sizes = [8, 8], strides = [1, 1]} : vector<8x96xf32> to vector<8x8xf32>
    %cst_77 = arith.constant dense<0.000000e+00> : vector<8x8xf32>
    %276 = tpu.matmul %273, %274, %cst_77 {dimension_numbers = #tpu.dot_dimension_numbers<[1], [1], [0], [0], [0, 0, 1, 0], [], []>} : vector<8x8xf32>, vector<8x8xf32>, vector<8x8xf32> -> vector<8x8xf32>
    %277 = vector.broadcast %54 : vector<1x8xf32> to vector<8x8xf32>
    %278 = arith.addf %276, %277 : vector<8x8xf32>
    %cst_78 = arith.constant dense<0xFF800000> : vector<8xf32>
    %279 = vector.multi_reduction <maximumf>, %278, %cst_78 [1] : vector<8x8xf32> to vector<8xf32>
    %280 = vector.shape_cast %279 : vector<8xf32> to vector<8x1xf32>
    %281 = vector.broadcast %280 : vector<8x1xf32> to vector<8x8xf32>
    %282 = arith.subf %278, %281 : vector<8x8xf32>
    %283 = math.exp %282 : vector<8x8xf32>
    %cst_79 = arith.constant dense<0.000000e+00> : vector<8xf32>
    %284 = vector.multi_reduction <add>, %283, %cst_79 [1] : vector<8x8xf32> to vector<8xf32>
    %285 = vector.shape_cast %284 : vector<8xf32> to vector<8x1xf32>
    %286 = tpu.reciprocal %285 {approx = true} : vector<8x1xf32> -> vector<8x1xf32>
    %287 = vector.broadcast %286 : vector<8x1xf32> to vector<8x8xf32>
    %288 = arith.mulf %283, %287 : vector<8x8xf32>
    %cst_80 = arith.constant dense<0.000000e+00> : vector<8x8xf32>
    %289 = tpu.matmul %288, %275, %cst_80 {dimension_numbers = #tpu.dot_dimension_numbers<[1], [0], [0], [1], [0, 0, 1, 1], [], []>} : vector<8x8xf32>, vector<8x8xf32>, vector<8x8xf32> -> vector<8x8xf32>
    %290 = vector.extract_strided_slice %270 {offsets = [0, 8], sizes = [8, 8], strides = [1, 1]} : vector<8x96xf32> to vector<8x8xf32>
    %cst_81 = arith.constant 0.353553385 : f32
    %291 = vector.broadcast %cst_81 : f32 to vector<8x8xf32>
    %292 = arith.mulf %290, %291 : vector<8x8xf32>
    %293 = vector.extract_strided_slice %270 {offsets = [0, 40], sizes = [8, 8], strides = [1, 1]} : vector<8x96xf32> to vector<8x8xf32>
    %294 = vector.extract_strided_slice %270 {offsets = [0, 72], sizes = [8, 8], strides = [1, 1]} : vector<8x96xf32> to vector<8x8xf32>
    %cst_82 = arith.constant dense<0.000000e+00> : vector<8x8xf32>
    %295 = tpu.matmul %292, %293, %cst_82 {dimension_numbers = #tpu.dot_dimension_numbers<[1], [1], [0], [0], [0, 0, 1, 0], [], []>} : vector<8x8xf32>, vector<8x8xf32>, vector<8x8xf32> -> vector<8x8xf32>
    %296 = vector.broadcast %54 : vector<1x8xf32> to vector<8x8xf32>
    %297 = arith.addf %295, %296 : vector<8x8xf32>
    %cst_83 = arith.constant dense<0xFF800000> : vector<8xf32>
    %298 = vector.multi_reduction <maximumf>, %297, %cst_83 [1] : vector<8x8xf32> to vector<8xf32>
    %299 = vector.shape_cast %298 : vector<8xf32> to vector<8x1xf32>
    %300 = vector.broadcast %299 : vector<8x1xf32> to vector<8x8xf32>
    %301 = arith.subf %297, %300 : vector<8x8xf32>
    %302 = math.exp %301 : vector<8x8xf32>
    %cst_84 = arith.constant dense<0.000000e+00> : vector<8xf32>
    %303 = vector.multi_reduction <add>, %302, %cst_84 [1] : vector<8x8xf32> to vector<8xf32>
    %304 = vector.shape_cast %303 : vector<8xf32> to vector<8x1xf32>
    %305 = tpu.reciprocal %304 {approx = true} : vector<8x1xf32> -> vector<8x1xf32>
    %306 = vector.broadcast %305 : vector<8x1xf32> to vector<8x8xf32>
    %307 = arith.mulf %302, %306 : vector<8x8xf32>
    %cst_85 = arith.constant dense<0.000000e+00> : vector<8x8xf32>
    %308 = tpu.matmul %307, %294, %cst_85 {dimension_numbers = #tpu.dot_dimension_numbers<[1], [0], [0], [1], [0, 0, 1, 1], [], []>} : vector<8x8xf32>, vector<8x8xf32>, vector<8x8xf32> -> vector<8x8xf32>
    %309 = vector.extract_strided_slice %270 {offsets = [0, 16], sizes = [8, 8], strides = [1, 1]} : vector<8x96xf32> to vector<8x8xf32>
    %cst_86 = arith.constant 0.353553385 : f32
    %310 = vector.broadcast %cst_86 : f32 to vector<8x8xf32>
    %311 = arith.mulf %309, %310 : vector<8x8xf32>
    %312 = vector.extract_strided_slice %270 {offsets = [0, 48], sizes = [8, 8], strides = [1, 1]} : vector<8x96xf32> to vector<8x8xf32>
    %313 = vector.extract_strided_slice %270 {offsets = [0, 80], sizes = [8, 8], strides = [1, 1]} : vector<8x96xf32> to vector<8x8xf32>
    %cst_87 = arith.constant dense<0.000000e+00> : vector<8x8xf32>
    %314 = tpu.matmul %311, %312, %cst_87 {dimension_numbers = #tpu.dot_dimension_numbers<[1], [1], [0], [0], [0, 0, 1, 0], [], []>} : vector<8x8xf32>, vector<8x8xf32>, vector<8x8xf32> -> vector<8x8xf32>
    %315 = vector.broadcast %54 : vector<1x8xf32> to vector<8x8xf32>
    %316 = arith.addf %314, %315 : vector<8x8xf32>
    %cst_88 = arith.constant dense<0xFF800000> : vector<8xf32>
    %317 = vector.multi_reduction <maximumf>, %316, %cst_88 [1] : vector<8x8xf32> to vector<8xf32>
    %318 = vector.shape_cast %317 : vector<8xf32> to vector<8x1xf32>
    %319 = vector.broadcast %318 : vector<8x1xf32> to vector<8x8xf32>
    %320 = arith.subf %316, %319 : vector<8x8xf32>
    %321 = math.exp %320 : vector<8x8xf32>
    %cst_89 = arith.constant dense<0.000000e+00> : vector<8xf32>
    %322 = vector.multi_reduction <add>, %321, %cst_89 [1] : vector<8x8xf32> to vector<8xf32>
    %323 = vector.shape_cast %322 : vector<8xf32> to vector<8x1xf32>
    %324 = tpu.reciprocal %323 {approx = true} : vector<8x1xf32> -> vector<8x1xf32>
    %325 = vector.broadcast %324 : vector<8x1xf32> to vector<8x8xf32>
    %326 = arith.mulf %321, %325 : vector<8x8xf32>
    %cst_90 = arith.constant dense<0.000000e+00> : vector<8x8xf32>
    %327 = tpu.matmul %326, %313, %cst_90 {dimension_numbers = #tpu.dot_dimension_numbers<[1], [0], [0], [1], [0, 0, 1, 1], [], []>} : vector<8x8xf32>, vector<8x8xf32>, vector<8x8xf32> -> vector<8x8xf32>
    %328 = vector.extract_strided_slice %270 {offsets = [0, 24], sizes = [8, 8], strides = [1, 1]} : vector<8x96xf32> to vector<8x8xf32>
    %cst_91 = arith.constant 0.353553385 : f32
    %329 = vector.broadcast %cst_91 : f32 to vector<8x8xf32>
    %330 = arith.mulf %328, %329 : vector<8x8xf32>
    %331 = vector.extract_strided_slice %270 {offsets = [0, 56], sizes = [8, 8], strides = [1, 1]} : vector<8x96xf32> to vector<8x8xf32>
    %332 = vector.extract_strided_slice %270 {offsets = [0, 88], sizes = [8, 8], strides = [1, 1]} : vector<8x96xf32> to vector<8x8xf32>
    %cst_92 = arith.constant dense<0.000000e+00> : vector<8x8xf32>
    %333 = tpu.matmul %330, %331, %cst_92 {dimension_numbers = #tpu.dot_dimension_numbers<[1], [1], [0], [0], [0, 0, 1, 0], [], []>} : vector<8x8xf32>, vector<8x8xf32>, vector<8x8xf32> -> vector<8x8xf32>
    %334 = vector.broadcast %54 : vector<1x8xf32> to vector<8x8xf32>
    %335 = arith.addf %333, %334 : vector<8x8xf32>
    %cst_93 = arith.constant dense<0xFF800000> : vector<8xf32>
    %336 = vector.multi_reduction <maximumf>, %335, %cst_93 [1] : vector<8x8xf32> to vector<8xf32>
    %337 = vector.shape_cast %336 : vector<8xf32> to vector<8x1xf32>
    %338 = vector.broadcast %337 : vector<8x1xf32> to vector<8x8xf32>
    %339 = arith.subf %335, %338 : vector<8x8xf32>
    %340 = math.exp %339 : vector<8x8xf32>
    %cst_94 = arith.constant dense<0.000000e+00> : vector<8xf32>
    %341 = vector.multi_reduction <add>, %340, %cst_94 [1] : vector<8x8xf32> to vector<8xf32>
    %342 = vector.shape_cast %341 : vector<8xf32> to vector<8x1xf32>
    %343 = tpu.reciprocal %342 {approx = true} : vector<8x1xf32> -> vector<8x1xf32>
    %344 = vector.broadcast %343 : vector<8x1xf32> to vector<8x8xf32>
    %345 = arith.mulf %340, %344 : vector<8x8xf32>
    %cst_95 = arith.constant dense<0.000000e+00> : vector<8x8xf32>
    %346 = tpu.matmul %345, %332, %cst_95 {dimension_numbers = #tpu.dot_dimension_numbers<[1], [0], [0], [1], [0, 0, 1, 1], [], []>} : vector<8x8xf32>, vector<8x8xf32>, vector<8x8xf32> -> vector<8x8xf32>
    %347 = tpu.concatenate %289, %308, %327, %346 in 1 : vector<8x8xf32>, vector<8x8xf32>, vector<8x8xf32>, vector<8x8xf32> -> vector<8x32xf32>
    %348 = arith.truncf %347 : vector<8x32xf32> to vector<8x32xbf16>
    %cst_96 = arith.constant dense<0.000000e+00> : vector<8x32xf32>
    %349 = tpu.matmul %348, %254, %cst_96 {dimension_numbers = #tpu.dot_dimension_numbers<[1], [0], [0], [1], [0, 0, 1, 1], [], []>} : vector<8x32xbf16>, vector<32x32xbf16>, vector<8x32xf32> -> vector<8x32xf32>
    %350 = vector.broadcast %260 : vector<1x32xf32> to vector<8x32xf32>
    %351 = arith.addf %349, %350 : vector<8x32xf32>
    %352 = arith.addf %351, %250 : vector<8x32xf32>
    %cst_97 = arith.constant dense<0.000000e+00> : vector<8xf32>
    %353 = vector.multi_reduction <add>, %352, %cst_97 [1] : vector<8x32xf32> to vector<8xf32>
    %354 = vector.shape_cast %353 : vector<8xf32> to vector<8x1xf32>
    %cst_98 = arith.constant 3.200000e+01 : f32
    %355 = vector.broadcast %cst_98 : f32 to vector<8x1xf32>
    %356 = arith.divf %354, %355 : vector<8x1xf32>
    %357 = vector.broadcast %356 : vector<8x1xf32> to vector<8x32xf32>
    %358 = arith.subf %352, %357 : vector<8x32xf32>
    %359 = arith.mulf %358, %358 : vector<8x32xf32>
    %cst_99 = arith.constant dense<0.000000e+00> : vector<8xf32>
    %360 = vector.multi_reduction <add>, %359, %cst_99 [1] : vector<8x32xf32> to vector<8xf32>
    %361 = vector.shape_cast %360 : vector<8xf32> to vector<8x1xf32>
    %cst_100 = arith.constant 3.200000e+01 : f32
    %362 = vector.broadcast %cst_100 : f32 to vector<8x1xf32>
    %363 = arith.divf %361, %362 : vector<8x1xf32>
    %364 = vector.broadcast %356 : vector<8x1xf32> to vector<8x32xf32>
    %365 = arith.subf %352, %364 : vector<8x32xf32>
    %cst_101 = arith.constant 9.99999996E-13 : f32
    %366 = vector.broadcast %cst_101 : f32 to vector<8x1xf32>
    %367 = arith.addf %363, %366 : vector<8x1xf32>
    %368 = math.rsqrt %367 : vector<8x1xf32>
    %369 = vector.broadcast %368 : vector<8x1xf32> to vector<8x32xf32>
    %370 = arith.mulf %365, %369 : vector<8x32xf32>
    %371 = vector.broadcast %261 : vector<1x32xf32> to vector<8x32xf32>
    %372 = arith.mulf %370, %371 : vector<8x32xf32>
    %373 = vector.broadcast %262 : vector<1x32xf32> to vector<8x32xf32>
    %374 = arith.addf %372, %373 : vector<8x32xf32>
    %375 = arith.truncf %374 : vector<8x32xf32> to vector<8x32xbf16>
    %cst_102 = arith.constant dense<0.000000e+00> : vector<8x64xf32>
    %376 = tpu.matmul %375, %255, %cst_102 {dimension_numbers = #tpu.dot_dimension_numbers<[1], [0], [0], [1], [0, 0, 1, 1], [], []>} : vector<8x32xbf16>, vector<32x64xbf16>, vector<8x64xf32> -> vector<8x64xf32>
    %377 = vector.broadcast %263 : vector<1x64xf32> to vector<8x64xf32>
    %378 = arith.addf %376, %377 : vector<8x64xf32>
    %cst_103 = arith.constant 5.000000e-01 : f32
    %379 = vector.broadcast %cst_103 : f32 to vector<8x64xf32>
    %380 = arith.mulf %379, %378 : vector<8x64xf32>
    %cst_104 = arith.constant 0.707106769 : f32
    %381 = vector.broadcast %cst_104 : f32 to vector<8x64xf32>
    %382 = arith.mulf %378, %381 : vector<8x64xf32>
    %cst_105 = arith.constant 0.000000e+00 : f32
    %383 = vector.broadcast %cst_105 : f32 to vector<8x64xf32>
    %384 = arith.cmpf oge, %382, %383 : vector<8x64xf32>
    %cst_106 = arith.constant 1.000000e+00 : f32
    %cst_107 = arith.constant -1.000000e+00 : f32
    %385 = vector.broadcast %cst_106 : f32 to vector<8x64xf32>
    %386 = vector.broadcast %cst_107 : f32 to vector<8x64xf32>
    %387 = arith.select %384, %385, %386 : vector<8x64xi1>, vector<8x64xf32>
    %388 = math.absf %382 : vector<8x64xf32>
    %cst_108 = arith.constant 0.327591091 : f32
    %389 = vector.broadcast %cst_108 : f32 to vector<8x64xf32>
    %390 = arith.mulf %389, %388 : vector<8x64xf32>
    %cst_109 = arith.constant 1.000000e+00 : f32
    %391 = vector.broadcast %cst_109 : f32 to vector<8x64xf32>
    %392 = arith.addf %391, %390 : vector<8x64xf32>
    %cst_110 = arith.constant 1.000000e+00 : f32
    %393 = vector.broadcast %cst_110 : f32 to vector<8x64xf32>
    %394 = arith.divf %393, %392 : vector<8x64xf32>
    %cst_111 = arith.constant 1.06140542 : f32
    %395 = vector.broadcast %cst_111 : f32 to vector<8x64xf32>
    %396 = arith.mulf %395, %394 : vector<8x64xf32>
    %cst_112 = arith.constant -1.45315206 : f32
    %397 = vector.broadcast %cst_112 : f32 to vector<8x64xf32>
    %398 = arith.addf %396, %397 : vector<8x64xf32>
    %399 = arith.mulf %398, %394 : vector<8x64xf32>
    %cst_113 = arith.constant 1.42141378 : f32
    %400 = vector.broadcast %cst_113 : f32 to vector<8x64xf32>
    %401 = arith.addf %399, %400 : vector<8x64xf32>
    %402 = arith.mulf %401, %394 : vector<8x64xf32>
    %cst_114 = arith.constant -0.284496725 : f32
    %403 = vector.broadcast %cst_114 : f32 to vector<8x64xf32>
    %404 = arith.addf %402, %403 : vector<8x64xf32>
    %405 = arith.mulf %404, %394 : vector<8x64xf32>
    %cst_115 = arith.constant 0.254829586 : f32
    %406 = vector.broadcast %cst_115 : f32 to vector<8x64xf32>
    %407 = arith.addf %405, %406 : vector<8x64xf32>
    %408 = arith.mulf %407, %394 : vector<8x64xf32>
    %cst_116 = arith.constant 0.000000e+00 : f32
    %409 = vector.broadcast %cst_116 : f32 to vector<8x64xf32>
    %410 = arith.subf %409, %388 : vector<8x64xf32>
    %411 = arith.mulf %410, %388 : vector<8x64xf32>
    %412 = math.exp %411 : vector<8x64xf32>
    %413 = arith.mulf %408, %412 : vector<8x64xf32>
    %cst_117 = arith.constant 1.000000e+00 : f32
    %414 = vector.broadcast %cst_117 : f32 to vector<8x64xf32>
    %415 = arith.subf %414, %413 : vector<8x64xf32>
    %416 = arith.mulf %387, %415 : vector<8x64xf32>
    %cst_118 = arith.constant 1.000000e+00 : f32
    %417 = vector.broadcast %cst_118 : f32 to vector<8x64xf32>
    %418 = arith.addf %417, %416 : vector<8x64xf32>
    %419 = arith.mulf %380, %418 : vector<8x64xf32>
    %420 = arith.truncf %419 : vector<8x64xf32> to vector<8x64xbf16>
    %cst_119 = arith.constant dense<0.000000e+00> : vector<8x32xf32>
    %421 = tpu.matmul %420, %256, %cst_119 {dimension_numbers = #tpu.dot_dimension_numbers<[1], [0], [0], [1], [0, 0, 1, 1], [], []>} : vector<8x64xbf16>, vector<64x32xbf16>, vector<8x32xf32> -> vector<8x32xf32>
    %422 = vector.broadcast %264 : vector<1x32xf32> to vector<8x32xf32>
    %423 = arith.addf %421, %422 : vector<8x32xf32>
    %424 = arith.addf %423, %374 : vector<8x32xf32>
    %cst_120 = arith.constant dense<0.000000e+00> : vector<8xf32>
    %425 = vector.multi_reduction <add>, %424, %cst_120 [1] : vector<8x32xf32> to vector<8xf32>
    %426 = vector.shape_cast %425 : vector<8xf32> to vector<8x1xf32>
    %cst_121 = arith.constant 3.200000e+01 : f32
    %427 = vector.broadcast %cst_121 : f32 to vector<8x1xf32>
    %428 = arith.divf %426, %427 : vector<8x1xf32>
    %429 = vector.broadcast %428 : vector<8x1xf32> to vector<8x32xf32>
    %430 = arith.subf %424, %429 : vector<8x32xf32>
    %431 = arith.mulf %430, %430 : vector<8x32xf32>
    %cst_122 = arith.constant dense<0.000000e+00> : vector<8xf32>
    %432 = vector.multi_reduction <add>, %431, %cst_122 [1] : vector<8x32xf32> to vector<8xf32>
    %433 = vector.shape_cast %432 : vector<8xf32> to vector<8x1xf32>
    %cst_123 = arith.constant 3.200000e+01 : f32
    %434 = vector.broadcast %cst_123 : f32 to vector<8x1xf32>
    %435 = arith.divf %433, %434 : vector<8x1xf32>
    %436 = vector.broadcast %428 : vector<8x1xf32> to vector<8x32xf32>
    %437 = arith.subf %424, %436 : vector<8x32xf32>
    %cst_124 = arith.constant 9.99999996E-13 : f32
    %438 = vector.broadcast %cst_124 : f32 to vector<8x1xf32>
    %439 = arith.addf %435, %438 : vector<8x1xf32>
    %440 = math.rsqrt %439 : vector<8x1xf32>
    %441 = vector.broadcast %440 : vector<8x1xf32> to vector<8x32xf32>
    %442 = arith.mulf %437, %441 : vector<8x32xf32>
    %443 = vector.broadcast %265 : vector<1x32xf32> to vector<8x32xf32>
    %444 = arith.mulf %442, %443 : vector<8x32xf32>
    %445 = vector.broadcast %266 : vector<1x32xf32> to vector<8x32xf32>
    %446 = arith.addf %444, %445 : vector<8x32xf32>
    %447 = vector.extract_strided_slice %446 {offsets = [0, 0], sizes = [1, 32], strides = [1, 1]} : vector<8x32xf32> to vector<1x32xf32>
    %448 = arith.mulf %447, %447 : vector<1x32xf32>
    %cst_125 = arith.constant dense<0.000000e+00> : vector<1xf32>
    %449 = vector.multi_reduction <add>, %448, %cst_125 [1] : vector<1x32xf32> to vector<1xf32>
    %450 = vector.shape_cast %449 : vector<1xf32> to vector<1x1xf32>
    %cst_126 = arith.constant 9.99999996E-13 : f32
    %451 = vector.broadcast %cst_126 : f32 to vector<1x1xf32>
    %452 = arith.addf %450, %451 : vector<1x1xf32>
    %453 = math.rsqrt %452 : vector<1x1xf32>
    %454 = vector.broadcast %453 : vector<1x1xf32> to vector<1x32xf32>
    %455 = arith.mulf %447, %454 : vector<1x32xf32>
    %c0_127 = arith.constant 0 : index
    %c0_128 = arith.constant 0 : index
    %456 = vector.load %arg7[%c0_127, %c0_128] : memref<32x16xf32, #tpu.memory_space<vmem>>, vector<32x16xf32>
    %cst_129 = arith.constant dense<0.000000e+00> : vector<1x16xf32>
    %457 = tpu.matmul %455, %456, %cst_129 {dimension_numbers = #tpu.dot_dimension_numbers<[1], [0], [0], [1], [0, 0, 1, 1], [], []>} : vector<1x32xf32>, vector<32x16xf32>, vector<1x16xf32> -> vector<1x16xf32>
    %cst_130 = arith.constant -1.000000e+00 : f32
    %cst_131 = arith.constant 1.000000e+00 : f32
    %458 = vector.broadcast %cst_130 : f32 to vector<1x16xf32>
    %459 = arith.maximumf %458, %457 : vector<1x16xf32>
    %460 = vector.broadcast %cst_131 : f32 to vector<1x16xf32>
    %461 = arith.minimumf %460, %459 : vector<1x16xf32>
    %462 = arith.mulf %461, %461 : vector<1x16xf32>
    %cst_132 = arith.constant 1.000000e+00 : f32
    %463 = vector.broadcast %cst_132 : f32 to vector<1x16xf32>
    %464 = arith.subf %463, %462 : vector<1x16xf32>
    %cst_133 = arith.constant 0.000000e+00 : f32
    %cst_134 = arith.constant 1.000000e+00 : f32
    %465 = vector.broadcast %cst_133 : f32 to vector<1x16xf32>
    %466 = arith.maximumf %465, %464 : vector<1x16xf32>
    %467 = vector.broadcast %cst_134 : f32 to vector<1x16xf32>
    %468 = arith.minimumf %467, %466 : vector<1x16xf32>
    %469 = math.sqrt %468 : vector<1x16xf32>
    %cst_135 = arith.constant 0.87758255 : f32
    %470 = vector.broadcast %cst_135 : f32 to vector<1x16xf32>
    %471 = arith.mulf %461, %470 : vector<1x16xf32>
    %cst_136 = arith.constant 0.47942555 : f32
    %472 = vector.broadcast %cst_136 : f32 to vector<1x16xf32>
    %473 = arith.mulf %469, %472 : vector<1x16xf32>
    %474 = arith.subf %471, %473 : vector<1x16xf32>
    %cst_137 = arith.constant -0.87758255 : f32
    %475 = vector.broadcast %cst_137 : f32 to vector<1x16xf32>
    %476 = arith.cmpf ogt, %461, %475 : vector<1x16xf32>
    %cst_138 = arith.constant 0.239712775 : f32
    %477 = vector.broadcast %cst_138 : f32 to vector<1x16xf32>
    %478 = arith.subf %461, %477 : vector<1x16xf32>
    %479 = arith.select %476, %474, %478 : vector<1x16xi1>, vector<1x16xf32>
    %c0_139 = arith.constant 0 : index
    %480 = memref.load %arg1[%c0_139] : memref<2xi32, #tpu.memory_space<smem>>
    %481 = tpu.iota {dimensions = array<i32: 1>} : vector<1x16xi32>
    %482 = vector.broadcast %480 : i32 to vector<1x16xi32>
    %483 = arith.cmpi eq, %481, %482 : vector<1x16xi32>
    %484 = arith.extui %483 : vector<1x16xi1> to vector<1x16xi32>
    %485 = arith.sitofp %484 : vector<1x16xi32> to vector<1x16xf32>
    %486 = arith.mulf %485, %479 : vector<1x16xf32>
    %cst_140 = arith.constant 1.000000e+00 : f32
    %487 = vector.broadcast %cst_140 : f32 to vector<1x16xf32>
    %488 = arith.subf %487, %485 : vector<1x16xf32>
    %489 = arith.mulf %488, %461 : vector<1x16xf32>
    %490 = arith.addf %486, %489 : vector<1x16xf32>
    %cst_141 = arith.constant 3.000000e+01 : f32
    %491 = vector.broadcast %cst_141 : f32 to vector<1x16xf32>
    %492 = arith.mulf %490, %491 : vector<1x16xf32>
    %c1_142 = arith.constant 1 : index
    %c0_143 = arith.constant 0 : index
    %c0_144 = arith.constant 0 : index
    %493 = vector.load %arg2[%c1_142, %c0_143, %c0_144] : memref<2x8x2xi32, #tpu.memory_space<vmem>>, vector<1x8x2xi32>
    %494 = vector.shape_cast %493 : vector<1x8x2xi32> to vector<8x2xi32>
    %495 = vector.extract_strided_slice %494 {offsets = [0, 0], sizes = [8, 1], strides = [1, 1]} : vector<8x2xi32> to vector<8x1xi32>
    %496 = vector.extract_strided_slice %494 {offsets = [0, 1], sizes = [8, 1], strides = [1, 1]} : vector<8x2xi32> to vector<8x1xi32>
    %497 = vector.broadcast %495 : vector<8x1xi32> to vector<8x120xi32>
    %498 = arith.cmpi eq, %5, %497 : vector<8x120xi32>
    %c100_i32_145 = arith.constant 100 : i32
    %499 = vector.broadcast %c100_i32_145 : i32 to vector<8x1xi32>
    %500 = arith.addi %499, %496 : vector<8x1xi32>
    %501 = vector.broadcast %500 : vector<8x1xi32> to vector<8x120xi32>
    %502 = arith.cmpi eq, %5, %501 : vector<8x120xi32>
    %503 = arith.ori %498, %502 : vector<8x120xi1>
    %c102_i32_146 = arith.constant 102 : i32
    %504 = vector.broadcast %c102_i32_146 : i32 to vector<8x1xi32>
    %505 = arith.addi %504, %6 : vector<8x1xi32>
    %506 = vector.broadcast %505 : vector<8x1xi32> to vector<8x120xi32>
    %507 = arith.cmpi eq, %5, %506 : vector<8x120xi32>
    %508 = arith.ori %503, %507 : vector<8x120xi1>
    %509 = arith.extui %508 : vector<8x120xi1> to vector<8x120xi32>
    %510 = arith.sitofp %509 : vector<8x120xi32> to vector<8x120xf32>
    %511 = arith.truncf %510 : vector<8x120xf32> to vector<8x120xbf16>
    %cst_147 = arith.constant dense<0.000000e+00> : vector<8x32xf32>
    %512 = tpu.matmul %511, %0, %cst_147 {dimension_numbers = #tpu.dot_dimension_numbers<[1], [0], [0], [1], [0, 0, 1, 1], [], []>} : vector<8x120xbf16>, vector<120x32xbf16>, vector<8x32xf32> -> vector<8x32xf32>
    %cst_148 = arith.constant dense<0.000000e+00> : vector<8xf32>
    %513 = vector.multi_reduction <add>, %512, %cst_148 [1] : vector<8x32xf32> to vector<8xf32>
    %514 = vector.shape_cast %513 : vector<8xf32> to vector<8x1xf32>
    %cst_149 = arith.constant 3.200000e+01 : f32
    %515 = vector.broadcast %cst_149 : f32 to vector<8x1xf32>
    %516 = arith.divf %514, %515 : vector<8x1xf32>
    %517 = vector.broadcast %516 : vector<8x1xf32> to vector<8x32xf32>
    %518 = arith.subf %512, %517 : vector<8x32xf32>
    %519 = arith.mulf %518, %518 : vector<8x32xf32>
    %cst_150 = arith.constant dense<0.000000e+00> : vector<8xf32>
    %520 = vector.multi_reduction <add>, %519, %cst_150 [1] : vector<8x32xf32> to vector<8xf32>
    %521 = vector.shape_cast %520 : vector<8xf32> to vector<8x1xf32>
    %cst_151 = arith.constant 3.200000e+01 : f32
    %522 = vector.broadcast %cst_151 : f32 to vector<8x1xf32>
    %523 = arith.divf %521, %522 : vector<8x1xf32>
    %524 = vector.broadcast %516 : vector<8x1xf32> to vector<8x32xf32>
    %525 = arith.subf %512, %524 : vector<8x32xf32>
    %cst_152 = arith.constant 9.99999996E-13 : f32
    %526 = vector.broadcast %cst_152 : f32 to vector<8x1xf32>
    %527 = arith.addf %523, %526 : vector<8x1xf32>
    %528 = math.rsqrt %527 : vector<8x1xf32>
    %529 = vector.broadcast %528 : vector<8x1xf32> to vector<8x32xf32>
    %530 = arith.mulf %525, %529 : vector<8x32xf32>
    %531 = vector.broadcast %2 : vector<1x32xf32> to vector<8x32xf32>
    %532 = arith.mulf %530, %531 : vector<8x32xf32>
    %533 = vector.broadcast %4 : vector<1x32xf32> to vector<8x32xf32>
    %534 = arith.addf %532, %533 : vector<8x32xf32>
    %c1_153 = arith.constant 1 : index
    %c0_154 = arith.constant 0 : index
    %c0_155 = arith.constant 0 : index
    %535 = vector.load %arg3[%c1_153, %c0_154, %c0_155] : memref<2x1x8xf32, #tpu.memory_space<vmem>>, vector<1x1x8xf32>
    %536 = vector.shape_cast %535 : vector<1x1x8xf32> to vector<1x8xf32>
    %cst_156 = arith.constant 1.000000e+00 : f32
    %537 = vector.broadcast %cst_156 : f32 to vector<1x8xf32>
    %538 = arith.subf %537, %536 : vector<1x8xf32>
    %cst_157 = arith.constant -1.000000e+09 : f32
    %539 = vector.broadcast %cst_157 : f32 to vector<1x8xf32>
    %540 = arith.mulf %538, %539 : vector<1x8xf32>
    %c0_158 = arith.constant 0 : index
    %c0_159 = arith.constant 0 : index
    %c0_160 = arith.constant 0 : index
    %541 = vector.load %arg5[%c0_158, %c0_159, %c0_160] : memref<2x160x96xbf16, #tpu.memory_space<vmem>>, vector<1x160x96xbf16>
    %542 = vector.shape_cast %541 : vector<1x160x96xbf16> to vector<160x96xbf16>
    %543 = vector.extract_strided_slice %542 {offsets = [0, 0], sizes = [32, 96], strides = [1, 1]} : vector<160x96xbf16> to vector<32x96xbf16>
    %544 = vector.extract_strided_slice %542 {offsets = [32, 0], sizes = [32, 32], strides = [1, 1]} : vector<160x96xbf16> to vector<32x32xbf16>
    %545 = vector.extract_strided_slice %542 {offsets = [64, 0], sizes = [32, 64], strides = [1, 1]} : vector<160x96xbf16> to vector<32x64xbf16>
    %546 = vector.extract_strided_slice %542 {offsets = [96, 0], sizes = [64, 32], strides = [1, 1]} : vector<160x96xbf16> to vector<64x32xbf16>
    %c0_161 = arith.constant 0 : index
    %c0_162 = arith.constant 0 : index
    %c0_163 = arith.constant 0 : index
    %547 = vector.load %arg6[%c0_161, %c0_162, %c0_163] : memref<2x8x96xf32, #tpu.memory_space<vmem>>, vector<1x8x96xf32>
    %548 = vector.shape_cast %547 : vector<1x8x96xf32> to vector<8x96xf32>
    %549 = vector.extract_strided_slice %548 {offsets = [0, 0], sizes = [1, 96], strides = [1, 1]} : vector<8x96xf32> to vector<1x96xf32>
    %550 = vector.extract_strided_slice %548 {offsets = [1, 0], sizes = [1, 32], strides = [1, 1]} : vector<8x96xf32> to vector<1x32xf32>
    %551 = vector.extract_strided_slice %548 {offsets = [2, 0], sizes = [1, 32], strides = [1, 1]} : vector<8x96xf32> to vector<1x32xf32>
    %552 = vector.extract_strided_slice %548 {offsets = [3, 0], sizes = [1, 32], strides = [1, 1]} : vector<8x96xf32> to vector<1x32xf32>
    %553 = vector.extract_strided_slice %548 {offsets = [4, 0], sizes = [1, 64], strides = [1, 1]} : vector<8x96xf32> to vector<1x64xf32>
    %554 = vector.extract_strided_slice %548 {offsets = [5, 0], sizes = [1, 32], strides = [1, 1]} : vector<8x96xf32> to vector<1x32xf32>
    %555 = vector.extract_strided_slice %548 {offsets = [6, 0], sizes = [1, 32], strides = [1, 1]} : vector<8x96xf32> to vector<1x32xf32>
    %556 = vector.extract_strided_slice %548 {offsets = [7, 0], sizes = [1, 32], strides = [1, 1]} : vector<8x96xf32> to vector<1x32xf32>
    %557 = arith.truncf %534 : vector<8x32xf32> to vector<8x32xbf16>
    %cst_164 = arith.constant dense<0.000000e+00> : vector<8x96xf32>
    %558 = tpu.matmul %557, %543, %cst_164 {dimension_numbers = #tpu.dot_dimension_numbers<[1], [0], [0], [1], [0, 0, 1, 1], [], []>} : vector<8x32xbf16>, vector<32x96xbf16>, vector<8x96xf32> -> vector<8x96xf32>
    %559 = vector.broadcast %549 : vector<1x96xf32> to vector<8x96xf32>
    %560 = arith.addf %558, %559 : vector<8x96xf32>
    %561 = vector.extract_strided_slice %560 {offsets = [0, 0], sizes = [8, 8], strides = [1, 1]} : vector<8x96xf32> to vector<8x8xf32>
    %cst_165 = arith.constant 0.353553385 : f32
    %562 = vector.broadcast %cst_165 : f32 to vector<8x8xf32>
    %563 = arith.mulf %561, %562 : vector<8x8xf32>
    %564 = vector.extract_strided_slice %560 {offsets = [0, 32], sizes = [8, 8], strides = [1, 1]} : vector<8x96xf32> to vector<8x8xf32>
    %565 = vector.extract_strided_slice %560 {offsets = [0, 64], sizes = [8, 8], strides = [1, 1]} : vector<8x96xf32> to vector<8x8xf32>
    %cst_166 = arith.constant dense<0.000000e+00> : vector<8x8xf32>
    %566 = tpu.matmul %563, %564, %cst_166 {dimension_numbers = #tpu.dot_dimension_numbers<[1], [1], [0], [0], [0, 0, 1, 0], [], []>} : vector<8x8xf32>, vector<8x8xf32>, vector<8x8xf32> -> vector<8x8xf32>
    %567 = vector.broadcast %540 : vector<1x8xf32> to vector<8x8xf32>
    %568 = arith.addf %566, %567 : vector<8x8xf32>
    %cst_167 = arith.constant dense<0xFF800000> : vector<8xf32>
    %569 = vector.multi_reduction <maximumf>, %568, %cst_167 [1] : vector<8x8xf32> to vector<8xf32>
    %570 = vector.shape_cast %569 : vector<8xf32> to vector<8x1xf32>
    %571 = vector.broadcast %570 : vector<8x1xf32> to vector<8x8xf32>
    %572 = arith.subf %568, %571 : vector<8x8xf32>
    %573 = math.exp %572 : vector<8x8xf32>
    %cst_168 = arith.constant dense<0.000000e+00> : vector<8xf32>
    %574 = vector.multi_reduction <add>, %573, %cst_168 [1] : vector<8x8xf32> to vector<8xf32>
    %575 = vector.shape_cast %574 : vector<8xf32> to vector<8x1xf32>
    %576 = tpu.reciprocal %575 {approx = true} : vector<8x1xf32> -> vector<8x1xf32>
    %577 = vector.broadcast %576 : vector<8x1xf32> to vector<8x8xf32>
    %578 = arith.mulf %573, %577 : vector<8x8xf32>
    %cst_169 = arith.constant dense<0.000000e+00> : vector<8x8xf32>
    %579 = tpu.matmul %578, %565, %cst_169 {dimension_numbers = #tpu.dot_dimension_numbers<[1], [0], [0], [1], [0, 0, 1, 1], [], []>} : vector<8x8xf32>, vector<8x8xf32>, vector<8x8xf32> -> vector<8x8xf32>
    %580 = vector.extract_strided_slice %560 {offsets = [0, 8], sizes = [8, 8], strides = [1, 1]} : vector<8x96xf32> to vector<8x8xf32>
    %cst_170 = arith.constant 0.353553385 : f32
    %581 = vector.broadcast %cst_170 : f32 to vector<8x8xf32>
    %582 = arith.mulf %580, %581 : vector<8x8xf32>
    %583 = vector.extract_strided_slice %560 {offsets = [0, 40], sizes = [8, 8], strides = [1, 1]} : vector<8x96xf32> to vector<8x8xf32>
    %584 = vector.extract_strided_slice %560 {offsets = [0, 72], sizes = [8, 8], strides = [1, 1]} : vector<8x96xf32> to vector<8x8xf32>
    %cst_171 = arith.constant dense<0.000000e+00> : vector<8x8xf32>
    %585 = tpu.matmul %582, %583, %cst_171 {dimension_numbers = #tpu.dot_dimension_numbers<[1], [1], [0], [0], [0, 0, 1, 0], [], []>} : vector<8x8xf32>, vector<8x8xf32>, vector<8x8xf32> -> vector<8x8xf32>
    %586 = vector.broadcast %540 : vector<1x8xf32> to vector<8x8xf32>
    %587 = arith.addf %585, %586 : vector<8x8xf32>
    %cst_172 = arith.constant dense<0xFF800000> : vector<8xf32>
    %588 = vector.multi_reduction <maximumf>, %587, %cst_172 [1] : vector<8x8xf32> to vector<8xf32>
    %589 = vector.shape_cast %588 : vector<8xf32> to vector<8x1xf32>
    %590 = vector.broadcast %589 : vector<8x1xf32> to vector<8x8xf32>
    %591 = arith.subf %587, %590 : vector<8x8xf32>
    %592 = math.exp %591 : vector<8x8xf32>
    %cst_173 = arith.constant dense<0.000000e+00> : vector<8xf32>
    %593 = vector.multi_reduction <add>, %592, %cst_173 [1] : vector<8x8xf32> to vector<8xf32>
    %594 = vector.shape_cast %593 : vector<8xf32> to vector<8x1xf32>
    %595 = tpu.reciprocal %594 {approx = true} : vector<8x1xf32> -> vector<8x1xf32>
    %596 = vector.broadcast %595 : vector<8x1xf32> to vector<8x8xf32>
    %597 = arith.mulf %592, %596 : vector<8x8xf32>
    %cst_174 = arith.constant dense<0.000000e+00> : vector<8x8xf32>
    %598 = tpu.matmul %597, %584, %cst_174 {dimension_numbers = #tpu.dot_dimension_numbers<[1], [0], [0], [1], [0, 0, 1, 1], [], []>} : vector<8x8xf32>, vector<8x8xf32>, vector<8x8xf32> -> vector<8x8xf32>
    %599 = vector.extract_strided_slice %560 {offsets = [0, 16], sizes = [8, 8], strides = [1, 1]} : vector<8x96xf32> to vector<8x8xf32>
    %cst_175 = arith.constant 0.353553385 : f32
    %600 = vector.broadcast %cst_175 : f32 to vector<8x8xf32>
    %601 = arith.mulf %599, %600 : vector<8x8xf32>
    %602 = vector.extract_strided_slice %560 {offsets = [0, 48], sizes = [8, 8], strides = [1, 1]} : vector<8x96xf32> to vector<8x8xf32>
    %603 = vector.extract_strided_slice %560 {offsets = [0, 80], sizes = [8, 8], strides = [1, 1]} : vector<8x96xf32> to vector<8x8xf32>
    %cst_176 = arith.constant dense<0.000000e+00> : vector<8x8xf32>
    %604 = tpu.matmul %601, %602, %cst_176 {dimension_numbers = #tpu.dot_dimension_numbers<[1], [1], [0], [0], [0, 0, 1, 0], [], []>} : vector<8x8xf32>, vector<8x8xf32>, vector<8x8xf32> -> vector<8x8xf32>
    %605 = vector.broadcast %540 : vector<1x8xf32> to vector<8x8xf32>
    %606 = arith.addf %604, %605 : vector<8x8xf32>
    %cst_177 = arith.constant dense<0xFF800000> : vector<8xf32>
    %607 = vector.multi_reduction <maximumf>, %606, %cst_177 [1] : vector<8x8xf32> to vector<8xf32>
    %608 = vector.shape_cast %607 : vector<8xf32> to vector<8x1xf32>
    %609 = vector.broadcast %608 : vector<8x1xf32> to vector<8x8xf32>
    %610 = arith.subf %606, %609 : vector<8x8xf32>
    %611 = math.exp %610 : vector<8x8xf32>
    %cst_178 = arith.constant dense<0.000000e+00> : vector<8xf32>
    %612 = vector.multi_reduction <add>, %611, %cst_178 [1] : vector<8x8xf32> to vector<8xf32>
    %613 = vector.shape_cast %612 : vector<8xf32> to vector<8x1xf32>
    %614 = tpu.reciprocal %613 {approx = true} : vector<8x1xf32> -> vector<8x1xf32>
    %615 = vector.broadcast %614 : vector<8x1xf32> to vector<8x8xf32>
    %616 = arith.mulf %611, %615 : vector<8x8xf32>
    %cst_179 = arith.constant dense<0.000000e+00> : vector<8x8xf32>
    %617 = tpu.matmul %616, %603, %cst_179 {dimension_numbers = #tpu.dot_dimension_numbers<[1], [0], [0], [1], [0, 0, 1, 1], [], []>} : vector<8x8xf32>, vector<8x8xf32>, vector<8x8xf32> -> vector<8x8xf32>
    %618 = vector.extract_strided_slice %560 {offsets = [0, 24], sizes = [8, 8], strides = [1, 1]} : vector<8x96xf32> to vector<8x8xf32>
    %cst_180 = arith.constant 0.353553385 : f32
    %619 = vector.broadcast %cst_180 : f32 to vector<8x8xf32>
    %620 = arith.mulf %618, %619 : vector<8x8xf32>
    %621 = vector.extract_strided_slice %560 {offsets = [0, 56], sizes = [8, 8], strides = [1, 1]} : vector<8x96xf32> to vector<8x8xf32>
    %622 = vector.extract_strided_slice %560 {offsets = [0, 88], sizes = [8, 8], strides = [1, 1]} : vector<8x96xf32> to vector<8x8xf32>
    %cst_181 = arith.constant dense<0.000000e+00> : vector<8x8xf32>
    %623 = tpu.matmul %620, %621, %cst_181 {dimension_numbers = #tpu.dot_dimension_numbers<[1], [1], [0], [0], [0, 0, 1, 0], [], []>} : vector<8x8xf32>, vector<8x8xf32>, vector<8x8xf32> -> vector<8x8xf32>
    %624 = vector.broadcast %540 : vector<1x8xf32> to vector<8x8xf32>
    %625 = arith.addf %623, %624 : vector<8x8xf32>
    %cst_182 = arith.constant dense<0xFF800000> : vector<8xf32>
    %626 = vector.multi_reduction <maximumf>, %625, %cst_182 [1] : vector<8x8xf32> to vector<8xf32>
    %627 = vector.shape_cast %626 : vector<8xf32> to vector<8x1xf32>
    %628 = vector.broadcast %627 : vector<8x1xf32> to vector<8x8xf32>
    %629 = arith.subf %625, %628 : vector<8x8xf32>
    %630 = math.exp %629 : vector<8x8xf32>
    %cst_183 = arith.constant dense<0.000000e+00> : vector<8xf32>
    %631 = vector.multi_reduction <add>, %630, %cst_183 [1] : vector<8x8xf32> to vector<8xf32>
    %632 = vector.shape_cast %631 : vector<8xf32> to vector<8x1xf32>
    %633 = tpu.reciprocal %632 {approx = true} : vector<8x1xf32> -> vector<8x1xf32>
    %634 = vector.broadcast %633 : vector<8x1xf32> to vector<8x8xf32>
    %635 = arith.mulf %630, %634 : vector<8x8xf32>
    %cst_184 = arith.constant dense<0.000000e+00> : vector<8x8xf32>
    %636 = tpu.matmul %635, %622, %cst_184 {dimension_numbers = #tpu.dot_dimension_numbers<[1], [0], [0], [1], [0, 0, 1, 1], [], []>} : vector<8x8xf32>, vector<8x8xf32>, vector<8x8xf32> -> vector<8x8xf32>
    %637 = tpu.concatenate %579, %598, %617, %636 in 1 : vector<8x8xf32>, vector<8x8xf32>, vector<8x8xf32>, vector<8x8xf32> -> vector<8x32xf32>
    %638 = arith.truncf %637 : vector<8x32xf32> to vector<8x32xbf16>
    %cst_185 = arith.constant dense<0.000000e+00> : vector<8x32xf32>
    %639 = tpu.matmul %638, %544, %cst_185 {dimension_numbers = #tpu.dot_dimension_numbers<[1], [0], [0], [1], [0, 0, 1, 1], [], []>} : vector<8x32xbf16>, vector<32x32xbf16>, vector<8x32xf32> -> vector<8x32xf32>
    %640 = vector.broadcast %550 : vector<1x32xf32> to vector<8x32xf32>
    %641 = arith.addf %639, %640 : vector<8x32xf32>
    %642 = arith.addf %641, %534 : vector<8x32xf32>
    %cst_186 = arith.constant dense<0.000000e+00> : vector<8xf32>
    %643 = vector.multi_reduction <add>, %642, %cst_186 [1] : vector<8x32xf32> to vector<8xf32>
    %644 = vector.shape_cast %643 : vector<8xf32> to vector<8x1xf32>
    %cst_187 = arith.constant 3.200000e+01 : f32
    %645 = vector.broadcast %cst_187 : f32 to vector<8x1xf32>
    %646 = arith.divf %644, %645 : vector<8x1xf32>
    %647 = vector.broadcast %646 : vector<8x1xf32> to vector<8x32xf32>
    %648 = arith.subf %642, %647 : vector<8x32xf32>
    %649 = arith.mulf %648, %648 : vector<8x32xf32>
    %cst_188 = arith.constant dense<0.000000e+00> : vector<8xf32>
    %650 = vector.multi_reduction <add>, %649, %cst_188 [1] : vector<8x32xf32> to vector<8xf32>
    %651 = vector.shape_cast %650 : vector<8xf32> to vector<8x1xf32>
    %cst_189 = arith.constant 3.200000e+01 : f32
    %652 = vector.broadcast %cst_189 : f32 to vector<8x1xf32>
    %653 = arith.divf %651, %652 : vector<8x1xf32>
    %654 = vector.broadcast %646 : vector<8x1xf32> to vector<8x32xf32>
    %655 = arith.subf %642, %654 : vector<8x32xf32>
    %cst_190 = arith.constant 9.99999996E-13 : f32
    %656 = vector.broadcast %cst_190 : f32 to vector<8x1xf32>
    %657 = arith.addf %653, %656 : vector<8x1xf32>
    %658 = math.rsqrt %657 : vector<8x1xf32>
    %659 = vector.broadcast %658 : vector<8x1xf32> to vector<8x32xf32>
    %660 = arith.mulf %655, %659 : vector<8x32xf32>
    %661 = vector.broadcast %551 : vector<1x32xf32> to vector<8x32xf32>
    %662 = arith.mulf %660, %661 : vector<8x32xf32>
    %663 = vector.broadcast %552 : vector<1x32xf32> to vector<8x32xf32>
    %664 = arith.addf %662, %663 : vector<8x32xf32>
    %665 = arith.truncf %664 : vector<8x32xf32> to vector<8x32xbf16>
    %cst_191 = arith.constant dense<0.000000e+00> : vector<8x64xf32>
    %666 = tpu.matmul %665, %545, %cst_191 {dimension_numbers = #tpu.dot_dimension_numbers<[1], [0], [0], [1], [0, 0, 1, 1], [], []>} : vector<8x32xbf16>, vector<32x64xbf16>, vector<8x64xf32> -> vector<8x64xf32>
    %667 = vector.broadcast %553 : vector<1x64xf32> to vector<8x64xf32>
    %668 = arith.addf %666, %667 : vector<8x64xf32>
    %cst_192 = arith.constant 5.000000e-01 : f32
    %669 = vector.broadcast %cst_192 : f32 to vector<8x64xf32>
    %670 = arith.mulf %669, %668 : vector<8x64xf32>
    %cst_193 = arith.constant 0.707106769 : f32
    %671 = vector.broadcast %cst_193 : f32 to vector<8x64xf32>
    %672 = arith.mulf %668, %671 : vector<8x64xf32>
    %cst_194 = arith.constant 0.000000e+00 : f32
    %673 = vector.broadcast %cst_194 : f32 to vector<8x64xf32>
    %674 = arith.cmpf oge, %672, %673 : vector<8x64xf32>
    %cst_195 = arith.constant 1.000000e+00 : f32
    %cst_196 = arith.constant -1.000000e+00 : f32
    %675 = vector.broadcast %cst_195 : f32 to vector<8x64xf32>
    %676 = vector.broadcast %cst_196 : f32 to vector<8x64xf32>
    %677 = arith.select %674, %675, %676 : vector<8x64xi1>, vector<8x64xf32>
    %678 = math.absf %672 : vector<8x64xf32>
    %cst_197 = arith.constant 0.327591091 : f32
    %679 = vector.broadcast %cst_197 : f32 to vector<8x64xf32>
    %680 = arith.mulf %679, %678 : vector<8x64xf32>
    %cst_198 = arith.constant 1.000000e+00 : f32
    %681 = vector.broadcast %cst_198 : f32 to vector<8x64xf32>
    %682 = arith.addf %681, %680 : vector<8x64xf32>
    %cst_199 = arith.constant 1.000000e+00 : f32
    %683 = vector.broadcast %cst_199 : f32 to vector<8x64xf32>
    %684 = arith.divf %683, %682 : vector<8x64xf32>
    %cst_200 = arith.constant 1.06140542 : f32
    %685 = vector.broadcast %cst_200 : f32 to vector<8x64xf32>
    %686 = arith.mulf %685, %684 : vector<8x64xf32>
    %cst_201 = arith.constant -1.45315206 : f32
    %687 = vector.broadcast %cst_201 : f32 to vector<8x64xf32>
    %688 = arith.addf %686, %687 : vector<8x64xf32>
    %689 = arith.mulf %688, %684 : vector<8x64xf32>
    %cst_202 = arith.constant 1.42141378 : f32
    %690 = vector.broadcast %cst_202 : f32 to vector<8x64xf32>
    %691 = arith.addf %689, %690 : vector<8x64xf32>
    %692 = arith.mulf %691, %684 : vector<8x64xf32>
    %cst_203 = arith.constant -0.284496725 : f32
    %693 = vector.broadcast %cst_203 : f32 to vector<8x64xf32>
    %694 = arith.addf %692, %693 : vector<8x64xf32>
    %695 = arith.mulf %694, %684 : vector<8x64xf32>
    %cst_204 = arith.constant 0.254829586 : f32
    %696 = vector.broadcast %cst_204 : f32 to vector<8x64xf32>
    %697 = arith.addf %695, %696 : vector<8x64xf32>
    %698 = arith.mulf %697, %684 : vector<8x64xf32>
    %cst_205 = arith.constant 0.000000e+00 : f32
    %699 = vector.broadcast %cst_205 : f32 to vector<8x64xf32>
    %700 = arith.subf %699, %678 : vector<8x64xf32>
    %701 = arith.mulf %700, %678 : vector<8x64xf32>
    %702 = math.exp %701 : vector<8x64xf32>
    %703 = arith.mulf %698, %702 : vector<8x64xf32>
    %cst_206 = arith.constant 1.000000e+00 : f32
    %704 = vector.broadcast %cst_206 : f32 to vector<8x64xf32>
    %705 = arith.subf %704, %703 : vector<8x64xf32>
    %706 = arith.mulf %677, %705 : vector<8x64xf32>
    %cst_207 = arith.constant 1.000000e+00 : f32
    %707 = vector.broadcast %cst_207 : f32 to vector<8x64xf32>
    %708 = arith.addf %707, %706 : vector<8x64xf32>
    %709 = arith.mulf %670, %708 : vector<8x64xf32>
    %710 = arith.truncf %709 : vector<8x64xf32> to vector<8x64xbf16>
    %cst_208 = arith.constant dense<0.000000e+00> : vector<8x32xf32>
    %711 = tpu.matmul %710, %546, %cst_208 {dimension_numbers = #tpu.dot_dimension_numbers<[1], [0], [0], [1], [0, 0, 1, 1], [], []>} : vector<8x64xbf16>, vector<64x32xbf16>, vector<8x32xf32> -> vector<8x32xf32>
    %712 = vector.broadcast %554 : vector<1x32xf32> to vector<8x32xf32>
    %713 = arith.addf %711, %712 : vector<8x32xf32>
    %714 = arith.addf %713, %664 : vector<8x32xf32>
    %cst_209 = arith.constant dense<0.000000e+00> : vector<8xf32>
    %715 = vector.multi_reduction <add>, %714, %cst_209 [1] : vector<8x32xf32> to vector<8xf32>
    %716 = vector.shape_cast %715 : vector<8xf32> to vector<8x1xf32>
    %cst_210 = arith.constant 3.200000e+01 : f32
    %717 = vector.broadcast %cst_210 : f32 to vector<8x1xf32>
    %718 = arith.divf %716, %717 : vector<8x1xf32>
    %719 = vector.broadcast %718 : vector<8x1xf32> to vector<8x32xf32>
    %720 = arith.subf %714, %719 : vector<8x32xf32>
    %721 = arith.mulf %720, %720 : vector<8x32xf32>
    %cst_211 = arith.constant dense<0.000000e+00> : vector<8xf32>
    %722 = vector.multi_reduction <add>, %721, %cst_211 [1] : vector<8x32xf32> to vector<8xf32>
    %723 = vector.shape_cast %722 : vector<8xf32> to vector<8x1xf32>
    %cst_212 = arith.constant 3.200000e+01 : f32
    %724 = vector.broadcast %cst_212 : f32 to vector<8x1xf32>
    %725 = arith.divf %723, %724 : vector<8x1xf32>
    %726 = vector.broadcast %718 : vector<8x1xf32> to vector<8x32xf32>
    %727 = arith.subf %714, %726 : vector<8x32xf32>
    %cst_213 = arith.constant 9.99999996E-13 : f32
    %728 = vector.broadcast %cst_213 : f32 to vector<8x1xf32>
    %729 = arith.addf %725, %728 : vector<8x1xf32>
    %730 = math.rsqrt %729 : vector<8x1xf32>
    %731 = vector.broadcast %730 : vector<8x1xf32> to vector<8x32xf32>
    %732 = arith.mulf %727, %731 : vector<8x32xf32>
    %733 = vector.broadcast %555 : vector<1x32xf32> to vector<8x32xf32>
    %734 = arith.mulf %732, %733 : vector<8x32xf32>
    %735 = vector.broadcast %556 : vector<1x32xf32> to vector<8x32xf32>
    %736 = arith.addf %734, %735 : vector<8x32xf32>
    %c1_214 = arith.constant 1 : index
    %c0_215 = arith.constant 0 : index
    %c0_216 = arith.constant 0 : index
    %737 = vector.load %arg5[%c1_214, %c0_215, %c0_216] : memref<2x160x96xbf16, #tpu.memory_space<vmem>>, vector<1x160x96xbf16>
    %738 = vector.shape_cast %737 : vector<1x160x96xbf16> to vector<160x96xbf16>
    %739 = vector.extract_strided_slice %738 {offsets = [0, 0], sizes = [32, 96], strides = [1, 1]} : vector<160x96xbf16> to vector<32x96xbf16>
    %740 = vector.extract_strided_slice %738 {offsets = [32, 0], sizes = [32, 32], strides = [1, 1]} : vector<160x96xbf16> to vector<32x32xbf16>
    %741 = vector.extract_strided_slice %738 {offsets = [64, 0], sizes = [32, 64], strides = [1, 1]} : vector<160x96xbf16> to vector<32x64xbf16>
    %742 = vector.extract_strided_slice %738 {offsets = [96, 0], sizes = [64, 32], strides = [1, 1]} : vector<160x96xbf16> to vector<64x32xbf16>
    %c1_217 = arith.constant 1 : index
    %c0_218 = arith.constant 0 : index
    %c0_219 = arith.constant 0 : index
    %743 = vector.load %arg6[%c1_217, %c0_218, %c0_219] : memref<2x8x96xf32, #tpu.memory_space<vmem>>, vector<1x8x96xf32>
    %744 = vector.shape_cast %743 : vector<1x8x96xf32> to vector<8x96xf32>
    %745 = vector.extract_strided_slice %744 {offsets = [0, 0], sizes = [1, 96], strides = [1, 1]} : vector<8x96xf32> to vector<1x96xf32>
    %746 = vector.extract_strided_slice %744 {offsets = [1, 0], sizes = [1, 32], strides = [1, 1]} : vector<8x96xf32> to vector<1x32xf32>
    %747 = vector.extract_strided_slice %744 {offsets = [2, 0], sizes = [1, 32], strides = [1, 1]} : vector<8x96xf32> to vector<1x32xf32>
    %748 = vector.extract_strided_slice %744 {offsets = [3, 0], sizes = [1, 32], strides = [1, 1]} : vector<8x96xf32> to vector<1x32xf32>
    %749 = vector.extract_strided_slice %744 {offsets = [4, 0], sizes = [1, 64], strides = [1, 1]} : vector<8x96xf32> to vector<1x64xf32>
    %750 = vector.extract_strided_slice %744 {offsets = [5, 0], sizes = [1, 32], strides = [1, 1]} : vector<8x96xf32> to vector<1x32xf32>
    %751 = vector.extract_strided_slice %744 {offsets = [6, 0], sizes = [1, 32], strides = [1, 1]} : vector<8x96xf32> to vector<1x32xf32>
    %752 = vector.extract_strided_slice %744 {offsets = [7, 0], sizes = [1, 32], strides = [1, 1]} : vector<8x96xf32> to vector<1x32xf32>
    %753 = arith.truncf %736 : vector<8x32xf32> to vector<8x32xbf16>
    %cst_220 = arith.constant dense<0.000000e+00> : vector<8x96xf32>
    %754 = tpu.matmul %753, %739, %cst_220 {dimension_numbers = #tpu.dot_dimension_numbers<[1], [0], [0], [1], [0, 0, 1, 1], [], []>} : vector<8x32xbf16>, vector<32x96xbf16>, vector<8x96xf32> -> vector<8x96xf32>
    %755 = vector.broadcast %745 : vector<1x96xf32> to vector<8x96xf32>
    %756 = arith.addf %754, %755 : vector<8x96xf32>
    %757 = vector.extract_strided_slice %756 {offsets = [0, 0], sizes = [8, 8], strides = [1, 1]} : vector<8x96xf32> to vector<8x8xf32>
    %cst_221 = arith.constant 0.353553385 : f32
    %758 = vector.broadcast %cst_221 : f32 to vector<8x8xf32>
    %759 = arith.mulf %757, %758 : vector<8x8xf32>
    %760 = vector.extract_strided_slice %756 {offsets = [0, 32], sizes = [8, 8], strides = [1, 1]} : vector<8x96xf32> to vector<8x8xf32>
    %761 = vector.extract_strided_slice %756 {offsets = [0, 64], sizes = [8, 8], strides = [1, 1]} : vector<8x96xf32> to vector<8x8xf32>
    %cst_222 = arith.constant dense<0.000000e+00> : vector<8x8xf32>
    %762 = tpu.matmul %759, %760, %cst_222 {dimension_numbers = #tpu.dot_dimension_numbers<[1], [1], [0], [0], [0, 0, 1, 0], [], []>} : vector<8x8xf32>, vector<8x8xf32>, vector<8x8xf32> -> vector<8x8xf32>
    %763 = vector.broadcast %540 : vector<1x8xf32> to vector<8x8xf32>
    %764 = arith.addf %762, %763 : vector<8x8xf32>
    %cst_223 = arith.constant dense<0xFF800000> : vector<8xf32>
    %765 = vector.multi_reduction <maximumf>, %764, %cst_223 [1] : vector<8x8xf32> to vector<8xf32>
    %766 = vector.shape_cast %765 : vector<8xf32> to vector<8x1xf32>
    %767 = vector.broadcast %766 : vector<8x1xf32> to vector<8x8xf32>
    %768 = arith.subf %764, %767 : vector<8x8xf32>
    %769 = math.exp %768 : vector<8x8xf32>
    %cst_224 = arith.constant dense<0.000000e+00> : vector<8xf32>
    %770 = vector.multi_reduction <add>, %769, %cst_224 [1] : vector<8x8xf32> to vector<8xf32>
    %771 = vector.shape_cast %770 : vector<8xf32> to vector<8x1xf32>
    %772 = tpu.reciprocal %771 {approx = true} : vector<8x1xf32> -> vector<8x1xf32>
    %773 = vector.broadcast %772 : vector<8x1xf32> to vector<8x8xf32>
    %774 = arith.mulf %769, %773 : vector<8x8xf32>
    %cst_225 = arith.constant dense<0.000000e+00> : vector<8x8xf32>
    %775 = tpu.matmul %774, %761, %cst_225 {dimension_numbers = #tpu.dot_dimension_numbers<[1], [0], [0], [1], [0, 0, 1, 1], [], []>} : vector<8x8xf32>, vector<8x8xf32>, vector<8x8xf32> -> vector<8x8xf32>
    %776 = vector.extract_strided_slice %756 {offsets = [0, 8], sizes = [8, 8], strides = [1, 1]} : vector<8x96xf32> to vector<8x8xf32>
    %cst_226 = arith.constant 0.353553385 : f32
    %777 = vector.broadcast %cst_226 : f32 to vector<8x8xf32>
    %778 = arith.mulf %776, %777 : vector<8x8xf32>
    %779 = vector.extract_strided_slice %756 {offsets = [0, 40], sizes = [8, 8], strides = [1, 1]} : vector<8x96xf32> to vector<8x8xf32>
    %780 = vector.extract_strided_slice %756 {offsets = [0, 72], sizes = [8, 8], strides = [1, 1]} : vector<8x96xf32> to vector<8x8xf32>
    %cst_227 = arith.constant dense<0.000000e+00> : vector<8x8xf32>
    %781 = tpu.matmul %778, %779, %cst_227 {dimension_numbers = #tpu.dot_dimension_numbers<[1], [1], [0], [0], [0, 0, 1, 0], [], []>} : vector<8x8xf32>, vector<8x8xf32>, vector<8x8xf32> -> vector<8x8xf32>
    %782 = vector.broadcast %540 : vector<1x8xf32> to vector<8x8xf32>
    %783 = arith.addf %781, %782 : vector<8x8xf32>
    %cst_228 = arith.constant dense<0xFF800000> : vector<8xf32>
    %784 = vector.multi_reduction <maximumf>, %783, %cst_228 [1] : vector<8x8xf32> to vector<8xf32>
    %785 = vector.shape_cast %784 : vector<8xf32> to vector<8x1xf32>
    %786 = vector.broadcast %785 : vector<8x1xf32> to vector<8x8xf32>
    %787 = arith.subf %783, %786 : vector<8x8xf32>
    %788 = math.exp %787 : vector<8x8xf32>
    %cst_229 = arith.constant dense<0.000000e+00> : vector<8xf32>
    %789 = vector.multi_reduction <add>, %788, %cst_229 [1] : vector<8x8xf32> to vector<8xf32>
    %790 = vector.shape_cast %789 : vector<8xf32> to vector<8x1xf32>
    %791 = tpu.reciprocal %790 {approx = true} : vector<8x1xf32> -> vector<8x1xf32>
    %792 = vector.broadcast %791 : vector<8x1xf32> to vector<8x8xf32>
    %793 = arith.mulf %788, %792 : vector<8x8xf32>
    %cst_230 = arith.constant dense<0.000000e+00> : vector<8x8xf32>
    %794 = tpu.matmul %793, %780, %cst_230 {dimension_numbers = #tpu.dot_dimension_numbers<[1], [0], [0], [1], [0, 0, 1, 1], [], []>} : vector<8x8xf32>, vector<8x8xf32>, vector<8x8xf32> -> vector<8x8xf32>
    %795 = vector.extract_strided_slice %756 {offsets = [0, 16], sizes = [8, 8], strides = [1, 1]} : vector<8x96xf32> to vector<8x8xf32>
    %cst_231 = arith.constant 0.353553385 : f32
    %796 = vector.broadcast %cst_231 : f32 to vector<8x8xf32>
    %797 = arith.mulf %795, %796 : vector<8x8xf32>
    %798 = vector.extract_strided_slice %756 {offsets = [0, 48], sizes = [8, 8], strides = [1, 1]} : vector<8x96xf32> to vector<8x8xf32>
    %799 = vector.extract_strided_slice %756 {offsets = [0, 80], sizes = [8, 8], strides = [1, 1]} : vector<8x96xf32> to vector<8x8xf32>
    %cst_232 = arith.constant dense<0.000000e+00> : vector<8x8xf32>
    %800 = tpu.matmul %797, %798, %cst_232 {dimension_numbers = #tpu.dot_dimension_numbers<[1], [1], [0], [0], [0, 0, 1, 0], [], []>} : vector<8x8xf32>, vector<8x8xf32>, vector<8x8xf32> -> vector<8x8xf32>
    %801 = vector.broadcast %540 : vector<1x8xf32> to vector<8x8xf32>
    %802 = arith.addf %800, %801 : vector<8x8xf32>
    %cst_233 = arith.constant dense<0xFF800000> : vector<8xf32>
    %803 = vector.multi_reduction <maximumf>, %802, %cst_233 [1] : vector<8x8xf32> to vector<8xf32>
    %804 = vector.shape_cast %803 : vector<8xf32> to vector<8x1xf32>
    %805 = vector.broadcast %804 : vector<8x1xf32> to vector<8x8xf32>
    %806 = arith.subf %802, %805 : vector<8x8xf32>
    %807 = math.exp %806 : vector<8x8xf32>
    %cst_234 = arith.constant dense<0.000000e+00> : vector<8xf32>
    %808 = vector.multi_reduction <add>, %807, %cst_234 [1] : vector<8x8xf32> to vector<8xf32>
    %809 = vector.shape_cast %808 : vector<8xf32> to vector<8x1xf32>
    %810 = tpu.reciprocal %809 {approx = true} : vector<8x1xf32> -> vector<8x1xf32>
    %811 = vector.broadcast %810 : vector<8x1xf32> to vector<8x8xf32>
    %812 = arith.mulf %807, %811 : vector<8x8xf32>
    %cst_235 = arith.constant dense<0.000000e+00> : vector<8x8xf32>
    %813 = tpu.matmul %812, %799, %cst_235 {dimension_numbers = #tpu.dot_dimension_numbers<[1], [0], [0], [1], [0, 0, 1, 1], [], []>} : vector<8x8xf32>, vector<8x8xf32>, vector<8x8xf32> -> vector<8x8xf32>
    %814 = vector.extract_strided_slice %756 {offsets = [0, 24], sizes = [8, 8], strides = [1, 1]} : vector<8x96xf32> to vector<8x8xf32>
    %cst_236 = arith.constant 0.353553385 : f32
    %815 = vector.broadcast %cst_236 : f32 to vector<8x8xf32>
    %816 = arith.mulf %814, %815 : vector<8x8xf32>
    %817 = vector.extract_strided_slice %756 {offsets = [0, 56], sizes = [8, 8], strides = [1, 1]} : vector<8x96xf32> to vector<8x8xf32>
    %818 = vector.extract_strided_slice %756 {offsets = [0, 88], sizes = [8, 8], strides = [1, 1]} : vector<8x96xf32> to vector<8x8xf32>
    %cst_237 = arith.constant dense<0.000000e+00> : vector<8x8xf32>
    %819 = tpu.matmul %816, %817, %cst_237 {dimension_numbers = #tpu.dot_dimension_numbers<[1], [1], [0], [0], [0, 0, 1, 0], [], []>} : vector<8x8xf32>, vector<8x8xf32>, vector<8x8xf32> -> vector<8x8xf32>
    %820 = vector.broadcast %540 : vector<1x8xf32> to vector<8x8xf32>
    %821 = arith.addf %819, %820 : vector<8x8xf32>
    %cst_238 = arith.constant dense<0xFF800000> : vector<8xf32>
    %822 = vector.multi_reduction <maximumf>, %821, %cst_238 [1] : vector<8x8xf32> to vector<8xf32>
    %823 = vector.shape_cast %822 : vector<8xf32> to vector<8x1xf32>
    %824 = vector.broadcast %823 : vector<8x1xf32> to vector<8x8xf32>
    %825 = arith.subf %821, %824 : vector<8x8xf32>
    %826 = math.exp %825 : vector<8x8xf32>
    %cst_239 = arith.constant dense<0.000000e+00> : vector<8xf32>
    %827 = vector.multi_reduction <add>, %826, %cst_239 [1] : vector<8x8xf32> to vector<8xf32>
    %828 = vector.shape_cast %827 : vector<8xf32> to vector<8x1xf32>
    %829 = tpu.reciprocal %828 {approx = true} : vector<8x1xf32> -> vector<8x1xf32>
    %830 = vector.broadcast %829 : vector<8x1xf32> to vector<8x8xf32>
    %831 = arith.mulf %826, %830 : vector<8x8xf32>
    %cst_240 = arith.constant dense<0.000000e+00> : vector<8x8xf32>
    %832 = tpu.matmul %831, %818, %cst_240 {dimension_numbers = #tpu.dot_dimension_numbers<[1], [0], [0], [1], [0, 0, 1, 1], [], []>} : vector<8x8xf32>, vector<8x8xf32>, vector<8x8xf32> -> vector<8x8xf32>
    %833 = tpu.concatenate %775, %794, %813, %832 in 1 : vector<8x8xf32>, vector<8x8xf32>, vector<8x8xf32>, vector<8x8xf32> -> vector<8x32xf32>
    %834 = arith.truncf %833 : vector<8x32xf32> to vector<8x32xbf16>
    %cst_241 = arith.constant dense<0.000000e+00> : vector<8x32xf32>
    %835 = tpu.matmul %834, %740, %cst_241 {dimension_numbers = #tpu.dot_dimension_numbers<[1], [0], [0], [1], [0, 0, 1, 1], [], []>} : vector<8x32xbf16>, vector<32x32xbf16>, vector<8x32xf32> -> vector<8x32xf32>
    %836 = vector.broadcast %746 : vector<1x32xf32> to vector<8x32xf32>
    %837 = arith.addf %835, %836 : vector<8x32xf32>
    %838 = arith.addf %837, %736 : vector<8x32xf32>
    %cst_242 = arith.constant dense<0.000000e+00> : vector<8xf32>
    %839 = vector.multi_reduction <add>, %838, %cst_242 [1] : vector<8x32xf32> to vector<8xf32>
    %840 = vector.shape_cast %839 : vector<8xf32> to vector<8x1xf32>
    %cst_243 = arith.constant 3.200000e+01 : f32
    %841 = vector.broadcast %cst_243 : f32 to vector<8x1xf32>
    %842 = arith.divf %840, %841 : vector<8x1xf32>
    %843 = vector.broadcast %842 : vector<8x1xf32> to vector<8x32xf32>
    %844 = arith.subf %838, %843 : vector<8x32xf32>
    %845 = arith.mulf %844, %844 : vector<8x32xf32>
    %cst_244 = arith.constant dense<0.000000e+00> : vector<8xf32>
    %846 = vector.multi_reduction <add>, %845, %cst_244 [1] : vector<8x32xf32> to vector<8xf32>
    %847 = vector.shape_cast %846 : vector<8xf32> to vector<8x1xf32>
    %cst_245 = arith.constant 3.200000e+01 : f32
    %848 = vector.broadcast %cst_245 : f32 to vector<8x1xf32>
    %849 = arith.divf %847, %848 : vector<8x1xf32>
    %850 = vector.broadcast %842 : vector<8x1xf32> to vector<8x32xf32>
    %851 = arith.subf %838, %850 : vector<8x32xf32>
    %cst_246 = arith.constant 9.99999996E-13 : f32
    %852 = vector.broadcast %cst_246 : f32 to vector<8x1xf32>
    %853 = arith.addf %849, %852 : vector<8x1xf32>
    %854 = math.rsqrt %853 : vector<8x1xf32>
    %855 = vector.broadcast %854 : vector<8x1xf32> to vector<8x32xf32>
    %856 = arith.mulf %851, %855 : vector<8x32xf32>
    %857 = vector.broadcast %747 : vector<1x32xf32> to vector<8x32xf32>
    %858 = arith.mulf %856, %857 : vector<8x32xf32>
    %859 = vector.broadcast %748 : vector<1x32xf32> to vector<8x32xf32>
    %860 = arith.addf %858, %859 : vector<8x32xf32>
    %861 = arith.truncf %860 : vector<8x32xf32> to vector<8x32xbf16>
    %cst_247 = arith.constant dense<0.000000e+00> : vector<8x64xf32>
    %862 = tpu.matmul %861, %741, %cst_247 {dimension_numbers = #tpu.dot_dimension_numbers<[1], [0], [0], [1], [0, 0, 1, 1], [], []>} : vector<8x32xbf16>, vector<32x64xbf16>, vector<8x64xf32> -> vector<8x64xf32>
    %863 = vector.broadcast %749 : vector<1x64xf32> to vector<8x64xf32>
    %864 = arith.addf %862, %863 : vector<8x64xf32>
    %cst_248 = arith.constant 5.000000e-01 : f32
    %865 = vector.broadcast %cst_248 : f32 to vector<8x64xf32>
    %866 = arith.mulf %865, %864 : vector<8x64xf32>
    %cst_249 = arith.constant 0.707106769 : f32
    %867 = vector.broadcast %cst_249 : f32 to vector<8x64xf32>
    %868 = arith.mulf %864, %867 : vector<8x64xf32>
    %cst_250 = arith.constant 0.000000e+00 : f32
    %869 = vector.broadcast %cst_250 : f32 to vector<8x64xf32>
    %870 = arith.cmpf oge, %868, %869 : vector<8x64xf32>
    %cst_251 = arith.constant 1.000000e+00 : f32
    %cst_252 = arith.constant -1.000000e+00 : f32
    %871 = vector.broadcast %cst_251 : f32 to vector<8x64xf32>
    %872 = vector.broadcast %cst_252 : f32 to vector<8x64xf32>
    %873 = arith.select %870, %871, %872 : vector<8x64xi1>, vector<8x64xf32>
    %874 = math.absf %868 : vector<8x64xf32>
    %cst_253 = arith.constant 0.327591091 : f32
    %875 = vector.broadcast %cst_253 : f32 to vector<8x64xf32>
    %876 = arith.mulf %875, %874 : vector<8x64xf32>
    %cst_254 = arith.constant 1.000000e+00 : f32
    %877 = vector.broadcast %cst_254 : f32 to vector<8x64xf32>
    %878 = arith.addf %877, %876 : vector<8x64xf32>
    %cst_255 = arith.constant 1.000000e+00 : f32
    %879 = vector.broadcast %cst_255 : f32 to vector<8x64xf32>
    %880 = arith.divf %879, %878 : vector<8x64xf32>
    %cst_256 = arith.constant 1.06140542 : f32
    %881 = vector.broadcast %cst_256 : f32 to vector<8x64xf32>
    %882 = arith.mulf %881, %880 : vector<8x64xf32>
    %cst_257 = arith.constant -1.45315206 : f32
    %883 = vector.broadcast %cst_257 : f32 to vector<8x64xf32>
    %884 = arith.addf %882, %883 : vector<8x64xf32>
    %885 = arith.mulf %884, %880 : vector<8x64xf32>
    %cst_258 = arith.constant 1.42141378 : f32
    %886 = vector.broadcast %cst_258 : f32 to vector<8x64xf32>
    %887 = arith.addf %885, %886 : vector<8x64xf32>
    %888 = arith.mulf %887, %880 : vector<8x64xf32>
    %cst_259 = arith.constant -0.284496725 : f32
    %889 = vector.broadcast %cst_259 : f32 to vector<8x64xf32>
    %890 = arith.addf %888, %889 : vector<8x64xf32>
    %891 = arith.mulf %890, %880 : vector<8x64xf32>
    %cst_260 = arith.constant 0.254829586 : f32
    %892 = vector.broadcast %cst_260 : f32 to vector<8x64xf32>
    %893 = arith.addf %891, %892 : vector<8x64xf32>
    %894 = arith.mulf %893, %880 : vector<8x64xf32>
    %cst_261 = arith.constant 0.000000e+00 : f32
    %895 = vector.broadcast %cst_261 : f32 to vector<8x64xf32>
    %896 = arith.subf %895, %874 : vector<8x64xf32>
    %897 = arith.mulf %896, %874 : vector<8x64xf32>
    %898 = math.exp %897 : vector<8x64xf32>
    %899 = arith.mulf %894, %898 : vector<8x64xf32>
    %cst_262 = arith.constant 1.000000e+00 : f32
    %900 = vector.broadcast %cst_262 : f32 to vector<8x64xf32>
    %901 = arith.subf %900, %899 : vector<8x64xf32>
    %902 = arith.mulf %873, %901 : vector<8x64xf32>
    %cst_263 = arith.constant 1.000000e+00 : f32
    %903 = vector.broadcast %cst_263 : f32 to vector<8x64xf32>
    %904 = arith.addf %903, %902 : vector<8x64xf32>
    %905 = arith.mulf %866, %904 : vector<8x64xf32>
    %906 = arith.truncf %905 : vector<8x64xf32> to vector<8x64xbf16>
    %cst_264 = arith.constant dense<0.000000e+00> : vector<8x32xf32>
    %907 = tpu.matmul %906, %742, %cst_264 {dimension_numbers = #tpu.dot_dimension_numbers<[1], [0], [0], [1], [0, 0, 1, 1], [], []>} : vector<8x64xbf16>, vector<64x32xbf16>, vector<8x32xf32> -> vector<8x32xf32>
    %908 = vector.broadcast %750 : vector<1x32xf32> to vector<8x32xf32>
    %909 = arith.addf %907, %908 : vector<8x32xf32>
    %910 = arith.addf %909, %860 : vector<8x32xf32>
    %cst_265 = arith.constant dense<0.000000e+00> : vector<8xf32>
    %911 = vector.multi_reduction <add>, %910, %cst_265 [1] : vector<8x32xf32> to vector<8xf32>
    %912 = vector.shape_cast %911 : vector<8xf32> to vector<8x1xf32>
    %cst_266 = arith.constant 3.200000e+01 : f32
    %913 = vector.broadcast %cst_266 : f32 to vector<8x1xf32>
    %914 = arith.divf %912, %913 : vector<8x1xf32>
    %915 = vector.broadcast %914 : vector<8x1xf32> to vector<8x32xf32>
    %916 = arith.subf %910, %915 : vector<8x32xf32>
    %917 = arith.mulf %916, %916 : vector<8x32xf32>
    %cst_267 = arith.constant dense<0.000000e+00> : vector<8xf32>
    %918 = vector.multi_reduction <add>, %917, %cst_267 [1] : vector<8x32xf32> to vector<8xf32>
    %919 = vector.shape_cast %918 : vector<8xf32> to vector<8x1xf32>
    %cst_268 = arith.constant 3.200000e+01 : f32
    %920 = vector.broadcast %cst_268 : f32 to vector<8x1xf32>
    %921 = arith.divf %919, %920 : vector<8x1xf32>
    %922 = vector.broadcast %914 : vector<8x1xf32> to vector<8x32xf32>
    %923 = arith.subf %910, %922 : vector<8x32xf32>
    %cst_269 = arith.constant 9.99999996E-13 : f32
    %924 = vector.broadcast %cst_269 : f32 to vector<8x1xf32>
    %925 = arith.addf %921, %924 : vector<8x1xf32>
    %926 = math.rsqrt %925 : vector<8x1xf32>
    %927 = vector.broadcast %926 : vector<8x1xf32> to vector<8x32xf32>
    %928 = arith.mulf %923, %927 : vector<8x32xf32>
    %929 = vector.broadcast %751 : vector<1x32xf32> to vector<8x32xf32>
    %930 = arith.mulf %928, %929 : vector<8x32xf32>
    %931 = vector.broadcast %752 : vector<1x32xf32> to vector<8x32xf32>
    %932 = arith.addf %930, %931 : vector<8x32xf32>
    %933 = vector.extract_strided_slice %932 {offsets = [0, 0], sizes = [1, 32], strides = [1, 1]} : vector<8x32xf32> to vector<1x32xf32>
    %934 = arith.mulf %933, %933 : vector<1x32xf32>
    %cst_270 = arith.constant dense<0.000000e+00> : vector<1xf32>
    %935 = vector.multi_reduction <add>, %934, %cst_270 [1] : vector<1x32xf32> to vector<1xf32>
    %936 = vector.shape_cast %935 : vector<1xf32> to vector<1x1xf32>
    %cst_271 = arith.constant 9.99999996E-13 : f32
    %937 = vector.broadcast %cst_271 : f32 to vector<1x1xf32>
    %938 = arith.addf %936, %937 : vector<1x1xf32>
    %939 = math.rsqrt %938 : vector<1x1xf32>
    %940 = vector.broadcast %939 : vector<1x1xf32> to vector<1x32xf32>
    %941 = arith.mulf %933, %940 : vector<1x32xf32>
    %c0_272 = arith.constant 0 : index
    %c0_273 = arith.constant 0 : index
    %942 = vector.load %arg7[%c0_272, %c0_273] : memref<32x16xf32, #tpu.memory_space<vmem>>, vector<32x16xf32>
    %cst_274 = arith.constant dense<0.000000e+00> : vector<1x16xf32>
    %943 = tpu.matmul %941, %942, %cst_274 {dimension_numbers = #tpu.dot_dimension_numbers<[1], [0], [0], [1], [0, 0, 1, 1], [], []>} : vector<1x32xf32>, vector<32x16xf32>, vector<1x16xf32> -> vector<1x16xf32>
    %cst_275 = arith.constant -1.000000e+00 : f32
    %cst_276 = arith.constant 1.000000e+00 : f32
    %944 = vector.broadcast %cst_275 : f32 to vector<1x16xf32>
    %945 = arith.maximumf %944, %943 : vector<1x16xf32>
    %946 = vector.broadcast %cst_276 : f32 to vector<1x16xf32>
    %947 = arith.minimumf %946, %945 : vector<1x16xf32>
    %948 = arith.mulf %947, %947 : vector<1x16xf32>
    %cst_277 = arith.constant 1.000000e+00 : f32
    %949 = vector.broadcast %cst_277 : f32 to vector<1x16xf32>
    %950 = arith.subf %949, %948 : vector<1x16xf32>
    %cst_278 = arith.constant 0.000000e+00 : f32
    %cst_279 = arith.constant 1.000000e+00 : f32
    %951 = vector.broadcast %cst_278 : f32 to vector<1x16xf32>
    %952 = arith.maximumf %951, %950 : vector<1x16xf32>
    %953 = vector.broadcast %cst_279 : f32 to vector<1x16xf32>
    %954 = arith.minimumf %953, %952 : vector<1x16xf32>
    %955 = math.sqrt %954 : vector<1x16xf32>
    %cst_280 = arith.constant 0.87758255 : f32
    %956 = vector.broadcast %cst_280 : f32 to vector<1x16xf32>
    %957 = arith.mulf %947, %956 : vector<1x16xf32>
    %cst_281 = arith.constant 0.47942555 : f32
    %958 = vector.broadcast %cst_281 : f32 to vector<1x16xf32>
    %959 = arith.mulf %955, %958 : vector<1x16xf32>
    %960 = arith.subf %957, %959 : vector<1x16xf32>
    %cst_282 = arith.constant -0.87758255 : f32
    %961 = vector.broadcast %cst_282 : f32 to vector<1x16xf32>
    %962 = arith.cmpf ogt, %947, %961 : vector<1x16xf32>
    %cst_283 = arith.constant 0.239712775 : f32
    %963 = vector.broadcast %cst_283 : f32 to vector<1x16xf32>
    %964 = arith.subf %947, %963 : vector<1x16xf32>
    %965 = arith.select %962, %960, %964 : vector<1x16xi1>, vector<1x16xf32>
    %c1_284 = arith.constant 1 : index
    %966 = memref.load %arg1[%c1_284] : memref<2xi32, #tpu.memory_space<smem>>
    %967 = tpu.iota {dimensions = array<i32: 1>} : vector<1x16xi32>
    %968 = vector.broadcast %966 : i32 to vector<1x16xi32>
    %969 = arith.cmpi eq, %967, %968 : vector<1x16xi32>
    %970 = arith.extui %969 : vector<1x16xi1> to vector<1x16xi32>
    %971 = arith.sitofp %970 : vector<1x16xi32> to vector<1x16xf32>
    %972 = arith.mulf %971, %965 : vector<1x16xf32>
    %cst_285 = arith.constant 1.000000e+00 : f32
    %973 = vector.broadcast %cst_285 : f32 to vector<1x16xf32>
    %974 = arith.subf %973, %971 : vector<1x16xf32>
    %975 = arith.mulf %974, %947 : vector<1x16xf32>
    %976 = arith.addf %972, %975 : vector<1x16xf32>
    %cst_286 = arith.constant 3.000000e+01 : f32
    %977 = vector.broadcast %cst_286 : f32 to vector<1x16xf32>
    %978 = arith.mulf %976, %977 : vector<1x16xf32>
    %979 = tpu.concatenate %492, %978 in 0 : vector<1x16xf32>, vector<1x16xf32> -> vector<2x16xf32>
    %c0_287 = arith.constant 0 : index
    %c0_288 = arith.constant 0 : index
    %980 = vector.load %arg8[%c0_287, %c0_288] : memref<2x16xf32, #tpu.memory_space<vmem>>, vector<2x16xf32>
    tpu.vector_store %arg8[%c0_287, %c0_288], %979 {strides = array<i32>} : memref<2x16xf32, #tpu.memory_space<vmem>>, vector<2x16xf32>,
    return
  }
  func.func @transform_0(%arg0: i32, %arg1: memref<2xi32, #tpu.memory_space<smem>>) -> (i32, i32, i32) {
    %c0_i32 = arith.constant 0 : i32
    %c0_i32_0 = arith.constant 0 : i32
    %c0_i32_1 = arith.constant 0 : i32
    %c0_i32_2 = arith.constant 0 : i32
    return %c0_i32, %c0_i32_0, %c0_i32_1 : i32, i32, i32
  }
  func.func @transform_1(%arg0: i32, %arg1: memref<2xi32, #tpu.memory_space<smem>>) -> (i32, i32, i32) {
    %c0_i32 = arith.constant 0 : i32
    %c0_i32_0 = arith.constant 0 : i32
    %c0_i32_1 = arith.constant 0 : i32
    %c0_i32_2 = arith.constant 0 : i32
    return %c0_i32, %c0_i32_0, %c0_i32_1 : i32, i32, i32
  }
  func.func @transform_2(%arg0: i32, %arg1: memref<2xi32, #tpu.memory_space<smem>>) -> (i32, i32) {
    %c0_i32 = arith.constant 0 : i32
    %c0_i32_0 = arith.constant 0 : i32
    %c0_i32_1 = arith.constant 0 : i32
    return %c0_i32, %c0_i32_0 : i32, i32
  }
  func.func @transform_3(%arg0: i32, %arg1: memref<2xi32, #tpu.memory_space<smem>>) -> (i32, i32, i32) {
    %c0_i32 = arith.constant 0 : i32
    %c0_i32_0 = arith.constant 0 : i32
    %c0_i32_1 = arith.constant 0 : i32
    %c0_i32_2 = arith.constant 0 : i32
    return %c0_i32, %c0_i32_0, %c0_i32_1 : i32, i32, i32
  }
  func.func @transform_4(%arg0: i32, %arg1: memref<2xi32, #tpu.memory_space<smem>>) -> (i32, i32, i32) {
    %c0_i32 = arith.constant 0 : i32
    %c0_i32_0 = arith.constant 0 : i32
    %c0_i32_1 = arith.constant 0 : i32
    %c0_i32_2 = arith.constant 0 : i32
    return %c0_i32, %c0_i32_0, %c0_i32_1 : i32, i32, i32
  }
  func.func @transform_5(%arg0: i32, %arg1: memref<2xi32, #tpu.memory_space<smem>>) -> (i32, i32) {
    %c0_i32 = arith.constant 0 : i32
    %c0_i32_0 = arith.constant 0 : i32
    %c0_i32_1 = arith.constant 0 : i32
    return %c0_i32, %c0_i32_0 : i32, i32
  }
  func.func @transform_6(%arg0: i32, %arg1: memref<2xi32, #tpu.memory_space<smem>>) -> (i32, i32) {
    %c0_i32 = arith.constant 0 : i32
    %c0_i32_0 = arith.constant 0 : i32
    %c0_i32_1 = arith.constant 0 : i32
    return %c0_i32, %c0_i32_0 : i32, i32
  }
}

</mosaic_0001>

<bundles_post_ra>
// kernel: forward.1
= control target key start
LH: loop header
LB: loop body
LE: loop exit
PB: predicated region body
PF: predicated region fallthrough
CT: control target
= control target key end

     0   :  { %s6229_s0 = inlined_call_operand.vmem [shape: s32[2], index: 0, kind: input, shape index: {}]   ;;  %s6230_s1 = inlined_call_operand.vmem [shape: s32[2,8,2], index: 1, kind: input, shape index: {}]   ;;  %s6231_s2 = inlined_call_operand.vmem [shape: f32[2,1,8], index: 2, kind: input, shape index: {}]   ;;  %s6232_s3 = inlined_call_operand.vmem [shape: bf16[120,32], index: 3, kind: input, shape index: {}]   ;;  %s6233_s4 = inlined_call_operand.vmem [shape: bf16[2,160,96], index: 4, kind: input, shape index: {}]   ;;  %s6234_s5 = inlined_call_operand.vmem [shape: f32[2,8,96], index: 5, kind: input, shape index: {}]   ;;  %s6235_s6 = inlined_call_operand.vmem [shape: f32[32,16], index: 6, kind: input, shape index: {}]   ;;  %s6236_s7 = inlined_call_operand.hbm [shape: f32[2,16], index: 7, kind: output, shape index: {}]  }
   0x1   :  { %s12_s26 = sshll.u32 %s6229_s0, 4  ;;  %s13_s26 = int_to_ptr.vmem [resolvable:$true] %s12_s26 }
   0x2   :  { %s5242_s27 = scalar_lea.vmem %s13_s26, 16  ;;  %p5247_p1 = scmp.lt.s32.totalorder %s13_s26, %s13_s26 }
   0x3   :  { %p5243_p0 = scmp.ne.s32.totalorder %s13_s26, %s5242_s27  ;;  %p5248_p2 = scmp.lt.s32.totalorder %s5242_s27, %s5242_s27 }
   0x5   :  { %p5249_p3 = por %p5248_p2, %p5247_p1 }
   0x7   :  { %p5250_p4 = pnand %p5249_p3, %p5243_p0 }
   0x9   :  { %5253 = shalt.err (!%p5250_p4)  }
   0xa   :  { %s5280_s28 = smov [#allocation3]  }
   0xb   :  { %15 = dma.vmem_to_smem %s13_s26, 16, %s5280_s28, [#allocation2] }
   0xc   :  { %5276 = dma.done.wait [#allocation2], 16 }
   0xd   :  { %5277 = vsyncadd [#allocation2], 4294967280 }
   0xe   :  { %17 = sfence }
   0xf   :  { %v52_v0 = vld [vmem:[%s6230_s1] sm:$0xff]  ;;  %v5281_v1 = vmov 0   ;;  %v5282_v2 = vmov 0.0   ;;  %v5082_v5 = vld [vmem:[%s6232_s3 + $0x8] sm:$0xff]   ;;  %v5283_v6 = vmov 1   ;;  %v5083_v7 = vld [vmem:[%s6232_s3 + $0x10] sm:$0xff]  }
  0x10   :  { %5076 = vset.pattern.permute.xlu0 %v5281_v1  ;;  %4676 = vmatprep.subr.bf16.mxu0 %v5282_v2  ;;  %v5081_v3 = vld [vmem:[%s6232_s3] sm:$0xff]   ;;  %v57_v4 = vadd.s32 100, %v52_v0  ;;  %v5084_v8 = vld [vmem:[%s6232_s3 + $0x18] sm:$0xff]   ;;  %vm5284_vm0 = vmmov 0   ;;  %v5086_v10 = vld [vmem:[%s6232_s3 + $0x28] sm:$0xff]  }
  0x11   :  { %54 = vperm.xlu0 %5076, %v52_v0   ;;  %4696 = vmatprep.subr.bf16.mxu1 %v5282_v2  ;;  %v5085_v9 = vld [vmem:[%s6232_s3 + $0x20] sm:$0xff]   ;;  %v46_v11 = vld [vmem:[%s6232_s3 + $0x38] sm:$0xf]  ;;  %v5087_v12 = vld [vmem:[%s6232_s3 + $0x30] sm:$0xff]  }
  0x12   :  { %4677 = vmatpush3.bf16.msra.mxu0 %v5081_v3  ;;  %5079 = vset.pattern.permute.xlu1 %v5283_v6 }
  0x13   :  { %4678 = vmatprep.subr.bf16.mxu0 %v5282_v2  ;;  %4692 = vmatprep.mubr.msk.bf16.mxu0 %vm5284_vm0, %v5282_v2 }
  0x14   :  { %4700 = vmatprep.mubr.msk.bf16.mxu1 %vm5284_vm0, %v5282_v2 }
  0x15   :  { %5077 = vset.pattern.permute.xlu0 %v5283_v6 }
  0x16   :  { %59 = vperm.xlu0 %5077, %v57_v4   ;;  %4679 = vmatpush3.bf16.msra.mxu0 %v5082_v5 }
  0x17   :  { %4680 = vmatprep.subr.bf16.mxu0 %v5282_v2 }
  0x1a   :  { %4681 = vmatpush3.bf16.msra.mxu0 %v5083_v7  ;;  %5078 = vset.pattern.permute.xlu0 %v5281_v1 }
  0x1b   :  { %4682 = vmatprep.subr.bf16.mxu0 %v5282_v2 }
  0x1e   :  { %4683 = vmatpush3.bf16.msra.mxu0 %v5084_v8 }
  0x1f   :  { %4684 = vmatprep.subr.bf16.mxu0 %v5282_v2 }
  0x22   :  { %4685 = vmatpush3.bf16.msra.mxu0 %v5085_v9 }
  0x23   :  { %4686 = vmatprep.subr.bf16.mxu0 %v5282_v2 }
  0x26   :  { %4687 = vmatpush3.bf16.msra.mxu0 %v5086_v10 }
  0x27   :  { %18 = vsyncpa [#allocation5], 0  ;;  %4688 = vmatprep.subr.bf16.mxu0 %v5282_v2  ;;  %v4408_v13 = vcombine.low %v46_v11, %v46_v11  ;;  %vm118_vm1 = vcmask 1043456   ;;  %v48_v15 = vlaneseq  ;;  %vm114_vm7 = vcmask 982016   ;;  %v5089_v33 = vld [vmem:[%s6233_s4] sm:$0xff]   ;;  %v5090_v34 = vld [vmem:[%s6233_s4 + $0x8] sm:$0xff]  }
  0x28   :  { %vm162_vm8 = vcmask 261120   ;;  %4697 = vmatpush3.bf16.msra.mxu1 %v5089_v33  ;;  %v47_v38 = vunpack.c.l.bf16 %v46_v11  ;;  %v5446_v49 = vld [vmem:[%s6234_s5] sm:$0xff]  ;;  %s5285_s29 = smov 96   ;;  %vm281_vm9 = vcmask 64512   ;;  %s5286_s8 = smov 64   ;;  %vm952_vm10 = vcmask 130048  }
  0x29   :  { %v5387_v14 = vsel %vm118_vm1, %v4408_v13, 0  ;;  %v5391_v16 = vshrl.u32 %v48_v15, 7  ;;  %v5396_v19 = vand.u32 127, %v48_v15  ;;  %4698 = vmatprep.subr.bf16.mxu1 %v5282_v2  ;;  %v187_v58 = vld [vmem:[%s6231_s2] sm:$0x1]  ;;  %s5287_s9 = smov 120  }
  0x2a   :  { %4689 = vmatpush3.bf16.msra.mxu0 %v5087_v12  ;;  %v188_v59 = vsub.f32 1.0, %v187_v58  ;;  %s5288_s10 = smov 88   ;;  %s5289_s11 = smov 56   ;;  %vm954_vm11 = vcmask 195584   ;;  %vm1156_vm13 = vcmask 523264   ;;  %vm2251_vm15 = vcmask 253952  }
  0x2b   :  { %4690 = vmatprep.subr.bf16.mxu0 %v5282_v2  ;;  %v5394_v18 = vadd.s32 102, %v5391_v16  ;;  %v5420_v39 = vsub.s32 6, %v5391_v16  ;;  %v5423_v40 = vsub.s32 7, %v5391_v16  ;;  %v5441_v48 = vsub.s32 0, %v5391_v16  ;;  %s5290_s12 = smov 112   ;;  %s5291_s13 = smov 80  }
  0x2c   :  { %4699 = vmatpush3.bf16.msra.mxu1 %v5090_v34  ;;  %v189_v60 = vmul.f32 -1e+09, %v188_v59  ;;  %s5292_s14 = smov 48   ;;  %s5293_s15 = smov 104  }
  0x2d   :  { %vm64_vm2 = vcmp.eq.s32.totalorder %v5396_v19, %v5394_v18  ;;  %4704 = vmatprep.subr.mxu1 %v5282_v2  ;;  %v5426_v41 = vrot.slane %v47_v38, %v5420_v39  ;;  %v5429_v43 = vrot.slane %v47_v38, %v5423_v40  ;;  %v5450_v50 = vrot.slane %v5446_v49, %v5441_v48  ;;  %s5294_s16 = smov 72   ;;  %s5295_s17 = smov 40  }
  0x2e   :  { %4691 = vmatpush3.bf16.msra.mxu0 %v5387_v14  ;;  %v5470_v61 = vrot.slane %v189_v60, %v5441_v48  ;;  %s5296_s18 = smov 16   ;;  %s5297_s19 = smov 8  }
  0x2f   :  { %4744 = vmatprep.subr.bf16.mxu0 %v5282_v2  ;;  %s5298_s24 = smov 24  }
  0x90   :  { %v55_v17 = vpop.permute.xlu0 %54 }
  0x91   :  { %vm56_vm3 = vcmp.eq.s32.totalorder %v5396_v19, %v55_v17 }
  0x95   :  { %v60_v20 = vpop.permute.xlu0 %59 }
  0x96   :  { %vm61_vm4 = vcmp.eq.s32.totalorder %v5396_v19, %v60_v20 }
  0x97   :  { %vm62_vm5 = vmor %vm56_vm3, %vm61_vm4 }
  0x98   :  { %vm65_vm6 = vmor %vm62_vm5, %vm64_vm2 }
  0x99   :  { %v4400_v21 = vsel %vm65_vm6, 1.0, %v5282_v2 }
  0x9a   :  { %v68_v22 = vpack.c.bf16 %v4400_v21, %v4400_v21 }
  0x9c   :  { %4693 = vmatmul.mubr.msk.bf16.vlgmr.msra.gmra.mrb[0].mxu0 %vm114_vm7, %v68_v22 }
  0x9d   :  { %4748 = vmatprep.mubr.msk.bf16.mxu0 %vm5284_vm0, %v5282_v2 }
 0x16f   :  { %v156_v23 = vpop.f32.mrb[0].mxu0 }
 0x170   :  { %v4694_v24 = vpop.f32.mrb[1].mxu0  ;;  %v163_v25 = vsel %vm162_vm8, %v156_v23, 0.0 }
 0x171   :  { %164 = vadd.xlane.f32.xlu1 %v163_v25  ;;  %v159_v26 = vpop.f32.mrb[2].mxu0 }
 0x172   :  { %v4695_v27 = vpop.f32.mrb[3].mxu0 }
 0x1fe   :  { %v165_v28 = vpop.xlane.xlu1 %164 }
 0x1ff   :  { %v167_v29 = vmul.f32 0.03125, %v165_v28 }
 0x201   :  { %v168_v30 = vsub.f32 %v156_v23, %v167_v29 }
 0x203   :  { %v169_v31 = vmul.f32 %v168_v30, %v168_v30 }
 0x205   :  { %v170_v32 = vsel %vm162_vm8, %v169_v31, 0.0 }
 0x206   :  { %171 = vadd.xlane.f32.xlu1 %v170_v32 }
 0x293   :  { %v172_v35 = vpop.xlane.xlu1 %171 }
 0x294   :  { %v173_v36 = vmul.f32 0.03125, %v172_v35 }
 0x296   :  { %v174_v37 = vadd.f32 1e-12, %v173_v36 }
 0x298   :  { %5109 = vrsqrt.f32 %v174_v37 }
 0x2a2   :  { %v5110_v42 = vpop.eup %5109 }
 0x2a3   :  { %v176_v44 = vmul.f32 %v5110_v42, %v168_v30 }
 0x2a5   :  { %v181_v45 = vmul.f32 %v5426_v41, %v176_v44 }
 0x2a7   :  { %v5433_v46 = vadd.f32 %v5429_v43, %v181_v45 }
 0x2a9   :  { %v211_v47 = vpack.c.bf16 %v5433_v46, %v5433_v46 }
 0x2ab   :  { %4701 = vmatmul.mubr.msk.bf16.vlgmr.msra.gmra.mrb[0].mxu1 %vm162_vm8, %v211_v47 }
 0x2ac   :  { %4706 = vmatprep.mubr.msk.f32.mxu1 %vm5284_vm0, %v5282_v2 }
 0x37e   :  { %v265_v51 = vpop.f32.mrb[0].mxu1 }
 0x37f   :  { %v5453_v52 = vadd.f32 %v265_v51, %v5450_v50  ;;  %v4702_v53 = vpop.f32.mrb[1].mxu1 }
 0x380   :  { %v268_v54 = vpop.f32.mrb[2].mxu1 }
 0x381   :  { %279 = vrot.lane.b32.xlu1 %v5453_v52, %s5285_s29  ;;  %v4703_v55 = vpop.f32.mrb[3].mxu1  ;;  %v5459_v57 = vmul.f32 0.35355338, %v5453_v52 }
 0x3f3   :  { %v280_v56 = vpop.permute.xlu1 %279 }
 0x3f4   :  { %4705 = vmatpush3.xpose.msk.msra.mxu1 %vm281_vm9, %v280_v56 }
 0x3f5   :  { %4709 = vmatprep.subr.mxu1 %v5282_v2 }
 0x3f7   :  { %4707 = vmatmul.mubr.msk.f32.vlgmr.msra.gmra.mrb[4].mxu1 %vm281_vm9, %v5459_v57 }
 0x3f8   :  { %4711 = vmatprep.mubr.msk.f32.mxu1 %vm5284_vm0, %v5282_v2 }
 0x4ca   :  { %v353_v62 = vpop.f32.mrb[4].mxu1 }
 0x4cb   :  { %v354_v63 = vadd.f32 %v353_v62, %v5470_v61  ;;  %v4708_v0 = vpop.f32.mrb[5].mxu1 }
 0x4cd   :  { %v357_v1 = vsel %vm281_vm9, %v354_v63, -inf }
 0x4ce   :  { %358 = vmax.xlane.f32.xlu0 %v357_v1 }
 0x4e4   :  { %368 = vrot.lane.b32.xlu0 %v5453_v52, %s5286_s8 }
 0x4e8   :  { %444 = vrot.lane.b32.xlu0 %v5459_v57, %s5287_s9 }
 0x55b   :  { %v359_v3 = vpop.xlane.xlu0 %358 }
 0x55c   :  { %v360_v4 = vsub.f32 %v354_v63, %v359_v3 }
 0x55e   :  { %v361_v5 = vmul.f32 1.442695, %v360_v4 }
 0x55f   :  { %v369_v7 = vpop.permute.xlu0 %368 }
 0x560   :  { %5111 = vpow2.f32 %v361_v5  ;;  %4710 = vmatpush3.msra.mxu1 %v369_v7 }
 0x561   :  { %4714 = vmatprep.subr.mxu1 %v5282_v2 }
 0x563   :  { %v445_v15 = vpop.permute.xlu0 %444 }
 0x56a   :  { %v5112_v8 = vpop.eup %5111 }
 0x56b   :  { %v363_v9 = vsel %vm281_vm9, %v5112_v8, 0.0 }
 0x56c   :  { %364 = vadd.xlane.f32.xlu1 %v363_v9 }
 0x57d   :  { %446 = vrot.lane.b32.xlu1 %v5453_v52, %s5288_s10 }
 0x5f9   :  { %v365_v10 = vpop.xlane.xlu1 %364 }
 0x5fa   :  { %5113 = vrcp.f32 %v365_v10 }
 0x5fd   :  { %v447_v13 = vpop.permute.xlu1 %446 }
 0x604   :  { %v5114_v11 = vpop.eup %5113 }
 0x605   :  { %v367_v12 = vmul.f32 %v5114_v11, %v5112_v8 }
 0x607   :  { %4712 = vmatmul.mubr.msk.f32.vlgmr.msra.gmra.mrb[6].mxu1 %vm281_vm9, %v367_v12 }
 0x608   :  { %4715 = vmatpush3.xpose.msk.msra.mxu1 %vm281_vm9, %v447_v13  ;;  %4716 = vmatprep.mubr.msk.f32.mxu1 %vm5284_vm0, %v5282_v2 }
 0x609   :  { %4719 = vmatprep.subr.mxu1 %v5282_v2 }
 0x60b   :  { %4717 = vmatmul.mubr.msk.f32.vlgmr.msra.gmra.mrb[8].mxu1 %vm281_vm9, %v445_v15 }
 0x60c   :  { %4721 = vmatprep.mubr.msk.f32.mxu1 %vm5284_vm0, %v5282_v2 }
 0x6da   :  { %v5490_v17 = vpop.f32.mrb[6].mxu1 }
 0x6db   :  { %v4713_v20 = vpop.f32.mrb[7].mxu1 }
 0x6dc   :  { %v5091_v20 = vld [vmem:[%s6233_s4 + $0x10] sm:$0xff]  }
 0x6dd   :  { %4745 = vmatpush3.bf16.msra.mxu0 %v5091_v20 }
 0x6de   :  { %v518_v21 = vpop.f32.mrb[8].mxu1  ;;  %4746 = vmatprep.subr.bf16.mxu0 %v5282_v2 }
 0x6df   :  { %v519_v22 = vadd.f32 %v518_v21, %v5470_v61  ;;  %v4718_v23 = vpop.f32.mrb[9].mxu1  ;;  %v5092_v21 = vld [vmem:[%s6233_s4 + $0x18] sm:$0xff]  }
 0x6e1   :  { %v522_v24 = vsel %vm281_vm9, %v519_v22, -inf  ;;  %4747 = vmatpush3.bf16.msra.mxu0 %v5092_v21 }
 0x6e2   :  { %523 = vmax.xlane.f32.xlu0 %v522_v24  ;;  %4760 = vmatprep.subr.bf16.mxu0 %v5282_v2 }
 0x6f8   :  { %533 = vrot.lane.b32.xlu0 %v5453_v52, %s5289_s11 }
 0x6fc   :  { %609 = vrot.lane.b32.xlu0 %v5459_v57, %s5290_s12 }
 0x76f   :  { %v524_v25 = vpop.xlane.xlu0 %523 }
 0x770   :  { %v525_v26 = vsub.f32 %v519_v22, %v524_v25 }
 0x772   :  { %v526_v27 = vmul.f32 1.442695, %v525_v26 }
 0x773   :  { %v534_v28 = vpop.permute.xlu0 %533 }
 0x774   :  { %5115 = vpow2.f32 %v526_v27  ;;  %4720 = vmatpush3.msra.mxu1 %v534_v28 }
 0x775   :  { %4724 = vmatprep.subr.mxu1 %v5282_v2 }
 0x777   :  { %v610_v35 = vpop.permute.xlu0 %609 }
 0x77e   :  { %v5116_v29 = vpop.eup %5115 }
 0x77f   :  { %v528_v30 = vsel %vm281_vm9, %v5116_v29, 0.0 }
 0x780   :  { %529 = vadd.xlane.f32.xlu1 %v528_v30 }
 0x791   :  { %611 = vrot.lane.b32.xlu1 %v5453_v52, %s5291_s13 }
 0x80d   :  { %v530_v31 = vpop.xlane.xlu1 %529 }
 0x80e   :  { %5117 = vrcp.f32 %v530_v31  ;;  %v959_v31 = vsub.s32 1, %v5391_v16 }
 0x811   :  { %v612_v34 = vpop.permute.xlu1 %611 }
 0x818   :  { %v5118_v32 = vpop.eup %5117 }
 0x819   :  { %v532_v33 = vmul.f32 %v5118_v32, %v5116_v29 }
 0x81b   :  { %4722 = vmatmul.mubr.msk.f32.vlgmr.msra.gmra.mrb[10].mxu1 %vm281_vm9, %v532_v33 }
 0x81c   :  { %4725 = vmatpush3.xpose.msk.msra.mxu1 %vm281_vm9, %v612_v34  ;;  %4726 = vmatprep.mubr.msk.f32.mxu1 %vm5284_vm0, %v5282_v2 }
 0x81d   :  { %4729 = vmatprep.subr.mxu1 %v5282_v2 }
 0x81f   :  { %4727 = vmatmul.mubr.msk.f32.vlgmr.msra.gmra.mrb[12].mxu1 %vm281_vm9, %v610_v35 }
 0x820   :  { %4731 = vmatprep.mubr.msk.f32.mxu1 %vm5284_vm0, %v5282_v2 }
 0x8ee   :  { %v605_v36 = vpop.f32.mrb[10].mxu1 }
 0x8ef   :  { %v4723_v37 = vpop.f32.mrb[11].mxu1 }
 0x8f2   :  { %v683_v38 = vpop.f32.mrb[12].mxu1 }
 0x8f3   :  { %v684_v42 = vadd.f32 %v683_v38, %v5470_v61  ;;  %v4728_v44 = vpop.f32.mrb[13].mxu1 }
 0x8f5   :  { %v687_v45 = vsel %vm281_vm9, %v684_v42, -inf }
 0x8f6   :  { %688 = vmax.xlane.f32.xlu0 %v687_v45 }
 0x90c   :  { %698 = vrot.lane.b32.xlu0 %v5453_v52, %s5292_s14 }
 0x910   :  { %774 = vrot.lane.b32.xlu0 %v5459_v57, %s5293_s15 }
 0x983   :  { %v689_v47 = vpop.xlane.xlu0 %688 }
 0x984   :  { %v690_v51 = vsub.f32 %v684_v42, %v689_v47 }
 0x986   :  { %v691_v53 = vmul.f32 1.442695, %v690_v51 }
 0x987   :  { %v699_v54 = vpop.permute.xlu0 %698 }
 0x988   :  { %5119 = vpow2.f32 %v691_v53  ;;  %4730 = vmatpush3.msra.mxu1 %v699_v54  ;;  %v5093_v53 = vld [vmem:[%s6233_s4 + $0x20] sm:$0xff]   ;;  %v5094_v54 = vld [vmem:[%s6233_s4 + $0x28] sm:$0xff]  }
 0x989   :  { %4734 = vmatprep.subr.mxu1 %v5282_v2 }
 0x98b   :  { %v775_v62 = vpop.permute.xlu0 %774 }
 0x992   :  { %v5120_v55 = vpop.eup %5119 }
 0x993   :  { %v693_v56 = vsel %vm281_vm9, %v5120_v55, 0.0 }
 0x994   :  { %694 = vadd.xlane.f32.xlu1 %v693_v56 }
 0x9a5   :  { %776 = vrot.lane.b32.xlu1 %v5453_v52, %s5294_s16 }
 0xa21   :  { %v695_v58 = vpop.xlane.xlu1 %694 }
 0xa22   :  { %5121 = vrcp.f32 %v695_v58  ;;  %v1032_v58 = vsub.s32 2, %v5391_v16 }
 0xa25   :  { %v777_v60 = vpop.permute.xlu1 %776 }
 0xa2c   :  { %v5122_v59 = vpop.eup %5121 }
 0xa2d   :  { %v697_v57 = vmul.f32 %v5122_v59, %v5120_v55  ;;  %v1037_v59 = vsub.s32 3, %v5391_v16 }
 0xa2f   :  { %4732 = vmatmul.mubr.msk.f32.vlgmr.msra.gmra.mrb[14].mxu1 %vm281_vm9, %v697_v57  ;;  %v5578_v57 = vrot.slane %v5446_v49, %v1032_v58 }
 0xa30   :  { %4735 = vmatpush3.xpose.msk.msra.mxu1 %vm281_vm9, %v777_v60  ;;  %4736 = vmatprep.mubr.msk.f32.mxu1 %vm5284_vm0, %v5282_v2 }
 0xa31   :  { %4739 = vmatprep.subr.mxu1 %v5282_v2 }
 0xa33   :  { %4737 = vmatmul.mubr.msk.f32.vlgmr.msra.gmra.mrb[16].mxu1 %vm281_vm9, %v775_v62 }
 0xa34   :  { %4741 = vmatprep.mubr.msk.f32.mxu1 %vm5284_vm0, %v5282_v2 }
 0xb02   :  { %v770_v63 = vpop.f32.mrb[14].mxu1 }
 0xb03   :  { %v4733_v0 = vpop.f32.mrb[15].mxu1 }
 0xb06   :  { %v848_v1 = vpop.f32.mrb[16].mxu1 }
 0xb07   :  { %v849_v3 = vadd.f32 %v848_v1, %v5470_v61  ;;  %v4738_v4 = vpop.f32.mrb[17].mxu1 }
 0xb08   :  { %v5095_v4 = vld [vmem:[%s6233_s4 + $0x30] sm:$0xff]  }
 0xb09   :  { %v852_v5 = vsel %vm281_vm9, %v849_v3, -inf }
 0xb0a   :  { %853 = vmax.xlane.f32.xlu0 %v852_v5  ;;  %v5096_v5 = vld [vmem:[%s6233_s4 + $0x38] sm:$0xff]  }
 0xb20   :  { %863 = vrot.lane.b32.xlu0 %v5453_v52, %s5295_s17 }
 0xb24   :  { %944 = vrot.lane.b32.xlu0 %v770_v63, %s5296_s18  ;;  %v5583_v63 = vrot.slane %v5446_v49, %v1037_v59 }
 0xb97   :  { %v854_v7 = vpop.xlane.xlu0 %853 }
 0xb98   :  { %v855_v8 = vsub.f32 %v849_v3, %v854_v7  ;;  %v5097_v7 = vld [vmem:[%s6233_s4 + $0x40] sm:$0xff]  }
 0xb9a   :  { %v856_v9 = vmul.f32 1.442695, %v855_v8  ;;  %v5098_v8 = vld [vmem:[%s6233_s4 + $0x48] sm:$0xff]  }
 0xb9b   :  { %v864_v10 = vpop.permute.xlu0 %863 }
 0xb9c   :  { %5123 = vpow2.f32 %v856_v9  ;;  %4740 = vmatpush3.msra.mxu1 %v864_v10  ;;  %v1043_v9 = vsub.s32 4, %v5391_v16 }
 0xb9d   :  { %4752 = vmatprep.subr.bf16.mxu1 %v5282_v2 }
 0xb9e   :  { %v5614_v10 = vrot.slane %v5446_v49, %v1043_v9 }
 0xb9f   :  { %v945_v26 = vpop.permute.xlu0 %944 }
 0xba6   :  { %v5124_v11 = vpop.eup %5123 }
 0xba7   :  { %v858_v12 = vsel %vm281_vm9, %v5124_v11, 0.0 }
 0xba8   :  { %859 = vadd.xlane.f32.xlu1 %v858_v12 }
 0xbb9   :  { %940 = vrot.lane.b32.xlu1 %v605_v36, %s5297_s19 }
 0xc35   :  { %v860_v13 = vpop.xlane.xlu1 %859 }
 0xc36   :  { %5125 = vrcp.f32 %v860_v13 }
 0xc39   :  { %v941_v24 = vpop.permute.xlu1 %940 }
 0xc3a   :  { %v951_v25 = vsel %vm281_vm9, %v5490_v17, %v941_v24  ;;  %v5559_v17 = vrot.slane %v5446_v49, %v959_v31 }
 0xc3b   :  { %v953_v27 = vsel %vm952_vm10, %v951_v25, %v945_v26 }
 0xc40   :  { %v5126_v52 = vpop.eup %5125 }
 0xc41   :  { %v862_v15 = vmul.f32 %v5126_v52, %v5124_v11 }
 0xc43   :  { %4742 = vmatmul.mubr.msk.f32.vlgmr.msra.gmra.mrb[18].mxu1 %vm281_vm9, %v862_v15 }
 0xc44   :  { %4756 = vmatprep.mubr.msk.bf16.mxu1 %vm5284_vm0, %v5282_v2  ;;  %4753 = vmatpush3.bf16.msra.mxu1 %v5093_v53 }
 0xc45   :  { %4754 = vmatprep.subr.bf16.mxu1 %v5282_v2 }
 0xc48   :  { %4755 = vmatpush3.bf16.msra.mxu1 %v5094_v54 }
 0xc49   :  { %4772 = vmatprep.subr.bf16.mxu1 %v5282_v2 }
 0xd16   :  { %v935_v22 = vpop.f32.mrb[18].mxu1 }
 0xd17   :  { %948 = vrot.lane.b32.xlu1 %v935_v22, %s5298_s24  ;;  %v4743_v23 = vpop.f32.mrb[19].mxu1 }
 0xd89   :  { %v949_v28 = vpop.permute.xlu1 %948 }
 0xd8a   :  { %v955_v29 = vsel %vm954_vm11, %v953_v27, %v949_v28 }
 0xd8b   :  { %v956_v30 = vpack.c.bf16 %v955_v29, %v955_v29 }
 0xd8d   :  { %4749 = vmatmul.mubr.msk.bf16.vlgmr.msra.gmra.mrb[4].mxu0 %vm162_vm8, %v956_v30 }
 0xd8e   :  { %4768 = vmatprep.mubr.msk.bf16.mxu0 %vm5284_vm0, %v5282_v2  ;;  %4761 = vmatpush3.bf16.msra.mxu0 %v5095_v4 }
 0xd8f   :  { %4762 = vmatprep.subr.bf16.mxu0 %v5282_v2 }
 0xd92   :  { %4763 = vmatpush3.bf16.msra.mxu0 %v5096_v5 }
 0xd93   :  { %4764 = vmatprep.subr.bf16.mxu0 %v5282_v2 }
 0xd96   :  { %4765 = vmatpush3.bf16.msra.mxu0 %v5097_v7 }
 0xd97   :  { %4766 = vmatprep.subr.bf16.mxu0 %v5282_v2 }
 0xd9a   :  { %4767 = vmatpush3.bf16.msra.mxu0 %v5098_v8 }
 0xd9b   :  { %4790 = vmatprep.subr.mxu0 %v5282_v2 }
 0xe60   :  { %v1010_v32 = vpop.f32.mrb[4].mxu0 }
 0xe61   :  { %v1011_v33 = vadd.f32 %v1010_v32, %v5559_v17  ;;  %v4750_v34 = vpop.f32.mrb[5].mxu0 }
 0xe62   :  { %v1013_v35 = vpop.f32.mrb[6].mxu0 }
 0xe63   :  { %v4751_v36 = vpop.f32.mrb[7].mxu0  ;;  %v1016_v37 = vadd.f32 %v1011_v33, %v5433_v46 }
 0xe65   :  { %v1017_v38 = vsel %vm162_vm8, %v1016_v37, 0.0 }
 0xe66   :  { %1018 = vadd.xlane.f32.xlu0 %v1017_v38 }
 0xef3   :  { %v1019_v42 = vpop.xlane.xlu0 %1018 }
 0xef4   :  { %v1020_v44 = vmul.f32 0.03125, %v1019_v42 }
 0xef6   :  { %v1021_v45 = vsub.f32 %v1016_v37, %v1020_v44 }
 0xef8   :  { %v1022_v47 = vmul.f32 %v1021_v45, %v1021_v45 }
 0xefa   :  { %v1023_v51 = vsel %vm162_vm8, %v1022_v47, 0.0 }
 0xefb   :  { %1024 = vadd.xlane.f32.xlu1 %v1023_v51 }
 0xf88   :  { %v1025_v46 = vpop.xlane.xlu1 %1024 }
 0xf89   :  { %v1026_v55 = vmul.f32 0.03125, %v1025_v46 }
 0xf8b   :  { %v1027_v56 = vadd.f32 1e-12, %v1026_v55 }
 0xf8d   :  { %5127 = vrsqrt.f32 %v1027_v56  ;;  %v1130_v56 = vsub.s32 5, %v5391_v16 }
 0xf97   :  { %v5128_v60 = vpop.eup %5127 }
 0xf98   :  { %v1029_v62 = vmul.f32 %v5128_v60, %v1021_v45  ;;  %v5299_v45 = vmov -1.0   ;;  %v5625_v60 = vrot.slane %v5446_v49, %v1130_v56 }
 0xf9a   :  { %v1034_v0 = vmul.f32 %v5578_v57, %v1029_v62 }
 0xf9c   :  { %v5587_v1 = vadd.f32 %v5583_v63, %v1034_v0 }
 0xf9e   :  { %v1040_v3 = vpack.c.bf16 %v5587_v1, %v5587_v1 }
 0xfa0   :  { %4757 = vmatmul.mubr.msk.bf16.vlgmr.msra.gmra.mrb[20].mxu1 %vm162_vm8, %v1040_v3 }
 0xfa1   :  { %4776 = vmatprep.mubr.msk.bf16.mxu1 %vm5284_vm0, %v5282_v2 }
0x1073   :  { %v1094_v11 = vpop.f32.mrb[20].mxu1 }
0x1074   :  { %v1095_v12 = vadd.f32 %v1094_v11, %v5614_v10  ;;  %v4758_v13 = vpop.f32.mrb[21].mxu1 }
0x1075   :  { %v1097_v52 = vpop.f32.mrb[22].mxu1 }
0x1076   :  { %v1101_v15 = vmul.f32 0.70710677, %v1095_v12  ;;  %v4759_v20 = vpop.f32.mrb[23].mxu1  ;;  %v1100_v53 = vmul.f32 0.5, %v1095_v12 }
0x1077   :  { %v5099_v20 = vld [vmem:[%s6233_s4 + $0x50] sm:$0xff]  }
0x1078   :  { %v1104_v21 = vand.u32 2147483647, %v1101_v15  ;;  %vm1102_vm12 = vcmp.ge.f32.partialorder %v1101_v15, 0.0  ;;  %4773 = vmatpush3.bf16.msra.mxu1 %v5099_v20 }
0x1079   :  { %v1103_v47 = vsel %vm1102_vm12, 1.0, %v5299_v45  ;;  %4774 = vmatprep.subr.bf16.mxu1 %v5282_v2 }
0x107a   :  { %v1105_v22 = vmul.f32 0.3275911, %v1104_v21  ;;  %v1118_v24 = vsub.f32 0.0, %v1104_v21 }
0x107c   :  { %v1106_v23 = vadd.f32 1.0, %v1105_v22  ;;  %v1119_v26 = vmul.f32 %v1118_v24, %v1104_v21  ;;  %v5100_v21 = vld [vmem:[%s6233_s4 + $0x58] sm:$0xff]   ;;  %v5641_v24 = vrot.slane %v5446_v49, %v5420_v39 }
0x107d   :  { %4775 = vmatpush3.bf16.msra.mxu1 %v5100_v21 }
0x107e   :  { %5129 = vrcp.f32 %v1106_v23  ;;  %v1120_v29 = vmul.f32 1.442695, %v1119_v26  ;;  %4780 = vmatprep.subr.mxu1 %v5282_v2 }
0x1080   :  { %5131 = vpow2.f32 %v1120_v29 }
0x1088   :  { %v5130_v25 = vpop.eup %5129 }
0x1089   :  { %v1109_v27 = vmul.f32 1.0614054, %v5130_v25 }
0x108a   :  { %v5132_v38 = vpop.eup %5131 }
0x108b   :  { %v1110_v28 = vadd.f32 -1.4531521, %v1109_v27  ;;  %v5645_v27 = vrot.slane %v5446_v49, %v5423_v40 }
0x108d   :  { %v1111_v30 = vmul.f32 %v5130_v25, %v1110_v28 }
0x108f   :  { %v1112_v32 = vadd.f32 1.4214138, %v1111_v30 }
0x1091   :  { %v1113_v33 = vmul.f32 %v5130_v25, %v1112_v32  ;;  %v5659_v32 = vld [vmem:[%s6234_s5 + $0x8] sm:$0xff] }
0x1092   :  { %v5663_v49 = vrot.slane %v5659_v32, %v5441_v48 }
0x1093   :  { %v1114_v34 = vadd.f32 -0.28449672, %v1113_v33 }
0x1095   :  { %v1115_v35 = vmul.f32 %v5130_v25, %v1114_v34 }
0x1097   :  { %v1116_v36 = vadd.f32 0.2548296, %v1115_v35 }
0x1099   :  { %v1117_v37 = vmul.f32 %v5130_v25, %v1116_v36 }
0x109b   :  { %v1122_v42 = vmul.f32 %v5132_v38, %v1117_v37 }
0x109d   :  { %v1123_v44 = vsub.f32 1.0, %v1122_v42 }
0x109f   :  { %v1124_v51 = vmul.f32 %v1123_v44, %v1103_v47 }
0x10a1   :  { %v1125_v54 = vadd.f32 1.0, %v1124_v51 }
0x10a3   :  { %v1126_v46 = vmul.f32 %v1125_v54, %v1100_v53 }
0x10a5   :  { %v1127_v55 = vpack.c.bf16 %v1126_v46, %v1126_v46 }
0x10a7   :  { %4769 = vmatmul.mubr.msk.bf16.vlgmr.msra.gmra.mrb[8].mxu0 %vm1156_vm13, %v1127_v55 }
0x10a8   :  { %4792 = vmatprep.mubr.msk.f32.mxu0 %vm5284_vm0, %v5282_v2 }
0x117a   :  { %v1194_v62 = vpop.f32.mrb[8].mxu0 }
0x117b   :  { %v1195_v0 = vadd.f32 %v1194_v62, %v5625_v60  ;;  %v4770_v3 = vpop.f32.mrb[9].mxu0 }
0x117c   :  { %v1197_v4 = vpop.f32.mrb[10].mxu0 }
0x117d   :  { %v4771_v5 = vpop.f32.mrb[11].mxu0  ;;  %v1200_v7 = vadd.f32 %v1195_v0, %v5587_v1 }
0x117f   :  { %v1201_v8 = vsel %vm162_vm8, %v1200_v7, 0.0 }
0x1180   :  { %1202 = vadd.xlane.f32.xlu0 %v1201_v8 }
0x120d   :  { %v1203_v11 = vpop.xlane.xlu0 %1202 }
0x120e   :  { %v1204_v12 = vmul.f32 0.03125, %v1203_v11 }
0x1210   :  { %v1205_v13 = vsub.f32 %v1200_v7, %v1204_v12 }
0x1212   :  { %v1206_v52 = vmul.f32 %v1205_v13, %v1205_v13 }
0x1214   :  { %v1207_v15 = vsel %vm162_vm8, %v1206_v52, 0.0 }
0x1215   :  { %1208 = vadd.xlane.f32.xlu0 %v1207_v15 }
0x12a2   :  { %v1209_v1 = vpop.xlane.xlu0 %1208 }
0x12a3   :  { %v1210_v22 = vmul.f32 0.03125, %v1209_v1 }
0x12a5   :  { %v1211_v23 = vadd.f32 1e-12, %v1210_v22 }
0x12a7   :  { %5133 = vrsqrt.f32 %v1211_v23 }
0x12b1   :  { %v5134_v25 = vpop.eup %5133 }
0x12b2   :  { %v1213_v26 = vmul.f32 %v5134_v25, %v1205_v13 }
0x12b4   :  { %v1218_v28 = vmul.f32 %v5641_v24, %v1213_v26 }
0x12b6   :  { %v5649_v29 = vadd.f32 %v5645_v27, %v1218_v28 }
0x12b8   :  { %v1247_v30 = vpack.c.bf16 %v5649_v29, %v5649_v29 }
0x12ba   :  { %4777 = vmatmul.mubr.msk.bf16.vlgmr.msra.gmra.mrb[24].mxu1 %vm162_vm8, %v1247_v30 }
0x12bb   :  { %4782 = vmatprep.mubr.msk.f32.mxu1 %vm5284_vm0, %v5282_v2 }
0x138d   :  { %v1301_v33 = vpop.f32.mrb[24].mxu1 }
0x138e   :  { %v5666_v34 = vadd.f32 %v1301_v33, %v5663_v49  ;;  %v4778_v35 = vpop.f32.mrb[25].mxu1 }
0x138f   :  { %v1304_v36 = vpop.f32.mrb[26].mxu1 }
0x1390   :  { %1475 = vrot.lane.b32.xlu0 %v5666_v34, %s5288_s10  ;;  %1309 = vrot.lane.b32.xlu1 %v5666_v34, %s5285_s29  ;;  %v4779_v37 = vpop.f32.mrb[27].mxu1  ;;  %v1307_v38 = vmul.f32 0.35355338, %v5666_v34 }
0x1394   :  { %1638 = vrot.lane.b32.xlu0 %v1307_v38, %s5290_s12  ;;  %1473 = vrot.lane.b32.xlu1 %v1307_v38, %s5287_s9 }
0x1398   :  { %1803 = vrot.lane.b32.xlu0 %v1307_v38, %s5293_s15  ;;  %1640 = vrot.lane.b32.xlu1 %v5666_v34, %s5291_s13 }
0x139c   :  { %1805 = vrot.lane.b32.xlu1 %v5666_v34, %s5294_s16 }
0x1402   :  { %v1476_v42 = vpop.permute.xlu0 %1475  ;;  %v1310_v44 = vpop.permute.xlu1 %1309 }
0x1403   :  { %4781 = vmatpush3.xpose.msk.msra.mxu1 %vm281_vm9, %v1310_v44  ;;  %4791 = vmatpush3.xpose.msk.msra.mxu0 %vm281_vm9, %v1476_v42 }
0x1404   :  { %4800 = vmatprep.subr.mxu0 %v5282_v2  ;;  %4785 = vmatprep.subr.mxu1 %v5282_v2 }
0x1406   :  { %v1474_v47 = vpop.permute.xlu1 %1473  ;;  %4783 = vmatmul.mubr.msk.f32.vlgmr.msra.gmra.mrb[28].mxu1 %vm281_vm9, %v1307_v38  ;;  %v1639_v53 = vpop.permute.xlu0 %1638 }
0x1407   :  { %4793 = vmatmul.mubr.msk.f32.vlgmr.msra.gmra.mrb[12].mxu0 %vm281_vm9, %v1474_v47  ;;  %4787 = vmatprep.mubr.msk.f32.mxu1 %vm5284_vm0, %v5282_v2 }
0x1408   :  { %4802 = vmatprep.mubr.msk.f32.mxu0 %vm5284_vm0, %v5282_v2 }
0x140a   :  { %v1641_v51 = vpop.permute.xlu1 %1640  ;;  %v1804_v46 = vpop.permute.xlu0 %1803 }
0x140b   :  { %4801 = vmatpush3.xpose.msk.msra.mxu0 %vm281_vm9, %v1641_v51 }
0x140c   :  { %4810 = vmatprep.subr.mxu0 %v5282_v2 }
0x140e   :  { %4803 = vmatmul.mubr.msk.f32.vlgmr.msra.gmra.mrb[14].mxu0 %vm281_vm9, %v1639_v53  ;;  %v1806_v54 = vpop.permute.xlu1 %1805 }
0x140f   :  { %4811 = vmatpush3.xpose.msk.msra.mxu0 %vm281_vm9, %v1806_v54  ;;  %4812 = vmatprep.mubr.msk.f32.mxu0 %vm5284_vm0, %v5282_v2 }
0x1410   :  { %4820 = vmatprep.subr.bf16.mxu0 %v5282_v2 }
0x1412   :  { %4813 = vmatmul.mubr.msk.f32.vlgmr.msra.gmra.mrb[16].mxu0 %vm281_vm9, %v1804_v46 }
0x1413   :  { %4824 = vmatprep.mubr.msk.bf16.mxu0 %vm5284_vm0, %v5282_v2 }
0x14d9   :  { %v1382_v55 = vpop.f32.mrb[28].mxu1 }
0x14da   :  { %v1383_v62 = vadd.f32 %v1382_v55, %v5470_v61  ;;  %v4784_v0 = vpop.f32.mrb[29].mxu1  ;;  %v1547_v3 = vpop.f32.mrb[12].mxu0 }
0x14db   :  { %v1548_v4 = vadd.f32 %v1547_v3, %v5470_v61  ;;  %v4794_v5 = vpop.f32.mrb[13].mxu0 }
0x14dc   :  { %v1386_v7 = vsel %vm281_vm9, %v1383_v62, -inf }
0x14dd   :  { %1387 = vmax.xlane.f32.xlu1 %v1386_v7  ;;  %v1551_v8 = vsel %vm281_vm9, %v1548_v4, -inf }
0x14de   :  { %1552 = vmax.xlane.f32.xlu0 %v1551_v8 }
0x14e1   :  { %v1712_v11 = vpop.f32.mrb[14].mxu0 }
0x14e2   :  { %v1713_v12 = vadd.f32 %v1712_v11, %v5470_v61  ;;  %v4804_v13 = vpop.f32.mrb[15].mxu0 }
0x14e4   :  { %v1716_v52 = vsel %vm281_vm9, %v1713_v12, -inf }
0x14e5   :  { %1717 = vmax.xlane.f32.xlu0 %v1716_v52  ;;  %v1877_v15 = vpop.f32.mrb[16].mxu0 }
0x14e6   :  { %v1878_v20 = vadd.f32 %v1877_v15, %v5470_v61  ;;  %v4814_v21 = vpop.f32.mrb[17].mxu0 }
0x14e8   :  { %v1881_v1 = vsel %vm281_vm9, %v1878_v20, -inf }
0x14e9   :  { %1882 = vmax.xlane.f32.xlu1 %v1881_v1 }
0x14fa   :  { %1562 = vrot.lane.b32.xlu1 %v5666_v34, %s5289_s11 }
0x156a   :  { %v1388_v22 = vpop.xlane.xlu1 %1387 }
0x156b   :  { %v1389_v23 = vsub.f32 %v1383_v62, %v1388_v22  ;;  %v1553_v25 = vpop.xlane.xlu0 %1552 }
0x156c   :  { %v1554_v26 = vsub.f32 %v1548_v4, %v1553_v25 }
0x156d   :  { %v1390_v28 = vmul.f32 1.442695, %v1389_v23 }
0x156e   :  { %v1555_v30 = vmul.f32 1.442695, %v1554_v26 }
0x156f   :  { %5135 = vpow2.f32 %v1390_v28  ;;  %v5740_v28 = vld [vmem:[%s6233_s4 + $0x60] sm:$0xff]  }
0x1570   :  { %5137 = vpow2.f32 %v1555_v30  ;;  %4821 = vmatpush3.bf16.msra.mxu0 %v5740_v28  ;;  %v5747_v30 = vld [vmem:[%s6233_s4 + $0x68] sm:$0xff]  }
0x1571   :  { %4822 = vmatprep.subr.bf16.mxu0 %v5282_v2 }
0x1572   :  { %v1718_v51 = vpop.xlane.xlu0 %1717 }
0x1573   :  { %v1719_v53 = vsub.f32 %v1713_v12, %v1718_v51 }
0x1574   :  { %4823 = vmatpush3.bf16.msra.mxu0 %v5747_v30 }
0x1575   :  { %v1720_v54 = vmul.f32 1.442695, %v1719_v53  ;;  %4836 = vmatprep.subr.bf16.mxu0 %v5282_v2 }
0x1576   :  { %v1883_v33 = vpop.xlane.xlu1 %1882 }
0x1577   :  { %v1884_v35 = vsub.f32 %v1878_v20, %v1883_v33 }
0x1579   :  { %v5136_v36 = vpop.eup %5135  ;;  %v1885_v37 = vmul.f32 1.442695, %v1884_v35 }
0x157a   :  { %v5138_v61 = vpop.eup %5137  ;;  %v1392_v38 = vsel %vm281_vm9, %v5136_v36, 0.0  ;;  %v1563_v62 = vpop.permute.xlu1 %1562 }
0x157b   :  { %5139 = vpow2.f32 %v1885_v37  ;;  %1393 = vadd.xlane.f32.xlu0 %v1392_v38  ;;  %v1557_v42 = vsel %vm281_vm9, %v5138_v61, 0.0 }
0x157c   :  { %1558 = vadd.xlane.f32.xlu1 %v1557_v42  ;;  %5141 = vpow2.f32 %v1720_v54  ;;  %v5762_v54 = vrot.slane %v5659_v32, %v959_v31  ;;  %v5103_v31 = vld [vmem:[%s6233_s4 + $0x70] sm:$0xff]  }
0x1585   :  { %v5140_v44 = vpop.eup %5139 }
0x1586   :  { %v1887_v47 = vsel %vm281_vm9, %v5140_v44, 0.0  ;;  %v5142_v46 = vpop.eup %5141 }
0x1587   :  { %1888 = vadd.xlane.f32.xlu1 %v1887_v47  ;;  %v1722_v55 = vsel %vm281_vm9, %v5142_v46, 0.0 }
0x1591   :  { %1397 = vrot.lane.b32.xlu0 %v5666_v34, %s5286_s8 }
0x1598   :  { %1727 = vrot.lane.b32.xlu1 %v5666_v34, %s5292_s14 }
0x15b0   :  { %1723 = vadd.xlane.f32.xlu0 %v1722_v55 }
0x15c6   :  { %1892 = vrot.lane.b32.xlu0 %v5666_v34, %s5295_s17 }
0x1608   :  { %v1394_v0 = vpop.xlane.xlu0 %1393 }
0x1609   :  { %5143 = vrcp.f32 %v1394_v0  ;;  %v1559_v3 = vpop.xlane.xlu1 %1558 }
0x160a   :  { %5145 = vrcp.f32 %v1559_v3 }
0x160c   :  { %v1398_v4 = vpop.permute.xlu0 %1397 }
0x160d   :  { %4786 = vmatpush3.msra.mxu1 %v1398_v4 }
0x160e   :  { %4795 = vmatprep.subr.mxu1 %v5282_v2 }
0x1613   :  { %v5144_v5 = vpop.eup %5143 }
0x1614   :  { %v1396_v7 = vmul.f32 %v5144_v5, %v5136_v36  ;;  %v1889_v8 = vpop.xlane.xlu1 %1888  ;;  %v5146_v11 = vpop.eup %5145 }
0x1615   :  { %v1561_v34 = vmul.f32 %v5146_v11, %v5138_v61 }
0x1616   :  { %4788 = vmatmul.mubr.msk.f32.vlgmr.msra.gmra.mrb[30].mxu1 %vm281_vm9, %v1396_v7 }
0x1617   :  { %4796 = vmatpush3.msra.mxu1 %v1563_v62  ;;  %4797 = vmatprep.mubr.msk.f32.mxu1 %vm5284_vm0, %v5282_v2 }
0x1618   :  { %v1728_v12 = vpop.permute.xlu1 %1727  ;;  %4805 = vmatprep.subr.mxu1 %v5282_v2 }
0x161a   :  { %4798 = vmatmul.mubr.msk.f32.vlgmr.msra.gmra.mrb[32].mxu1 %vm281_vm9, %v1561_v34 }
0x161b   :  { %4806 = vmatpush3.msra.mxu1 %v1728_v12  ;;  %4807 = vmatprep.mubr.msk.f32.mxu1 %vm5284_vm0, %v5282_v2 }
0x161c   :  { %4815 = vmatprep.subr.mxu1 %v5282_v2 }
0x163d   :  { %v1724_v13 = vpop.xlane.xlu0 %1723 }
0x163e   :  { %5147 = vrcp.f32 %v1724_v13  ;;  %v5104_v13 = vld [vmem:[%s6233_s4 + $0x78] sm:$0xff]  }
0x163f   :  { %5149 = vrcp.f32 %v1889_v8 }
0x1641   :  { %v1893_v21 = vpop.permute.xlu0 %1892 }
0x1648   :  { %v5148_v52 = vpop.eup %5147 }
0x1649   :  { %v1726_v15 = vmul.f32 %v5148_v52, %v5142_v46  ;;  %v5150_v20 = vpop.eup %5149 }
0x164a   :  { %v1891_v1 = vmul.f32 %v5150_v20, %v5140_v44  ;;  %v5778_v20 = vrot.slane %v5659_v32, %v1032_v58  ;;  %v5105_v58 = vld [vmem:[%s6233_s4 + $0x80] sm:$0xff]  }
0x164b   :  { %4808 = vmatmul.mubr.msk.f32.vlgmr.msra.gmra.mrb[34].mxu1 %vm281_vm9, %v1726_v15 }
0x164c   :  { %4816 = vmatpush3.msra.mxu1 %v1893_v21  ;;  %4817 = vmatprep.mubr.msk.f32.mxu1 %vm5284_vm0, %v5282_v2 }
0x164d   :  { %4828 = vmatprep.subr.bf16.mxu1 %v5282_v2 }
0x164f   :  { %4818 = vmatmul.mubr.msk.f32.vlgmr.msra.gmra.mrb[36].mxu1 %vm281_vm9, %v1891_v1 }
0x1650   :  { %4832 = vmatprep.mubr.msk.bf16.mxu1 %vm5284_vm0, %v5282_v2  ;;  %4829 = vmatpush3.bf16.msra.mxu1 %v5103_v31 }
0x1651   :  { %4830 = vmatprep.subr.bf16.mxu1 %v5282_v2 }
0x1654   :  { %4831 = vmatpush3.bf16.msra.mxu1 %v5104_v13 }
0x16e9   :  { %v1469_v22 = vpop.f32.mrb[30].mxu1 }
0x16ea   :  { %v4789_v23 = vpop.f32.mrb[31].mxu1 }
0x16ed   :  { %v1634_v25 = vpop.f32.mrb[32].mxu1 }
0x16ee   :  { %1969 = vrot.lane.b32.xlu1 %v1634_v25, %s5297_s19  ;;  %v4799_v26 = vpop.f32.mrb[33].mxu1 }
0x171e   :  { %v1799_v33 = vpop.f32.mrb[34].mxu1 }
0x171f   :  { %1973 = vrot.lane.b32.xlu0 %v1799_v33, %s5296_s18  ;;  %v4809_v35 = vpop.f32.mrb[35].mxu1  ;;  %v5107_v33 = vld [vmem:[%s6233_s4 + $0x90] sm:$0xff]  }
0x1720   :  { %v5108_v35 = vld [vmem:[%s6233_s4 + $0x98] sm:$0xff]  }
0x1722   :  { %v1964_v36 = vpop.f32.mrb[36].mxu1 }
0x1723   :  { %1977 = vrot.lane.b32.xlu1 %v1964_v36, %s5298_s24  ;;  %v4819_v37 = vpop.f32.mrb[37].mxu1  ;;  %v5813_v36 = vrot.slane %v5659_v32, %v1043_v9 }
0x1760   :  { %v1970_v61 = vpop.permute.xlu1 %1969 }
0x1761   :  { %v1980_v42 = vsel %vm281_vm9, %v1469_v22, %v1970_v61  ;;  %v5783_v22 = vrot.slane %v5659_v32, %v1037_v59  ;;  %v5106_v59 = vld [vmem:[%s6233_s4 + $0x88] sm:$0xff]  }
0x1791   :  { %v1974_v38 = vpop.permute.xlu0 %1973 }
0x1792   :  { %v1981_v44 = vsel %vm952_vm10, %v1980_v42, %v1974_v38 }
0x1795   :  { %v1978_v47 = vpop.permute.xlu1 %1977 }
0x1796   :  { %v1982_v51 = vsel %vm954_vm11, %v1981_v44, %v1978_v47 }
0x1797   :  { %v1983_v53 = vpack.c.bf16 %v1982_v51, %v1982_v51 }
0x1799   :  { %4825 = vmatmul.mubr.msk.bf16.vlgmr.msra.gmra.mrb[20].mxu0 %vm162_vm8, %v1983_v53 }
0x179a   :  { %4844 = vmatprep.mubr.msk.bf16.mxu0 %vm5284_vm0, %v5282_v2  ;;  %4837 = vmatpush3.bf16.msra.mxu0 %v5105_v58 }
0x179b   :  { %4838 = vmatprep.subr.bf16.mxu0 %v5282_v2 }
0x179e   :  { %4839 = vmatpush3.bf16.msra.mxu0 %v5106_v59  ;;  %v5217_v59 = vld [vmem:[%s6233_s4] sm:$0xff]  }
0x179f   :  { %4840 = vmatprep.subr.bf16.mxu0 %v5282_v2 }
0x17a2   :  { %4841 = vmatpush3.bf16.msra.mxu0 %v5107_v33  ;;  %v5218_v33 = vld [vmem:[%s6233_s4 + $0x8] sm:$0xff]  }
0x17a3   :  { %4842 = vmatprep.subr.bf16.mxu0 %v5282_v2 }
0x17a6   :  { %4843 = vmatpush3.bf16.msra.mxu0 %v5108_v35  ;;  %v5831_v35 = vrot.slane %v5659_v32, %v1130_v56  ;;  %v4487_v56 = vld [vmem:[%s6230_s1 + $0x8] sm:$0xff] }
0x17a7   :  { %4879 = vmatprep.subr.bf16.mxu0 %v5282_v2 }
0x186c   :  { %v2037_v46 = vpop.f32.mrb[20].mxu0 }
0x186d   :  { %v2038_v55 = vadd.f32 %v2037_v46, %v5762_v54  ;;  %v4826_v62 = vpop.f32.mrb[21].mxu0 }
0x186e   :  { %v2040_v0 = vpop.f32.mrb[22].mxu0 }
0x186f   :  { %v4827_v3 = vpop.f32.mrb[23].mxu0  ;;  %v2043_v4 = vadd.f32 %v2038_v55, %v5649_v29 }
0x1871   :  { %v2044_v5 = vsel %vm162_vm8, %v2043_v4, 0.0 }
0x1872   :  { %2045 = vadd.xlane.f32.xlu0 %v2044_v5 }
0x18ff   :  { %v2046_v7 = vpop.xlane.xlu0 %2045 }
0x1900   :  { %v2047_v8 = vmul.f32 0.03125, %v2046_v7 }
0x1902   :  { %v2048_v11 = vsub.f32 %v2043_v4, %v2047_v8 }
0x1904   :  { %v2049_v34 = vmul.f32 %v2048_v11, %v2048_v11 }
0x1906   :  { %v2050_v12 = vsel %vm162_vm8, %v2049_v34, 0.0 }
0x1907   :  { %2051 = vadd.xlane.f32.xlu1 %v2050_v12 }
0x1994   :  { %v2052_v29 = vpop.xlane.xlu1 %2051 }
0x1995   :  { %v2053_v52 = vmul.f32 0.03125, %v2052_v29 }
0x1997   :  { %v2054_v15 = vadd.f32 1e-12, %v2053_v52 }
0x1999   :  { %5151 = vrsqrt.f32 %v2054_v15 }
0x19a3   :  { %v5152_v21 = vpop.eup %5151 }
0x19a4   :  { %v2056_v1 = vmul.f32 %v5152_v21, %v2048_v11 }
0x19a6   :  { %v2061_v23 = vmul.f32 %v5778_v20, %v2056_v1 }
0x19a8   :  { %v5787_v25 = vadd.f32 %v5783_v22, %v2061_v23 }
0x19aa   :  { %v2067_v26 = vpack.c.bf16 %v5787_v25, %v5787_v25 }
0x19ac   :  { %4833 = vmatmul.mubr.msk.bf16.vlgmr.msra.gmra.mrb[40].mxu1 %vm162_vm8, %v2067_v26 }
0x19ad   :  { %4856 = vmatprep.mubr.msk.f32.mxu1 %vm5284_vm0, %v5282_v2 }
0x1a7f   :  { %v2121_v37 = vpop.f32.mrb[40].mxu1 }
0x1a80   :  { %v2122_v61 = vadd.f32 %v2121_v37, %v5813_v36  ;;  %v4834_v38 = vpop.f32.mrb[41].mxu1 }
0x1a81   :  { %v2124_v42 = vpop.f32.mrb[42].mxu1 }
0x1a82   :  { %v2128_v44 = vmul.f32 0.70710677, %v2122_v61  ;;  %v4835_v47 = vpop.f32.mrb[43].mxu1  ;;  %v2127_v1 = vmul.f32 0.5, %v2122_v61 }
0x1a84   :  { %v2131_v51 = vand.u32 2147483647, %v2128_v44  ;;  %vm2129_vm14 = vcmp.ge.f32.partialorder %v2128_v44, 0.0 }
0x1a85   :  { %v2130_v15 = vsel %vm2129_vm14, 1.0, %v5299_v45  ;;  %vm4382_vm14 = vcmask 1040384  }
0x1a86   :  { %v2132_v53 = vmul.f32 0.3275911, %v2131_v51  ;;  %v2145_v55 = vsub.f32 0.0, %v2131_v51 }
0x1a88   :  { %v2133_v46 = vadd.f32 1.0, %v2132_v53  ;;  %v2146_v0 = vmul.f32 %v2145_v55, %v2131_v51 }
0x1a8a   :  { %5153 = vrcp.f32 %v2133_v46  ;;  %v2147_v5 = vmul.f32 1.442695, %v2146_v0 }
0x1a8c   :  { %5155 = vpow2.f32 %v2147_v5 }
0x1a94   :  { %v5154_v62 = vpop.eup %5153 }
0x1a95   :  { %v2136_v3 = vmul.f32 1.0614054, %v5154_v62 }
0x1a96   :  { %v5156_v13 = vpop.eup %5155 }
0x1a97   :  { %v2137_v4 = vadd.f32 -1.4531521, %v2136_v3 }
0x1a99   :  { %v2138_v7 = vmul.f32 %v5154_v62, %v2137_v4  ;;  %v5843_v4 = vrot.slane %v5659_v32, %v5420_v39  ;;  %v2258_v39 = vld [vmem:[%s6235_s6] sm:$0xff] }
0x1a9b   :  { %v2139_v9 = vadd.f32 1.4214138, %v2138_v7 }
0x1a9d   :  { %v2140_v8 = vmul.f32 %v5154_v62, %v2139_v9  ;;  %v5847_v9 = vrot.slane %v5659_v32, %v5423_v40  ;;  %v2260_v40 = vld [vmem:[%s6235_s6 + $0x10] sm:$0xff]  ;;  %v5300_v32 = vmov 0.0|0.0  }
0x1a9e   :  { %5042 = vmatprep.subr.bf16.mxu1 %v5300_v32 }
0x1a9f   :  { %v2141_v11 = vadd.f32 -0.28449672, %v2140_v8 }
0x1aa1   :  { %v2142_v34 = vmul.f32 %v5154_v62, %v2141_v11 }
0x1aa3   :  { %v2143_v12 = vadd.f32 0.2548296, %v2142_v34 }
0x1aa5   :  { %v2144_v31 = vmul.f32 %v5154_v62, %v2143_v12  ;;  %v2370_v12 = vadd.s32 100, %v4487_v56 }
0x1aa7   :  { %v2149_v29 = vmul.f32 %v5156_v13, %v2144_v31  ;;  %v2259_v31 = vld [vmem:[%s6235_s6 + $0x8] sm:$0xff] }
0x1aa8   :  { %v5862_v13 = vpack.c.bf16 %v2259_v31, %v2258_v39 }
0x1aa9   :  { %v2150_v52 = vsub.f32 1.0, %v2149_v29  ;;  %v2261_v29 = vld [vmem:[%s6235_s6 + $0x18] sm:$0xff] }
0x1aaa   :  { %5044 = vmatpush3.bf16.msra.mxu1 %v5862_v13 }
0x1aab   :  { %v2151_v21 = vmul.f32 %v2150_v52, %v2130_v15  ;;  %v5868_v52 = vpack.c.bf16 %v2261_v29, %v2260_v40  ;;  %5045 = vmatprep.subr.bf16.mxu1 %v5300_v32 }
0x1aad   :  { %v2152_v23 = vadd.f32 1.0, %v2151_v21 }
0x1aae   :  { %5047 = vmatpush3.bf16.msra.mxu1 %v5868_v52 }
0x1aaf   :  { %v2153_v26 = vmul.f32 %v2152_v23, %v2127_v1  ;;  %4859 = vmatprep.subr.bf16.mxu1 %v5282_v2 }
0x1ab1   :  { %v2154_v58 = vpack.c.bf16 %v2153_v26, %v2153_v26  ;;  %v5219_v26 = vld [vmem:[%s6232_s3] sm:$0xff]  }
0x1ab3   :  { %4845 = vmatmul.mubr.msk.bf16.vlgmr.msra.gmra.mrb[24].mxu0 %vm1156_vm13, %v2154_v58  ;;  %v5220_v58 = vld [vmem:[%s6232_s3 + $0x8] sm:$0xff]  }
0x1ab4   :  { %4880 = vmatpush3.bf16.msra.mxu0 %v5217_v59  ;;  %4883 = vmatprep.mubr.msk.bf16.mxu0 %vm5284_vm0, %v5282_v2  ;;  %v5221_v59 = vld [vmem:[%s6232_s3 + $0x10] sm:$0xff]  }
0x1ab5   :  { %4881 = vmatprep.subr.bf16.mxu0 %v5282_v2 }
0x1ab8   :  { %4882 = vmatpush3.bf16.msra.mxu0 %v5218_v33  ;;  %v5222_v33 = vld [vmem:[%s6232_s3 + $0x18] sm:$0xff]  }
0x1ab9   :  { %4887 = vmatprep.subr.mxu0 %v5282_v2 }
0x1b86   :  { %v2220_v37 = vpop.f32.mrb[24].mxu0 }
0x1b87   :  { %v2221_v61 = vadd.f32 %v2220_v37, %v5831_v35  ;;  %v4846_v38 = vpop.f32.mrb[25].mxu0 }
0x1b88   :  { %v2223_v42 = vpop.f32.mrb[26].mxu0  ;;  %v5223_v38 = vld [vmem:[%s6232_s3 + $0x20] sm:$0xff]  }
0x1b89   :  { %v4847_v44 = vpop.f32.mrb[27].mxu0  ;;  %v2226_v47 = vadd.f32 %v2221_v61, %v5787_v25  ;;  %v5224_v42 = vld [vmem:[%s6232_s3 + $0x28] sm:$0xff]  }
0x1b8a   :  { %v5225_v44 = vld [vmem:[%s6232_s3 + $0x30] sm:$0xff]  }
0x1b8b   :  { %v2227_v51 = vsel %vm162_vm8, %v2226_v47, 0.0 }
0x1b8c   :  { %2228 = vadd.xlane.f32.xlu0 %v2227_v51 }
0x1c19   :  { %v2229_v53 = vpop.xlane.xlu0 %2228 }
0x1c1a   :  { %v2230_v46 = vmul.f32 0.03125, %v2229_v53 }
0x1c1c   :  { %v2231_v55 = vsub.f32 %v2226_v47, %v2230_v46 }
0x1c1e   :  { %v2232_v62 = vmul.f32 %v2231_v55, %v2231_v55 }
0x1c20   :  { %v2233_v16 = vsel %vm162_vm8, %v2232_v62, 0.0 }
0x1c21   :  { %2234 = vadd.xlane.f32.xlu0 %v2233_v16 }
0x1c37   :  { %2367 = vperm.xlu0 %5078, %v4487_v56  }
0x1c3b   :  { %5080 = vset.pattern.permute.xlu0 %v5283_v6 }
0x1cae   :  { %v2235_v0 = vpop.xlane.xlu0 %2234 }
0x1caf   :  { %v2236_v3 = vmul.f32 0.03125, %v2235_v0 }
0x1cb1   :  { %v2237_v25 = vadd.f32 1e-12, %v2236_v3 }
0x1cb3   :  { %5157 = vrsqrt.f32 %v2237_v25 }
0x1cb6   :  { %v2368_v61 = vpop.permute.xlu0 %2367 }
0x1cb7   :  { %vm2369_vm3 = vcmp.eq.s32.totalorder %v5396_v19, %v2368_v61 }
0x1cbd   :  { %v5158_v5 = vpop.eup %5157 }
0x1cbe   :  { %v2239_v7 = vmul.f32 %v5158_v5, %v2231_v55 }
0x1cc0   :  { %v2244_v8 = vmul.f32 %v5843_v4, %v2239_v7 }
0x1cc2   :  { %v2249_v11 = vadd.f32 %v5847_v9, %v2244_v8 }
0x1cc4   :  { %v2250_v6 = vmul.f32 %v2249_v11, %v2249_v11 }
0x1cc6   :  { %v2252_v34 = vsel %vm2251_vm15, %v2250_v6, 0.0 }
0x1cc7   :  { %2253 = vadd.xlane.f32.xlu1 %v2252_v34 }
0x1cd8   :  { %2372 = vperm.xlu1 %5079, %v2370_v12  }
0x1d54   :  { %v2254_v15 = vpop.xlane.xlu1 %2253 }
0x1d55   :  { %v2255_v21 = vadd.f32 1e-12, %v2254_v15 }
0x1d57   :  { %5159 = vrsqrt.f32 %v2255_v21 }
0x1d58   :  { %v2373_v37 = vpop.permute.xlu1 %2372 }
0x1d59   :  { %vm2374_vm1 = vcmp.eq.s32.totalorder %v5396_v19, %v2373_v37 }
0x1d5a   :  { %vm2375_vm4 = vmor %vm2369_vm3, %vm2374_vm1 }
0x1d5b   :  { %vm2376_vm5 = vmor %vm2375_vm4, %vm64_vm2 }
0x1d5c   :  { %v4488_v47 = vsel %vm2376_vm5, 1.0, %v5282_v2 }
0x1d5d   :  { %v2379_v51 = vpack.c.bf16 %v4488_v47, %v4488_v47 }
0x1d61   :  { %v5160_v1 = vpop.eup %5159 }
0x1d62   :  { %v2257_v23 = vmul.f32 %v5160_v1, %v2249_v11 }
0x1d64   :  { %4857 = vmatmul.mubr.msk.f32.vlgmr.msra.gmra.mrb[38].mxu1 %vm162_vm8, %v2257_v23  ;;  %v4490_v23 = vld [vmem:[%s6231_s2 + $0x1] sm:$0x1] }
0x1d65   :  { %4860 = vmatpush3.bf16.msra.mxu1 %v5219_v26  ;;  %4875 = vmatprep.mubr.msk.bf16.mxu1 %vm5284_vm0, %v5282_v2  ;;  %v2440_v26 = vsub.f32 1.0, %v4490_v23  ;;  %v5227_v23 = vld [vmem:[%s6233_s4 + $0x18] sm:$0xff]  }
0x1d66   :  { %4861 = vmatprep.subr.bf16.mxu1 %v5282_v2 }
0x1d69   :  { %4862 = vmatpush3.bf16.msra.mxu1 %v5220_v58  ;;  %v2441_v58 = vmul.f32 -1e+09, %v2440_v26 }
0x1d6a   :  { %4863 = vmatprep.subr.bf16.mxu1 %v5282_v2 }
0x1d6d   :  { %4864 = vmatpush3.bf16.msra.mxu1 %v5221_v59  ;;  %v5948_v59 = vrot.slane %v2441_v58, %v5441_v48 }
0x1d6e   :  { %4865 = vmatprep.subr.bf16.mxu1 %v5282_v2 }
0x1d71   :  { %4866 = vmatpush3.bf16.msra.mxu1 %v5222_v33 }
0x1d72   :  { %4867 = vmatprep.subr.bf16.mxu1 %v5282_v2 }
0x1d75   :  { %4868 = vmatpush3.bf16.msra.mxu1 %v5223_v38 }
0x1d76   :  { %4869 = vmatprep.subr.bf16.mxu1 %v5282_v2 }
0x1d79   :  { %4870 = vmatpush3.bf16.msra.mxu1 %v5224_v42 }
0x1d7a   :  { %4871 = vmatprep.subr.bf16.mxu1 %v5282_v2 }
0x1d7d   :  { %4872 = vmatpush3.bf16.msra.mxu1 %v5225_v44 }
0x1d7e   :  { %4873 = vmatprep.subr.bf16.mxu1 %v5282_v2 }
0x1d81   :  { %4874 = vmatpush3.bf16.msra.mxu1 %v5387_v14 }
0x1d82   :  { %4912 = vmatprep.subr.mxu1 %v5282_v2 }
0x1d84   :  { %4876 = vmatmul.mubr.msk.bf16.vlgmr.msra.gmra.mrb[44].mxu1 %vm114_vm7, %v2379_v51 }
0x1d85   :  { %4914 = vmatprep.mubr.msk.f32.mxu1 %vm5284_vm0, %v5282_v2 }
0x1e37   :  { %v5915_v18 = vpop.f32.mrb[38].mxu1 }
0x1e38   :  { %v4858_v53 = vpop.f32.mrb[39].mxu1 }
0x1e57   :  { %v2417_v46 = vpop.f32.mrb[44].mxu1 }
0x1e58   :  { %v4877_v55 = vpop.f32.mrb[45].mxu1  ;;  %v2423_v62 = vsel %vm162_vm8, %v2417_v46, 0.0 }
0x1e59   :  { %2424 = vadd.xlane.f32.xlu1 %v2423_v62  ;;  %v2420_v16 = vpop.f32.mrb[46].mxu1 }
0x1e5a   :  { %v4878_v56 = vpop.f32.mrb[47].mxu1 }
0x1ee6   :  { %v2425_v0 = vpop.xlane.xlu1 %2424 }
0x1ee7   :  { %v2426_v3 = vmul.f32 0.03125, %v2425_v0 }
0x1ee9   :  { %v2427_v14 = vsub.f32 %v2417_v46, %v2426_v3 }
0x1eeb   :  { %v2428_v25 = vmul.f32 %v2427_v14, %v2427_v14 }
0x1eed   :  { %v2429_v5 = vsel %vm162_vm8, %v2428_v25, 0.0 }
0x1eee   :  { %2430 = vadd.xlane.f32.xlu0 %v2429_v5 }
0x1f7b   :  { %v2431_v7 = vpop.xlane.xlu0 %2430 }
0x1f7c   :  { %v2432_v8 = vmul.f32 0.03125, %v2431_v7 }
0x1f7e   :  { %v2433_v11 = vadd.f32 1e-12, %v2432_v8 }
0x1f80   :  { %5161 = vrsqrt.f32 %v2433_v11 }
0x1f8a   :  { %v5162_v6 = vpop.eup %5161 }
0x1f8b   :  { %v2435_v34 = vmul.f32 %v5162_v6, %v2427_v14 }
0x1f8d   :  { %v2436_v12 = vmul.f32 %v2435_v34, %v5426_v41 }
0x1f8f   :  { %v5921_v39 = vadd.f32 %v2436_v12, %v5429_v43 }
0x1f91   :  { %v2442_v31 = vpack.c.bf16 %v5921_v39, %v5921_v39 }
0x1f93   :  { %4884 = vmatmul.mubr.msk.bf16.vlgmr.msra.gmra.mrb[28].mxu0 %vm162_vm8, %v2442_v31 }
0x1f94   :  { %4889 = vmatprep.mubr.msk.f32.mxu0 %vm5284_vm0, %v5282_v2 }
0x2066   :  { %v2480_v40 = vpop.f32.mrb[28].mxu0 }
0x2067   :  { %v5929_v29 = vadd.f32 %v2480_v40, %v5450_v50  ;;  %v4885_v15 = vpop.f32.mrb[29].mxu0 }
0x2068   :  { %v2483_v21 = vpop.f32.mrb[30].mxu0 }
0x2069   :  { %2582 = vrot.lane.b32.xlu0 %v5929_v29, %s5286_s8  ;;  %2494 = vrot.lane.b32.xlu1 %v5929_v29, %s5285_s29  ;;  %v4886_v41 = vpop.f32.mrb[31].mxu0  ;;  %v2486_v1 = vmul.f32 0.35355338, %v5929_v29 }
0x206d   :  { %2660 = vrot.lane.b32.xlu0 %v5929_v29, %s5288_s10 }
0x20db   :  { %v2495_v43 = vpop.permute.xlu1 %2494  ;;  %v2583_v50 = vpop.permute.xlu0 %2582 }
0x20dc   :  { %4888 = vmatpush3.xpose.msk.msra.mxu0 %vm281_vm9, %v2495_v43 }
0x20dd   :  { %4892 = vmatprep.subr.mxu0 %v5282_v2 }
0x20df   :  { %4890 = vmatmul.mubr.msk.f32.vlgmr.msra.gmra.mrb[18].mxu0 %vm281_vm9, %v2486_v1  ;;  %v2661_v46 = vpop.permute.xlu0 %2660 }
0x20e0   :  { %4893 = vmatpush3.msra.mxu0 %v2583_v50  ;;  %4894 = vmatprep.mubr.msk.f32.mxu0 %vm5284_vm0, %v5282_v2  ;;  %v5226_v50 = vld [vmem:[%s6233_s4 + $0x10] sm:$0xff]  }
0x20e1   :  { %4897 = vmatprep.subr.mxu0 %v5282_v2 }
0x21b2   :  { %v2567_v33 = vpop.f32.mrb[18].mxu0 }
0x21b3   :  { %v2568_v37 = vadd.f32 %v2567_v33, %v5948_v59  ;;  %v4891_v61 = vpop.f32.mrb[19].mxu0 }
0x21b5   :  { %v2571_v38 = vsel %vm281_vm9, %v2568_v37, -inf }
0x21b6   :  { %2572 = vmax.xlane.f32.xlu1 %v2571_v38 }
0x2243   :  { %v2573_v42 = vpop.xlane.xlu1 %2572 }
0x2244   :  { %v2574_v44 = vsub.f32 %v2568_v37, %v2573_v42 }
0x2246   :  { %v2575_v47 = vmul.f32 1.442695, %v2574_v44 }
0x2248   :  { %5163 = vpow2.f32 %v2575_v47 }
0x2252   :  { %v5164_v51 = vpop.eup %5163 }
0x2253   :  { %v2577_v53 = vsel %vm281_vm9, %v5164_v51, 0.0 }
0x2254   :  { %2578 = vadd.xlane.f32.xlu0 %v2577_v53 }
0x226a   :  { %2658 = vrot.lane.b32.xlu0 %v2486_v1, %s5287_s9 }
0x22e1   :  { %v2579_v48 = vpop.xlane.xlu0 %2578 }
0x22e2   :  { %5165 = vrcp.f32 %v2579_v48 }
0x22e5   :  { %v2659_v16 = vpop.permute.xlu0 %2658 }
0x22ec   :  { %v5166_v55 = vpop.eup %5165 }
0x22ed   :  { %v2581_v62 = vmul.f32 %v5166_v55, %v5164_v51 }
0x22ef   :  { %4895 = vmatmul.mubr.msk.f32.vlgmr.msra.gmra.mrb[32].mxu0 %vm281_vm9, %v2581_v62 }
0x22f0   :  { %4898 = vmatpush3.xpose.msk.msra.mxu0 %vm281_vm9, %v2661_v46  ;;  %4899 = vmatprep.mubr.msk.f32.mxu0 %vm5284_vm0, %v5282_v2 }
0x22f1   :  { %4902 = vmatprep.subr.mxu0 %v5282_v2 }
0x22f3   :  { %4900 = vmatmul.mubr.msk.f32.vlgmr.msra.gmra.mrb[34].mxu0 %vm281_vm9, %v2659_v16 }
0x22f4   :  { %4904 = vmatprep.mubr.msk.f32.mxu0 %vm5284_vm0, %v5282_v2 }
0x23c2   :  { %v5962_v56 = vpop.f32.mrb[32].mxu0 }
0x23c3   :  { %v4896_v0 = vpop.f32.mrb[33].mxu0 }
0x23c6   :  { %v2732_v3 = vpop.f32.mrb[34].mxu0 }
0x23c7   :  { %v2733_v14 = vadd.f32 %v2732_v3, %v5948_v59  ;;  %v4901_v25 = vpop.f32.mrb[35].mxu0 }
0x23c9   :  { %v2736_v5 = vsel %vm281_vm9, %v2733_v14, -inf }
0x23ca   :  { %2737 = vmax.xlane.f32.xlu1 %v2736_v5 }
0x23db   :  { %2747 = vrot.lane.b32.xlu1 %v5929_v29, %s5289_s11 }
0x23df   :  { %2825 = vrot.lane.b32.xlu1 %v5929_v29, %s5291_s13 }
0x23e3   :  { %2823 = vrot.lane.b32.xlu1 %v2486_v1, %s5290_s12 }
0x23e7   :  { %2990 = vrot.lane.b32.xlu1 %v5929_v29, %s5294_s16 }
0x2457   :  { %v2738_v7 = vpop.xlane.xlu1 %2737 }
0x2458   :  { %v2739_v8 = vsub.f32 %v2733_v14, %v2738_v7 }
0x245a   :  { %v2740_v11 = vmul.f32 1.442695, %v2739_v8 }
0x245b   :  { %v2748_v6 = vpop.permute.xlu1 %2747 }
0x245c   :  { %5167 = vpow2.f32 %v2740_v11  ;;  %4903 = vmatpush3.msra.mxu0 %v2748_v6 }
0x245d   :  { %4907 = vmatprep.subr.mxu0 %v5282_v2 }
0x245f   :  { %v2826_v40 = vpop.permute.xlu1 %2825 }
0x2463   :  { %v2824_v21 = vpop.permute.xlu1 %2823 }
0x2466   :  { %v5168_v34 = vpop.eup %5167 }
0x2467   :  { %v2742_v12 = vsel %vm281_vm9, %v5168_v34, 0.0  ;;  %v2991_v43 = vpop.permute.xlu1 %2990 }
0x2468   :  { %2743 = vadd.xlane.f32.xlu0 %v2742_v12 }
0x247e   :  { %2988 = vrot.lane.b32.xlu0 %v2486_v1, %s5293_s15 }
0x24f5   :  { %v2744_v31 = vpop.xlane.xlu0 %2743 }
0x24f6   :  { %5169 = vrcp.f32 %v2744_v31  ;;  %v5228_v31 = vld [vmem:[%s6233_s4 + $0x20] sm:$0xff]  }
0x24f9   :  { %v2989_v1 = vpop.permute.xlu0 %2988 }
0x2500   :  { %v5170_v15 = vpop.eup %5169 }
0x2501   :  { %v2746_v41 = vmul.f32 %v5170_v15, %v5168_v34 }
0x2503   :  { %4905 = vmatmul.mubr.msk.f32.vlgmr.msra.gmra.mrb[36].mxu0 %vm281_vm9, %v2746_v41 }
0x2504   :  { %4908 = vmatpush3.xpose.msk.msra.mxu0 %vm281_vm9, %v2826_v40  ;;  %4909 = vmatprep.mubr.msk.f32.mxu0 %vm5284_vm0, %v5282_v2  ;;  %v5229_v40 = vld [vmem:[%s6233_s4 + $0x28] sm:$0xff]  }
0x2505   :  { %4917 = vmatprep.subr.mxu0 %v5282_v2 }
0x2507   :  { %4910 = vmatmul.mubr.msk.f32.vlgmr.msra.gmra.mrb[38].mxu0 %vm281_vm9, %v2824_v21 }
0x2508   :  { %4918 = vmatpush3.xpose.msk.msra.mxu0 %vm281_vm9, %v2991_v43  ;;  %4919 = vmatprep.mubr.msk.f32.mxu0 %vm5284_vm0, %v5282_v2 }
0x2509   :  { %4927 = vmatprep.subr.bf16.mxu0 %v5282_v2 }
0x250b   :  { %4920 = vmatmul.mubr.msk.f32.vlgmr.msra.gmra.mrb[40].mxu0 %vm281_vm9, %v2989_v1 }
0x250c   :  { %4928 = vmatpush3.bf16.msra.mxu0 %v5226_v50  ;;  %4931 = vmatprep.mubr.msk.bf16.mxu0 %vm5284_vm0, %v5282_v2 }
0x250d   :  { %4929 = vmatprep.subr.bf16.mxu0 %v5282_v2 }
0x2510   :  { %4930 = vmatpush3.bf16.msra.mxu0 %v5227_v23 }
0x2511   :  { %4943 = vmatprep.subr.bf16.mxu0 %v5282_v2 }
0x25d6   :  { %v2819_v26 = vpop.f32.mrb[36].mxu0 }
0x25d7   :  { %v4906_v58 = vpop.f32.mrb[37].mxu0 }
0x25da   :  { %v2897_v33 = vpop.f32.mrb[38].mxu0 }
0x25db   :  { %v2898_v37 = vadd.f32 %v2897_v33, %v5948_v59  ;;  %v4911_v61 = vpop.f32.mrb[39].mxu0 }
0x25dc   :  { %v5230_v61 = vld [vmem:[%s6233_s4 + $0x30] sm:$0xff]  }
0x25dd   :  { %v2901_v38 = vsel %vm281_vm9, %v2898_v37, -inf }
0x25de   :  { %2902 = vmax.xlane.f32.xlu1 %v2901_v38  ;;  %v3062_v42 = vpop.f32.mrb[40].mxu0  ;;  %v5232_v38 = vld [vmem:[%s6233_s4 + $0x40] sm:$0xff]  }
0x25df   :  { %v3063_v44 = vadd.f32 %v3062_v42, %v5948_v59  ;;  %v4921_v47 = vpop.f32.mrb[41].mxu0  ;;  %v5233_v42 = vld [vmem:[%s6233_s4 + $0x48] sm:$0xff]  }
0x25e1   :  { %v3066_v51 = vsel %vm281_vm9, %v3063_v44, -inf }
0x25e2   :  { %3067 = vmax.xlane.f32.xlu0 %v3066_v51 }
0x25f8   :  { %3077 = vrot.lane.b32.xlu0 %v5929_v29, %s5295_s17 }
0x266b   :  { %v2903_v53 = vpop.xlane.xlu1 %2902 }
0x266c   :  { %v2904_v46 = vsub.f32 %v2898_v37, %v2903_v53 }
0x266e   :  { %v2905_v48 = vmul.f32 1.442695, %v2904_v46 }
0x266f   :  { %v3068_v55 = vpop.xlane.xlu0 %3067 }
0x2670   :  { %5171 = vpow2.f32 %v2905_v48  ;;  %v3069_v62 = vsub.f32 %v3063_v44, %v3068_v55 }
0x2672   :  { %v3070_v16 = vmul.f32 1.442695, %v3069_v62 }
0x2673   :  { %v3078_v34 = vpop.permute.xlu0 %3077 }
0x2674   :  { %5173 = vpow2.f32 %v3070_v16 }
0x267a   :  { %v5172_v0 = vpop.eup %5171 }
0x267b   :  { %v2907_v3 = vsel %vm281_vm9, %v5172_v0, 0.0 }
0x267c   :  { %2908 = vadd.xlane.f32.xlu1 %v2907_v3 }
0x267e   :  { %v5174_v14 = vpop.eup %5173 }
0x267f   :  { %v3072_v25 = vsel %vm281_vm9, %v5174_v14, 0.0 }
0x2680   :  { %3073 = vadd.xlane.f32.xlu1 %v3072_v25 }
0x2691   :  { %2912 = vrot.lane.b32.xlu1 %v5929_v29, %s5292_s14 }
0x2695   :  { %3154 = vrot.lane.b32.xlu1 %v2819_v26, %s5297_s19 }
0x2709   :  { %v2909_v5 = vpop.xlane.xlu1 %2908 }
0x270a   :  { %5175 = vrcp.f32 %v2909_v5 }
0x270d   :  { %v3074_v7 = vpop.xlane.xlu1 %3073 }
0x270e   :  { %5177 = vrcp.f32 %v3074_v7 }
0x2711   :  { %v2913_v8 = vpop.permute.xlu1 %2912 }
0x2712   :  { %4913 = vmatpush3.msra.mxu1 %v2913_v8 }
0x2713   :  { %4922 = vmatprep.subr.mxu1 %v5282_v2 }
0x2714   :  { %v5176_v11 = vpop.eup %5175 }
0x2715   :  { %v2911_v6 = vmul.f32 %v5176_v11, %v5172_v0  ;;  %v3155_v1 = vpop.permute.xlu1 %3154 }
0x2716   :  { %v3165_v23 = vsel %vm281_vm9, %v5962_v56, %v3155_v1  ;;  %v5231_v56 = vld [vmem:[%s6233_s4 + $0x38] sm:$0xff]  }
0x2717   :  { %4915 = vmatmul.mubr.msk.f32.vlgmr.msra.gmra.mrb[48].mxu1 %vm281_vm9, %v2911_v6 }
0x2718   :  { %v5178_v12 = vpop.eup %5177  ;;  %4923 = vmatpush3.msra.mxu1 %v3078_v34  ;;  %4924 = vmatprep.mubr.msk.f32.mxu1 %vm5284_vm0, %v5282_v2  ;;  %v5234_v34 = vld [vmem:[%s6233_s4 + $0x50] sm:$0xff]  }
0x2719   :  { %v3076_v29 = vmul.f32 %v5178_v12, %v5174_v14  ;;  %4935 = vmatprep.subr.bf16.mxu1 %v5282_v2  ;;  %v5235_v12 = vld [vmem:[%s6233_s4 + $0x58] sm:$0xff]  }
0x271b   :  { %4925 = vmatmul.mubr.msk.f32.vlgmr.msra.gmra.mrb[50].mxu1 %vm281_vm9, %v3076_v29 }
0x271c   :  { %4936 = vmatpush3.bf16.msra.mxu1 %v5228_v31  ;;  %4939 = vmatprep.mubr.msk.bf16.mxu1 %vm5284_vm0, %v5282_v2 }
0x271d   :  { %4937 = vmatprep.subr.bf16.mxu1 %v5282_v2 }
0x2720   :  { %4938 = vmatpush3.bf16.msra.mxu1 %v5229_v40 }
0x2721   :  { %4955 = vmatprep.subr.bf16.mxu1 %v5282_v2 }
0x27ea   :  { %v2984_v15 = vpop.f32.mrb[48].mxu1 }
0x27eb   :  { %3158 = vrot.lane.b32.xlu1 %v2984_v15, %s5296_s18  ;;  %v4916_v21 = vpop.f32.mrb[49].mxu1 }
0x27ee   :  { %v3149_v41 = vpop.f32.mrb[50].mxu1 }
0x27ef   :  { %3162 = vrot.lane.b32.xlu1 %v3149_v41, %s5298_s24  ;;  %v4926_v43 = vpop.f32.mrb[51].mxu1 }
0x285d   :  { %v3159_v50 = vpop.permute.xlu1 %3158 }
0x285e   :  { %v3166_v26 = vsel %vm952_vm10, %v3165_v23, %v3159_v50 }
0x2861   :  { %v3163_v58 = vpop.permute.xlu1 %3162 }
0x2862   :  { %v3167_v33 = vsel %vm954_vm11, %v3166_v26, %v3163_v58 }
0x2863   :  { %v3168_v37 = vpack.c.bf16 %v3167_v33, %v3167_v33 }
0x2865   :  { %4932 = vmatmul.mubr.msk.bf16.vlgmr.msra.gmra.mrb[44].mxu0 %vm162_vm8, %v3168_v37 }
0x2866   :  { %4944 = vmatpush3.bf16.msra.mxu0 %v5230_v61  ;;  %4951 = vmatprep.mubr.msk.bf16.mxu0 %vm5284_vm0, %v5282_v2 }
0x2867   :  { %4945 = vmatprep.subr.bf16.mxu0 %v5282_v2 }
0x286a   :  { %4946 = vmatpush3.bf16.msra.mxu0 %v5231_v56 }
0x286b   :  { %4947 = vmatprep.subr.bf16.mxu0 %v5282_v2 }
0x286e   :  { %4948 = vmatpush3.bf16.msra.mxu0 %v5232_v38 }
0x286f   :  { %4949 = vmatprep.subr.bf16.mxu0 %v5282_v2 }
0x2872   :  { %4950 = vmatpush3.bf16.msra.mxu0 %v5233_v42 }
0x2873   :  { %4973 = vmatprep.subr.mxu0 %v5282_v2 }
0x2938   :  { %v3206_v44 = vpop.f32.mrb[44].mxu0 }
0x2939   :  { %v3207_v47 = vadd.f32 %v3206_v44, %v5559_v17  ;;  %v4933_v51 = vpop.f32.mrb[45].mxu0 }
0x293a   :  { %v3209_v53 = vpop.f32.mrb[46].mxu0 }
0x293b   :  { %v4934_v46 = vpop.f32.mrb[47].mxu0  ;;  %v3212_v48 = vadd.f32 %v3207_v47, %v5921_v39 }
0x293d   :  { %v3213_v55 = vsel %vm162_vm8, %v3212_v48, 0.0 }
0x293e   :  { %3214 = vadd.xlane.f32.xlu1 %v3213_v55 }
0x29cb   :  { %v3215_v62 = vpop.xlane.xlu1 %3214 }
0x29cc   :  { %v3216_v16 = vmul.f32 0.03125, %v3215_v62 }
0x29ce   :  { %v3217_v0 = vsub.f32 %v3212_v48, %v3216_v16 }
0x29d0   :  { %v3218_v3 = vmul.f32 %v3217_v0, %v3217_v0 }
0x29d2   :  { %v3219_v14 = vsel %vm162_vm8, %v3218_v3, 0.0 }
0x29d3   :  { %3220 = vadd.xlane.f32.xlu0 %v3219_v14 }
0x2a60   :  { %v3221_v25 = vpop.xlane.xlu0 %3220 }
0x2a61   :  { %v3222_v5 = vmul.f32 0.03125, %v3221_v25 }
0x2a63   :  { %v3223_v7 = vadd.f32 1e-12, %v3222_v5 }
0x2a65   :  { %5179 = vrsqrt.f32 %v3223_v7 }
0x2a6f   :  { %v5180_v17 = vpop.eup %5179 }
0x2a70   :  { %v3225_v8 = vmul.f32 %v5180_v17, %v3217_v0 }
0x2a72   :  { %v3226_v11 = vmul.f32 %v3225_v8, %v5578_v57 }
0x2a74   :  { %v3227_v39 = vadd.f32 %v3226_v11, %v5583_v63 }
0x2a76   :  { %v3228_v6 = vpack.c.bf16 %v3227_v39, %v3227_v39 }
0x2a78   :  { %4940 = vmatmul.mubr.msk.bf16.vlgmr.msra.gmra.mrb[52].mxu1 %vm162_vm8, %v3228_v6 }
0x2a79   :  { %4956 = vmatpush3.bf16.msra.mxu1 %v5234_v34  ;;  %4959 = vmatprep.mubr.msk.bf16.mxu1 %vm5284_vm0, %v5282_v2 }
0x2a7a   :  { %4957 = vmatprep.subr.bf16.mxu1 %v5282_v2 }
0x2a7d   :  { %4958 = vmatpush3.bf16.msra.mxu1 %v5235_v12 }
0x2a7e   :  { %4963 = vmatprep.subr.mxu1 %v5282_v2 }
0x2b4b   :  { %v3266_v57 = vpop.f32.mrb[52].mxu1 }
0x2b4c   :  { %v3267_v63 = vadd.f32 %v3266_v57, %v5614_v10  ;;  %v4941_v29 = vpop.f32.mrb[53].mxu1 }
0x2b4d   :  { %v3269_v31 = vpop.f32.mrb[54].mxu1 }
0x2b4e   :  { %v3273_v40 = vmul.f32 0.70710677, %v3267_v63  ;;  %v4942_v15 = vpop.f32.mrb[55].mxu1  ;;  %v3272_v55 = vmul.f32 0.5, %v3267_v63 }
0x2b50   :  { %v3276_v21 = vand.u32 2147483647, %v3273_v40  ;;  %vm3274_vm2 = vcmp.ge.f32.partialorder %v3273_v40, 0.0 }
0x2b51   :  { %v3275_v46 = vsel %vm3274_vm2, 1.0, %v5299_v45 }
0x2b52   :  { %v3277_v41 = vmul.f32 0.3275911, %v3276_v21  ;;  %v3290_v1 = vsub.f32 0.0, %v3276_v21 }
0x2b54   :  { %v3278_v43 = vadd.f32 1.0, %v3277_v41  ;;  %v3291_v23 = vmul.f32 %v3290_v1, %v3276_v21 }
0x2b56   :  { %5181 = vrcp.f32 %v3278_v43  ;;  %v3292_v33 = vmul.f32 1.442695, %v3291_v23 }
0x2b58   :  { %5183 = vpow2.f32 %v3292_v33 }
0x2b60   :  { %v5182_v50 = vpop.eup %5181 }
0x2b61   :  { %v3281_v26 = vmul.f32 1.0614054, %v5182_v50 }
0x2b62   :  { %v5184_v47 = vpop.eup %5183 }
0x2b63   :  { %v3282_v58 = vadd.f32 -1.4531521, %v3281_v26 }
0x2b65   :  { %v3283_v37 = vmul.f32 %v5182_v50, %v3282_v58 }
0x2b67   :  { %v3284_v61 = vadd.f32 1.4214138, %v3283_v37 }
0x2b69   :  { %v3285_v56 = vmul.f32 %v5182_v50, %v3284_v61 }
0x2b6b   :  { %v3286_v38 = vadd.f32 -0.28449672, %v3285_v56 }
0x2b6d   :  { %v3287_v10 = vmul.f32 %v5182_v50, %v3286_v38 }
0x2b6f   :  { %v3288_v42 = vadd.f32 0.2548296, %v3287_v10 }
0x2b71   :  { %v3289_v44 = vmul.f32 %v5182_v50, %v3288_v42 }
0x2b73   :  { %v3294_v51 = vmul.f32 %v5184_v47, %v3289_v44 }
0x2b75   :  { %v3295_v53 = vsub.f32 1.0, %v3294_v51 }
0x2b77   :  { %v3296_v48 = vmul.f32 %v3295_v53, %v3275_v46 }
0x2b79   :  { %v3297_v62 = vadd.f32 1.0, %v3296_v48 }
0x2b7b   :  { %v3298_v16 = vmul.f32 %v3297_v62, %v3272_v55 }
0x2b7d   :  { %v3299_v0 = vpack.c.bf16 %v3298_v16, %v3298_v16 }
0x2b7f   :  { %4952 = vmatmul.mubr.msk.bf16.vlgmr.msra.gmra.mrb[48].mxu0 %vm1156_vm13, %v3299_v0 }
0x2b80   :  { %4975 = vmatprep.mubr.msk.f32.mxu0 %vm5284_vm0, %v5282_v2 }
0x2c52   :  { %v3337_v3 = vpop.f32.mrb[48].mxu0 }
0x2c53   :  { %v3338_v14 = vadd.f32 %v3337_v3, %v5625_v60  ;;  %v4953_v25 = vpop.f32.mrb[49].mxu0 }
0x2c54   :  { %v3340_v5 = vpop.f32.mrb[50].mxu0 }
0x2c55   :  { %v4954_v7 = vpop.f32.mrb[51].mxu0  ;;  %v3343_v17 = vadd.f32 %v3338_v14, %v3227_v39 }
0x2c57   :  { %v3344_v8 = vsel %vm162_vm8, %v3343_v17, 0.0 }
0x2c58   :  { %3345 = vadd.xlane.f32.xlu0 %v3344_v8 }
0x2ce5   :  { %v3346_v11 = vpop.xlane.xlu0 %3345 }
0x2ce6   :  { %v3347_v6 = vmul.f32 0.03125, %v3346_v11 }
0x2ce8   :  { %v3348_v34 = vsub.f32 %v3343_v17, %v3347_v6 }
0x2cea   :  { %v3349_v12 = vmul.f32 %v3348_v34, %v3348_v34 }
0x2cec   :  { %v3350_v57 = vsel %vm162_vm8, %v3349_v12, 0.0 }
0x2ced   :  { %3351 = vadd.xlane.f32.xlu0 %v3350_v57 }
0x2d7a   :  { %v3352_v63 = vpop.xlane.xlu0 %3351 }
0x2d7b   :  { %v3353_v29 = vmul.f32 0.03125, %v3352_v63 }
0x2d7d   :  { %v3354_v31 = vadd.f32 1e-12, %v3353_v29 }
0x2d7f   :  { %5185 = vrsqrt.f32 %v3354_v31 }
0x2d89   :  { %v5186_v40 = vpop.eup %5185 }
0x2d8a   :  { %v3356_v60 = vmul.f32 %v5186_v40, %v3348_v34 }
0x2d8c   :  { %v3357_v15 = vmul.f32 %v3356_v60, %v5641_v24 }
0x2d8e   :  { %v6076_v39 = vadd.f32 %v3357_v15, %v5645_v27 }
0x2d90   :  { %v3359_v21 = vpack.c.bf16 %v6076_v39, %v6076_v39 }
0x2d92   :  { %4960 = vmatmul.mubr.msk.bf16.vlgmr.msra.gmra.mrb[56].mxu1 %vm162_vm8, %v3359_v21 }
0x2d93   :  { %4965 = vmatprep.mubr.msk.f32.mxu1 %vm5284_vm0, %v5282_v2 }
0x2e65   :  { %v3397_v41 = vpop.f32.mrb[56].mxu1 }
0x2e66   :  { %v6084_v43 = vadd.f32 %v3397_v41, %v5663_v49  ;;  %v4961_v1 = vpop.f32.mrb[57].mxu1 }
0x2e67   :  { %v3400_v50 = vpop.f32.mrb[58].mxu1 }
0x2e68   :  { %3571 = vrot.lane.b32.xlu0 %v6084_v43, %s5288_s10  ;;  %3405 = vrot.lane.b32.xlu1 %v6084_v43, %s5285_s29  ;;  %v4962_v24 = vpop.f32.mrb[59].mxu1  ;;  %v3403_v27 = vmul.f32 0.35355338, %v6084_v43 }
0x2e6c   :  { %3901 = vrot.lane.b32.xlu0 %v6084_v43, %s5294_s16  ;;  %3736 = vrot.lane.b32.xlu1 %v6084_v43, %s5291_s13 }
0x2e70   :  { %3569 = vrot.lane.b32.xlu1 %v3403_v27, %s5287_s9 }
0x2e74   :  { %3734 = vrot.lane.b32.xlu1 %v3403_v27, %s5290_s12 }
0x2e78   :  { %3899 = vrot.lane.b32.xlu1 %v3403_v27, %s5293_s15 }
0x2eda   :  { %v3572_v49 = vpop.permute.xlu0 %3571  ;;  %v3406_v23 = vpop.permute.xlu1 %3405 }
0x2edb   :  { %4964 = vmatpush3.xpose.msk.msra.mxu1 %vm281_vm9, %v3406_v23  ;;  %4974 = vmatpush3.xpose.msk.msra.mxu0 %vm281_vm9, %v3572_v49 }
0x2edc   :  { %4983 = vmatprep.subr.mxu0 %v5282_v2  ;;  %4968 = vmatprep.subr.mxu1 %v5282_v2 }
0x2ede   :  { %v3737_v26 = vpop.permute.xlu1 %3736  ;;  %4966 = vmatmul.mubr.msk.f32.vlgmr.msra.gmra.mrb[60].mxu1 %vm281_vm9, %v3403_v27  ;;  %v3902_v37 = vpop.permute.xlu0 %3901 }
0x2edf   :  { %4970 = vmatprep.mubr.msk.f32.mxu1 %vm5284_vm0, %v5282_v2 }
0x2ee2   :  { %v3570_v58 = vpop.permute.xlu1 %3569 }
0x2ee3   :  { %4976 = vmatmul.mubr.msk.f32.vlgmr.msra.gmra.mrb[42].mxu0 %vm281_vm9, %v3570_v58 }
0x2ee4   :  { %4984 = vmatpush3.xpose.msk.msra.mxu0 %vm281_vm9, %v3737_v26  ;;  %4985 = vmatprep.mubr.msk.f32.mxu0 %vm5284_vm0, %v5282_v2 }
0x2ee5   :  { %4993 = vmatprep.subr.mxu0 %v5282_v2 }
0x2ee6   :  { %v3735_v33 = vpop.permute.xlu1 %3734 }
0x2ee7   :  { %4986 = vmatmul.mubr.msk.f32.vlgmr.msra.gmra.mrb[52].mxu0 %vm281_vm9, %v3735_v33 }
0x2ee8   :  { %4994 = vmatpush3.xpose.msk.msra.mxu0 %vm281_vm9, %v3902_v37  ;;  %4995 = vmatprep.mubr.msk.f32.mxu0 %vm5284_vm0, %v5282_v2 }
0x2ee9   :  { %5003 = vmatprep.subr.bf16.mxu0 %v5282_v2 }
0x2eea   :  { %v3900_v61 = vpop.permute.xlu1 %3899 }
0x2eeb   :  { %4996 = vmatmul.mubr.msk.f32.vlgmr.msra.gmra.mrb[54].mxu0 %vm281_vm9, %v3900_v61 }
0x2eec   :  { %5004 = vmatpush3.bf16.msra.mxu0 %v5740_v28  ;;  %5007 = vmatprep.mubr.msk.bf16.mxu0 %vm5284_vm0, %v5282_v2 }
0x2eed   :  { %5005 = vmatprep.subr.bf16.mxu0 %v5282_v2 }
0x2ef0   :  { %5006 = vmatpush3.bf16.msra.mxu0 %v5747_v30 }
0x2ef1   :  { %5019 = vmatprep.subr.bf16.mxu0 %v5282_v2 }
0x2fb1   :  { %v3478_v56 = vpop.f32.mrb[60].mxu1 }
0x2fb2   :  { %v3479_v38 = vadd.f32 %v3478_v56, %v5948_v59  ;;  %v4967_v10 = vpop.f32.mrb[61].mxu1 }
0x2fb4   :  { %v3482_v42 = vsel %vm281_vm9, %v3479_v38, -inf }
0x2fb5   :  { %3483 = vmax.xlane.f32.xlu0 %v3482_v42  ;;  %v5236_v42 = vld [vmem:[%s6233_s4 + $0x70] sm:$0xff]  }
0x2fb6   :  { %v3643_v44 = vpop.f32.mrb[42].mxu0 }
0x2fb7   :  { %v3644_v47 = vadd.f32 %v3643_v44, %v5948_v59  ;;  %v4977_v28 = vpop.f32.mrb[43].mxu0  ;;  %v5237_v44 = vld [vmem:[%s6233_s4 + $0x78] sm:$0xff]  }
0x2fb9   :  { %v3647_v51 = vsel %vm281_vm9, %v3644_v47, -inf }
0x2fba   :  { %3648 = vmax.xlane.f32.xlu1 %v3647_v51  ;;  %v3808_v53 = vpop.f32.mrb[52].mxu0 }
0x2fbb   :  { %v3809_v46 = vadd.f32 %v3808_v53, %v5948_v59  ;;  %v4987_v30 = vpop.f32.mrb[53].mxu0 }
0x2fbd   :  { %v3812_v48 = vsel %vm281_vm9, %v3809_v46, -inf }
0x2fbe   :  { %3813 = vmax.xlane.f32.xlu0 %v3812_v48  ;;  %v3973_v55 = vpop.f32.mrb[54].mxu0 }
0x2fbf   :  { %v3974_v62 = vadd.f32 %v3973_v55, %v5948_v59  ;;  %v4997_v16 = vpop.f32.mrb[55].mxu0 }
0x2fc1   :  { %v3977_v0 = vsel %vm281_vm9, %v3974_v62, -inf }
0x2fc2   :  { %3978 = vmax.xlane.f32.xlu0 %v3977_v0 }
0x3042   :  { %v3484_v3 = vpop.xlane.xlu0 %3483 }
0x3043   :  { %v3485_v14 = vsub.f32 %v3479_v38, %v3484_v3 }
0x3045   :  { %v3486_v25 = vmul.f32 1.442695, %v3485_v14 }
0x3047   :  { %5187 = vpow2.f32 %v3486_v25  ;;  %v3649_v5 = vpop.xlane.xlu1 %3648 }
0x3048   :  { %v3650_v7 = vsub.f32 %v3644_v47, %v3649_v5 }
0x304a   :  { %v3651_v17 = vmul.f32 1.442695, %v3650_v7  ;;  %v5238_v7 = vld [vmem:[%s6233_s4 + $0x80] sm:$0xff]  }
0x304b   :  { %v3814_v8 = vpop.xlane.xlu0 %3813 }
0x304c   :  { %5189 = vpow2.f32 %v3651_v17  ;;  %v3815_v11 = vsub.f32 %v3809_v46, %v3814_v8  ;;  %v5239_v17 = vld [vmem:[%s6233_s4 + $0x88] sm:$0xff]   ;;  %v5240_v8 = vld [vmem:[%s6233_s4 + $0x90] sm:$0xff]  }
0x304e   :  { %v3816_v6 = vmul.f32 1.442695, %v3815_v11  ;;  %v5241_v11 = vld [vmem:[%s6233_s4 + $0x98] sm:$0xff]   ;;  %s2354_s4 = sld [smem:[#allocation3]] }
0x304f   :  { %v3979_v31 = vpop.xlane.xlu0 %3978 }
0x3050   :  { %5191 = vpow2.f32 %v3816_v6  ;;  %v3980_v40 = vsub.f32 %v3974_v62, %v3979_v31 }
0x3051   :  { %v5188_v34 = vpop.eup %5187 }
0x3052   :  { %v3488_v12 = vsel %vm281_vm9, %v5188_v34, 0.0  ;;  %v3981_v60 = vmul.f32 1.442695, %v3980_v40 }
0x3053   :  { %3489 = vadd.xlane.f32.xlu0 %v3488_v12 }
0x3054   :  { %5193 = vpow2.f32 %v3981_v60 }
0x3056   :  { %v5190_v59 = vpop.eup %5189 }
0x3057   :  { %v3653_v57 = vsel %vm281_vm9, %v5190_v59, 0.0 }
0x3058   :  { %3654 = vadd.xlane.f32.xlu1 %v3653_v57 }
0x305a   :  { %v5192_v63 = vpop.eup %5191 }
0x305b   :  { %v3818_v29 = vsel %vm281_vm9, %v5192_v63, 0.0 }
0x305c   :  { %3819 = vadd.xlane.f32.xlu0 %v3818_v29 }
0x305e   :  { %v5194_v15 = vpop.eup %5193 }
0x305f   :  { %v3983_v21 = vsel %vm281_vm9, %v5194_v15, 0.0 }
0x3069   :  { %3658 = vrot.lane.b32.xlu1 %v6084_v43, %s5289_s11 }
0x306d   :  { %3823 = vrot.lane.b32.xlu1 %v6084_v43, %s5292_s14 }
0x3072   :  { %3493 = vrot.lane.b32.xlu0 %v6084_v43, %s5286_s8 }
0x3091   :  { %3984 = vadd.xlane.f32.xlu1 %v3983_v21 }
0x30a2   :  { %3988 = vrot.lane.b32.xlu1 %v6084_v43, %s5295_s17 }
0x30e0   :  { %v3490_v41 = vpop.xlane.xlu0 %3489 }
0x30e1   :  { %5195 = vrcp.f32 %v3490_v41 }
0x30e5   :  { %v3655_v1 = vpop.xlane.xlu1 %3654 }
0x30e6   :  { %5197 = vrcp.f32 %v3655_v1 }
0x30e9   :  { %v3820_v50 = vpop.xlane.xlu0 %3819  ;;  %v3659_v49 = vpop.permute.xlu1 %3658 }
0x30ea   :  { %5199 = vrcp.f32 %v3820_v50 }
0x30eb   :  { %v5196_v24 = vpop.eup %5195 }
0x30ec   :  { %v3492_v27 = vmul.f32 %v5196_v24, %v5188_v34 }
0x30ed   :  { %v3494_v23 = vpop.permute.xlu0 %3493  ;;  %v3824_v58 = vpop.permute.xlu1 %3823 }
0x30ee   :  { %4969 = vmatpush3.msra.mxu1 %v3494_v23 }
0x30ef   :  { %4971 = vmatmul.mubr.msk.f32.vlgmr.msra.gmra.mrb[62].mxu1 %vm281_vm9, %v3492_v27  ;;  %4978 = vmatprep.subr.mxu1 %v5282_v2 }
0x30f0   :  { %v5198_v26 = vpop.eup %5197  ;;  %4979 = vmatpush3.msra.mxu1 %v3659_v49  ;;  %4980 = vmatprep.mubr.msk.f32.mxu1 %vm5284_vm0, %v5282_v2 }
0x30f1   :  { %v3657_v43 = vmul.f32 %v5198_v26, %v5190_v59  ;;  %4988 = vmatprep.subr.mxu1 %v5282_v2 }
0x30f3   :  { %4981 = vmatmul.mubr.msk.f32.vlgmr.msra.gmra.mrb[64].mxu1 %vm281_vm9, %v3657_v43 }
0x30f4   :  { %v5200_v33 = vpop.eup %5199  ;;  %4989 = vmatpush3.msra.mxu1 %v3824_v58  ;;  %4990 = vmatprep.mubr.msk.f32.mxu1 %vm5284_vm0, %v5282_v2 }
0x30f5   :  { %v3822_v37 = vmul.f32 %v5200_v33, %v5192_v63  ;;  %4998 = vmatprep.subr.mxu1 %v5282_v2 }
0x30f7   :  { %4991 = vmatmul.mubr.msk.f32.vlgmr.msra.gmra.mrb[66].mxu1 %vm281_vm9, %v3822_v37 }
0x30f8   :  { %5000 = vmatprep.mubr.msk.f32.mxu1 %vm5284_vm0, %v5282_v2 }
0x311e   :  { %v3985_v61 = vpop.xlane.xlu1 %3984 }
0x311f   :  { %5201 = vrcp.f32 %v3985_v61 }
0x3122   :  { %v3989_v56 = vpop.permute.xlu1 %3988 }
0x3123   :  { %4999 = vmatpush3.msra.mxu1 %v3989_v56 }
0x3124   :  { %5011 = vmatprep.subr.bf16.mxu1 %v5282_v2 }
0x3129   :  { %v5202_v38 = vpop.eup %5201 }
0x312a   :  { %v3987_v10 = vmul.f32 %v5202_v38, %v5194_v15 }
0x312c   :  { %5001 = vmatmul.mubr.msk.f32.vlgmr.msra.gmra.mrb[68].mxu1 %vm281_vm9, %v3987_v10 }
0x312d   :  { %5012 = vmatpush3.bf16.msra.mxu1 %v5236_v42  ;;  %5015 = vmatprep.mubr.msk.bf16.mxu1 %vm5284_vm0, %v5282_v2 }
0x312e   :  { %5013 = vmatprep.subr.bf16.mxu1 %v5282_v2 }
0x3131   :  { %5014 = vmatpush3.bf16.msra.mxu1 %v5237_v44 }
0x3132   :  { %5048 = vmatprep.subr.bf16.mxu1 %v5300_v32 }
0x31c2   :  { %v3565_v47 = vpop.f32.mrb[62].mxu1 }
0x31c3   :  { %v4972_v28 = vpop.f32.mrb[63].mxu1 }
0x31c6   :  { %v3730_v51 = vpop.f32.mrb[64].mxu1 }
0x31c7   :  { %4065 = vrot.lane.b32.xlu0 %v3730_v51, %s5297_s19  ;;  %v4982_v53 = vpop.f32.mrb[65].mxu1  ;;  %s4526_s19 = sld [smem:[#allocation3 + $0x1]] }
0x31ca   :  { %v3895_v46 = vpop.f32.mrb[66].mxu1 }
0x31cb   :  { %4069 = vrot.lane.b32.xlu1 %v3895_v46, %s5296_s18  ;;  %v4992_v30 = vpop.f32.mrb[67].mxu1 }
0x31ff   :  { %v4060_v48 = vpop.f32.mrb[68].mxu1 }
0x3200   :  { %4073 = vrot.lane.b32.xlu0 %v4060_v48, %s5298_s24  ;;  %v5002_v55 = vpop.f32.mrb[69].mxu1  ;;  %s5301_s24 = smov [#allocation4]  }
0x3201   :  { %s4392_s5 = sshll.u32 %s5301_s24, 4  ;;  %s4393_s5 = int_to_ptr.vmem [resolvable:$true] %s4392_s5 }
0x3202   :  { %s5254_s22 = scalar_lea.vmem %s4393_s5, 32  ;;  %p5259_p6 = scmp.lt.s32.totalorder %s4393_s5, %s4393_s5 }
0x3203   :  { %p5255_p5 = scmp.ne.s32.totalorder %s4393_s5, %s5254_s22  ;;  %p5260_p7 = scmp.lt.s32.totalorder %s5254_s22, %s5254_s22 }
0x3205   :  { %p5261_p8 = por %p5260_p7, %p5259_p6 }
0x3207   :  { %p5262_p9 = pnand %p5261_p8, %p5255_p5 }
0x3239   :  { %v4066_v62 = vpop.permute.xlu0 %4065 }
0x323a   :  { %v4076_v0 = vsel %vm281_vm9, %v3565_v47, %v4066_v62 }
0x323d   :  { %v4070_v16 = vpop.permute.xlu1 %4069 }
0x323e   :  { %v4077_v3 = vsel %vm952_vm10, %v4076_v0, %v4070_v16 }
0x3272   :  { %v4074_v14 = vpop.permute.xlu0 %4073 }
0x3273   :  { %v4078_v25 = vsel %vm954_vm11, %v4077_v3, %v4074_v14 }
0x3274   :  { %v4079_v5 = vpack.c.bf16 %v4078_v25, %v4078_v25 }
0x3276   :  { %5008 = vmatmul.mubr.msk.bf16.vlgmr.msra.gmra.mrb[56].mxu0 %vm162_vm8, %v4079_v5 }
0x3277   :  { %5020 = vmatpush3.bf16.msra.mxu0 %v5238_v7  ;;  %5027 = vmatprep.mubr.msk.bf16.mxu0 %vm5284_vm0, %v5282_v2 }
0x3278   :  { %5021 = vmatprep.subr.bf16.mxu0 %v5282_v2 }
0x327b   :  { %5022 = vmatpush3.bf16.msra.mxu0 %v5239_v17 }
0x327c   :  { %5023 = vmatprep.subr.bf16.mxu0 %v5282_v2 }
0x327f   :  { %5024 = vmatpush3.bf16.msra.mxu0 %v5240_v8 }
0x3280   :  { %5025 = vmatprep.subr.bf16.mxu0 %v5282_v2 }
0x3283   :  { %5026 = vmatpush3.bf16.msra.mxu0 %v5241_v11 }
0x3349   :  { %v4117_v6 = vpop.f32.mrb[56].mxu0 }
0x334a   :  { %v4118_v34 = vadd.f32 %v4117_v6, %v5762_v54  ;;  %v5009_v12 = vpop.f32.mrb[57].mxu0 }
0x334b   :  { %v4120_v59 = vpop.f32.mrb[58].mxu0 }
0x334c   :  { %v4123_v57 = vadd.f32 %v4118_v34, %v6076_v39  ;;  %v5010_v63 = vpop.f32.mrb[59].mxu0 }
0x334e   :  { %v4124_v29 = vsel %vm162_vm8, %v4123_v57, 0.0 }
0x334f   :  { %4125 = vadd.xlane.f32.xlu1 %v4124_v29 }
0x33dc   :  { %v4126_v31 = vpop.xlane.xlu1 %4125 }
0x33dd   :  { %v4127_v40 = vmul.f32 0.03125, %v4126_v31 }
0x33df   :  { %v4128_v60 = vsub.f32 %v4123_v57, %v4127_v40 }
0x33e1   :  { %v4129_v15 = vmul.f32 %v4128_v60, %v4128_v60 }
0x33e3   :  { %v4130_v21 = vsel %vm162_vm8, %v4129_v15, 0.0 }
0x33e4   :  { %4131 = vadd.xlane.f32.xlu0 %v4130_v21 }
0x3471   :  { %v4132_v41 = vpop.xlane.xlu0 %4131 }
0x3472   :  { %v4133_v1 = vmul.f32 0.03125, %v4132_v41 }
0x3474   :  { %v4134_v50 = vadd.f32 1e-12, %v4133_v1 }
0x3476   :  { %5203 = vrsqrt.f32 %v4134_v50 }
0x3480   :  { %v5204_v54 = vpop.eup %5203 }
0x3481   :  { %v4136_v24 = vmul.f32 %v5204_v54, %v4128_v60 }
0x3483   :  { %v4137_v27 = vmul.f32 %v4136_v24, %v5778_v20 }
0x3485   :  { %v4138_v39 = vadd.f32 %v4137_v27, %v5783_v22  ;;  %v4484_v27 = vclamps-f32 %v5915_v18, 1.0 }
0x3487   :  { %v4139_v49 = vpack.c.bf16 %v4138_v39, %v4138_v39  ;;  %vm2351_vm12 = vcmp.gt.f32.partialorder %v4484_v27, -0.87758255 }
0x3489   :  { %5016 = vmatmul.mubr.msk.bf16.vlgmr.msra.gmra.mrb[72].mxu1 %vm162_vm8, %v4139_v49 }
0x348a   :  { %5050 = vmatpush3.bf16.msra.mxu1 %v5862_v13  ;;  %5039 = vmatprep.mubr.msk.f32.mxu1 %vm5284_vm0, %v5282_v2 }
0x348b   :  { %5051 = vmatprep.subr.bf16.mxu1 %v5300_v32 }
0x348e   :  { %5053 = vmatpush3.bf16.msra.mxu1 %v5868_v52 }
0x355c   :  { %v4177_v23 = vpop.f32.mrb[72].mxu1 }
0x355d   :  { %v4178_v26 = vadd.f32 %v4177_v23, %v5813_v36  ;;  %v5017_v43 = vpop.f32.mrb[73].mxu1 }
0x355e   :  { %v4180_v58 = vpop.f32.mrb[74].mxu1 }
0x355f   :  { %v4184_v20 = vmul.f32 0.70710677, %v4178_v26  ;;  %v5018_v33 = vpop.f32.mrb[75].mxu1  ;;  %v4183_v16 = vmul.f32 0.5, %v4178_v26 }
0x3561   :  { %v4187_v22 = vand.u32 2147483647, %v4184_v20  ;;  %vm4185_vm0 = vcmp.ge.f32.partialorder %v4184_v20, 0.0 }
0x3562   :  { %v4186_v55 = vsel %vm4185_vm0, 1.0, %v5299_v45 }
0x3563   :  { %v4188_v37 = vmul.f32 0.3275911, %v4187_v22  ;;  %v4201_v56 = vsub.f32 0.0, %v4187_v22 }
0x3565   :  { %v4189_v61 = vadd.f32 1.0, %v4188_v37  ;;  %v4202_v38 = vmul.f32 %v4201_v56, %v4187_v22 }
0x3567   :  { %5205 = vrcp.f32 %v4189_v61  ;;  %v4203_v44 = vmul.f32 1.442695, %v4202_v38  ;;  %v2355_v38 = vstv %s2354_s4 }
0x3569   :  { %5207 = vpow2.f32 %v4203_v44  ;;  %v2348_v44 = vmul.f32 0.87758255, %v4484_v27 }
0x3571   :  { %v5206_v13 = vpop.eup %5205 }
0x3572   :  { %v4192_v10 = vmul.f32 1.0614054, %v5206_v13 }
0x3573   :  { %v5208_v46 = vpop.eup %5207 }
0x3574   :  { %v4193_v42 = vadd.f32 -1.4531521, %v4192_v10 }
0x3576   :  { %v4194_v32 = vmul.f32 %v5206_v13, %v4193_v42  ;;  %v4370_v42 = vstv %s4526_s19 }
0x3577   :  { %vm4371_vm9 = vcmp.eq.s32.totalorder %v5396_v19, %v4370_v42 }
0x3578   :  { %v4195_v47 = vadd.f32 1.4214138, %v4194_v32 }
0x357a   :  { %v4196_v52 = vmul.f32 %v5206_v13, %v4195_v47 }
0x357c   :  { %v4197_v28 = vadd.f32 -0.28449672, %v4196_v52 }
0x357e   :  { %v4198_v36 = vmul.f32 %v5206_v13, %v4197_v28 }
0x3580   :  { %v4199_v51 = vadd.f32 0.2548296, %v4198_v36 }
0x3582   :  { %v4200_v53 = vmul.f32 %v5206_v13, %v4199_v51  ;;  %v4485_v51 = vadd.f32 -0.23971277, %v4484_v27 }
0x3584   :  { %v4205_v30 = vmul.f32 %v5208_v46, %v4200_v53  ;;  %v4527_v46 = vsel %vm4371_vm9, 1.0, %v5282_v2 }
0x3586   :  { %v4206_v48 = vsub.f32 1.0, %v4205_v30 }
0x3588   :  { %v4207_v62 = vmul.f32 %v4206_v48, %v4186_v55 }
0x358a   :  { %v4208_v0 = vadd.f32 1.0, %v4207_v62 }
0x358c   :  { %v4209_v3 = vmul.f32 %v4208_v0, %v4183_v16  ;;  %v4375_v0 = vsub.f32 1.0, %v4527_v46 }
0x358e   :  { %v4210_v14 = vpack.c.bf16 %v4209_v3, %v4209_v3 }
0x3590   :  { %5028 = vmatmul.mubr.msk.bf16.vlgmr.msra.gmra.mrb[60].mxu0 %vm1156_vm13, %v4210_v14 }
0x3663   :  { %v4248_v25 = vpop.f32.mrb[60].mxu0 }
0x3664   :  { %v4249_v5 = vadd.f32 %v4248_v25, %v5831_v35  ;;  %v5029_v7 = vpop.f32.mrb[61].mxu0 }
0x3665   :  { %v4251_v17 = vpop.f32.mrb[62].mxu0 }
0x3666   :  { %v4254_v8 = vadd.f32 %v4249_v5, %v4138_v39  ;;  %v5030_v11 = vpop.f32.mrb[63].mxu0  ;;  %v2337_v39 = vmul.f32 %v4484_v27, %v4484_v27 }
0x3668   :  { %v4255_v6 = vsel %vm162_vm8, %v4254_v8, 0.0  ;;  %v2338_v49 = vsub.f32 1.0, %v2337_v39 }
0x3669   :  { %4256 = vadd.xlane.f32.xlu0 %v4255_v6 }
0x366a   :  { %v2339_v23 = vmax.f32 %v2338_v49, 0.0 }
0x366c   :  { %v2340_v26 = vmin.f32 %v2339_v23, 1.0 }
0x366e   :  { %vm2343_vm6 = vcmp.eq.f32.partialorder %v2340_v26, inf  ;;  %v2346_v18 = vand.u32 2147483648, %v2340_v26  ;;  %vm2345_vm7 = vcmp.eq.f32.partialorder %v2340_v26, 0.0 }
0x36f6   :  { %v4257_v34 = vpop.xlane.xlu0 %4256 }
0x36f7   :  { %v4258_v12 = vmul.f32 0.03125, %v4257_v34 }
0x36f9   :  { %v4259_v45 = vsub.f32 %v4254_v8, %v4258_v12 }
0x36fb   :  { %v4260_v59 = vmul.f32 %v4259_v45, %v4259_v45 }
0x36fd   :  { %v4261_v57 = vsel %vm162_vm8, %v4260_v59, 0.0 }
0x36fe   :  { %4262 = vadd.xlane.f32.xlu0 %v4261_v57 }
0x378b   :  { %v4263_v63 = vpop.xlane.xlu0 %4262 }
0x378c   :  { %v4264_v29 = vmul.f32 0.03125, %v4263_v63 }
0x378e   :  { %v4265_v31 = vadd.f32 1e-12, %v4264_v29 }
0x3790   :  { %5209 = vrsqrt.f32 %v4265_v31 }
0x379a   :  { %v5210_v40 = vpop.eup %5209 }
0x379b   :  { %v4267_v35 = vmul.f32 %v5210_v40, %v4259_v45 }
0x379d   :  { %v4268_v60 = vmul.f32 %v4267_v35, %v5843_v4 }
0x379f   :  { %v4269_v15 = vadd.f32 %v4268_v60, %v5847_v9 }
0x37a1   :  { %v4270_v21 = vmul.f32 %v4269_v15, %v4269_v15 }
0x37a3   :  { %v4271_v41 = vsel %vm2251_vm15, %v4270_v21, 0.0  ;;  %vm4384_vm15 = vcmask 123904  }
0x37a4   :  { %4272 = vadd.xlane.f32.xlu1 %v4271_v41 }
0x3831   :  { %v4273_v1 = vpop.xlane.xlu1 %4272 }
0x3832   :  { %v4274_v50 = vadd.f32 1e-12, %v4273_v1 }
0x3834   :  { %5211 = vrsqrt.f32 %v4274_v50 }
0x3835   :  { %5213 = vrsqrt.f32 %v2340_v26 }
0x383e   :  { %v5212_v54 = vpop.eup %5211 }
0x383f   :  { %v4276_v24 = vmul.f32 %v5212_v54, %v4269_v15  ;;  %v5214_v20 = vpop.eup %5213 }
0x3840   :  { %v2342_v37 = vmul.f32 %v5214_v20, %v2340_v26 }
0x3841   :  { %5040 = vmatmul.mubr.msk.f32.vlgmr.msra.gmra.mrb[70].mxu1 %vm162_vm8, %v4276_v24  ;;  %vm2356_vm8 = vcmp.eq.s32.totalorder %v5396_v19, %v2355_v38 }
0x3842   :  { %v2344_v56 = vsel %vm2343_vm6, %v2340_v26, %v2342_v37  ;;  %v4486_v36 = vsel %vm2356_vm8, 1.0, %v5282_v2 }
0x3843   :  { %v2347_v13 = vsel %vm2345_vm7, %v2346_v18, %v2344_v56  ;;  %v2360_v16 = vsub.f32 1.0, %v4486_v36 }
0x3844   :  { %v2349_v10 = vmul.f32 0.47942555, %v2347_v13 }
0x3845   :  { %v2361_v5 = vmul.f32 %v4484_v27, %v2360_v16 }
0x3846   :  { %v2350_v47 = vsub.f32 %v2348_v44, %v2349_v10 }
0x3848   :  { %v2353_v62 = vsel %vm2351_vm12, %v2350_v47, %v4485_v51 }
0x3849   :  { %v2359_v14 = vmul.f32 %v4486_v36, %v2353_v62 }
0x384b   :  { %v2362_v8 = vadd.f32 %v2361_v5, %v2359_v14 }
0x384d   :  { %v2363_v2 = vmul.f32 30.0, %v2362_v8 }
0x3914   :  { %v4346_v4 = vpop.f32.mrb[70].mxu1 }
0x3915   :  { %v4524_v9 = vclamps-f32 %v4346_v4, 1.0  ;;  %v5041_v43 = vpop.f32.mrb[71].mxu1 }
0x3917   :  { %v4352_v58 = vmul.f32 %v4524_v9, %v4524_v9  ;;  %v4363_v48 = vmul.f32 0.87758255, %v4524_v9  ;;  %v4525_v19 = vadd.f32 -0.23971277, %v4524_v9  ;;  %vm4366_vm13 = vcmp.gt.f32.partialorder %v4524_v9, -0.87758255 }
0x3918   :  { %v4376_v17 = vmul.f32 %v4524_v9, %v4375_v0 }
0x3919   :  { %v4353_v33 = vsub.f32 1.0, %v4352_v58 }
0x391b   :  { %v4354_v22 = vmax.f32 %v4353_v33, 0.0 }
0x391d   :  { %v4355_v61 = vmin.f32 %v4354_v22, 1.0 }
0x391f   :  { %5215 = vrsqrt.f32 %v4355_v61  ;;  %vm4358_vm10 = vcmp.eq.f32.partialorder %v4355_v61, inf  ;;  %v4361_v28 = vand.u32 2147483648, %v4355_v61  ;;  %vm4360_vm11 = vcmp.eq.f32.partialorder %v4355_v61, 0.0 }
0x3929   :  { %v5216_v32 = vpop.eup %5215 }
0x392a   :  { %v4357_v52 = vmul.f32 %v5216_v32, %v4355_v61 }
0x392c   :  { %v4359_v53 = vsel %vm4358_vm10, %v4355_v61, %v4357_v52 }
0x392d   :  { %v4362_v30 = vsel %vm4360_vm11, %v4361_v28, %v4359_v53 }
0x392e   :  { %v4364_v55 = vmul.f32 0.47942555, %v4362_v30 }
0x3930   :  { %v4365_v3 = vsub.f32 %v4363_v48, %v4364_v55 }
0x3932   :  { %v4368_v25 = vsel %vm4366_vm13, %v4365_v3, %v4525_v19 }
0x3933   :  { %v4374_v7 = vmul.f32 %v4527_v46, %v4368_v25 }
0x3935   :  { %v4377_v11 = vadd.f32 %v4376_v17, %v4374_v7 }
0x3937   :  { %v4378_v6 = vmul.f32 30.0, %v4377_v11 }
0x3939   :  { %v4380_v34 = vrot.slane %v4378_v6, 7 }
0x393b   :  { %v4383_v12 = vsel %vm4382_vm14, %v2363_v2, %v4380_v34 }
0x393c   :  { %4385 = vst.msk [vmem:[#allocation4] sm:$0x3] %vm4384_vm15, %v4383_v12 }
0x393d   :  { %5265 = shalt.err (!%p5262_p9)
}
0x393e   :  { %s5266_s26 = scalar_lea.hbm %s6236_s7, 32 }
0x393f   :  { %p5267_p10 = scmp.ne.s32.totalorder %s6236_s7, %s5266_s26  ;;  %p5270_p11 = scmp.lt.u32.totalorder %s5266_s26, %s6236_s7 }
0x3941   :  { %p5272_p12 = pnand %p5270_p11, %p5267_p10 }
0x3943   :  { %5275 = shalt.err (!%p5272_p12)
}
0x3944   :  { %4395 = dma.vmem_to_hbm [thread:$0]  %s4393_s5, 32, %s6236_s7, [#allocation5]  }
0x3945   :  { %5278 = dma.done.wait [#allocation5], 32  }
0x3946   :  { %5279 = vsyncadd [#allocation5], 4294967264 }
0x3947   :  { %4399 = vsyncpa [#allocation5], 1 }

</bundles_post_ra>
